<compile_context>
chip_gen: v6e
topology: v6e:2x2x1
jax: 0.10.0
libtpu: 0.0.40
codegen_flags: <defaults>
</compile_context>

<pallas_src>
import functools

import jax
import jax.numpy as jnp
from jax.experimental import pallas as pl
from jax.experimental.pallas import tpu as pltpu


# ------------------------------ fused kernel ------------------------------- #

def _spatial_attn_kernel(q_ref, k_ref, v_ref,
                         qw_ref, qb_ref, kw_ref, kb_ref,
                         vw_ref, vb_ref, pw_ref, pb_ref,
                         o_ref,
                         acc_sc, m_sc, l_sc,
                         *, n_heads, scale):
    kv = pl.program_id(1)
    nkv = pl.num_programs(1)

    @pl.when(kv == 0)
    def _init():
        m_sc[...] = jnp.full_like(m_sc, -jnp.inf)
        l_sc[...] = jnp.zeros_like(l_sc)
        acc_sc[...] = jnp.zeros_like(acc_sc)

    # 1x1 depthwise projections == per-channel scale + bias; applied directly
    # on the VMEM tiles (fused, no HBM round-trip).
    q = q_ref[0].astype(jnp.float32) * qw_ref[0] + qb_ref[0]     # (T,  C)
    k = k_ref[0].astype(jnp.float32) * kw_ref[0] + kb_ref[0]     # (TK, C)
    v = v_ref[0].astype(jnp.float32) * vw_ref[0] + vb_ref[0]     # (TK, Cv)

    C = q.shape[-1]
    Cv = v.shape[-1]
    dh = C // n_heads
    dv = Cv // n_heads

    for h in range(n_heads):                       # static, unrolled head loop
        qh = q[:, h * dh:(h + 1) * dh]             # (T,  dh)
        kh = k[:, h * dh:(h + 1) * dh]             # (TK, dh)
        vh = v[:, h * dv:(h + 1) * dv]             # (TK, dv)

        s = jax.lax.dot_general(
            qh, kh, (((1,), (1,)), ((), ())),
            preferred_element_type=jnp.float32) * scale           # (T, TK)

        m_prev = m_sc[h]                                           # (T, 1)
        m_new = jnp.maximum(m_prev, jnp.max(s, axis=-1, keepdims=True))
        alpha = jnp.exp(m_prev - m_new)
        p = jnp.exp(s - m_new)

        l_sc[h] = alpha * l_sc[h] + jnp.sum(p, axis=-1, keepdims=True)
        pv = jnp.dot(p.astype(v_ref.dtype), vh.astype(v_ref.dtype),
                     preferred_element_type=jnp.float32)           # (T, dv)
        acc_sc[h] = alpha * acc_sc[h] + pv
        m_sc[h] = m_new

    @pl.when(kv == nkv - 1)
    def _finalize():
        pw = pw_ref[0]                                             # (Cv,)
        pb = pb_ref[0]
        outs = []
        for h in range(n_heads):
            inv_l = pl.reciprocal(l_sc[h], approx=True)            # EUP slot
            outs.append(acc_sc[h] * inv_l)
        att = jnp.concatenate(outs, axis=-1)                       # (T, Cv)
        # output projection fused in the epilogue, single full-width store
        o_ref[0] = (att * pw + pb).astype(o_ref.dtype)


# --------------------------------- wrapper ---------------------------------- #

def _kv_tile(T, max_tile=512):
    """Largest KV tile <= max_tile that divides T (multiple of 8 when tiling)."""
    if T <= max_tile:
        return T
    for tk in range(max_tile - max_tile % 8, 7, -8):
        if T % tk == 0:
            return tk
    return T


def spatial_attention(q, k, v, params, n_heads):
    """SpatialAttention.forward([q, k, v]) -> (B, T, C_out)."""
    B, T, C = q.shape
    Cv = v.shape[2]
    assert k.shape == (B, T, C)
    assert C % n_heads == 0 and Cv % n_heads == 0
    dh = C // n_heads
    dv = Cv // n_heads
    scale = float(dh) ** -0.5          # matches (c // n_heads) ** -0.5

    TK = _kv_tile(T)
    nkv = T // TK

    kernel = functools.partial(_spatial_attn_kernel,
                               n_heads=n_heads, scale=scale)

    spec_c = pl.BlockSpec((1, C), lambda b, kv: (0, 0))
    spec_cv = pl.BlockSpec((1, Cv), lambda b, kv: (0, 0))

    def vec(name, n):
        return params[name].reshape(1, n)

    return pl.pallas_call(
        kernel,
        out_shape=jax.ShapeDtypeStruct((B, T, Cv), v.dtype),
        grid=(B, nkv),
        in_specs=[
            pl.BlockSpec((1, T, C), lambda b, kv: (b, 0, 0)),      # q (full T)
            pl.BlockSpec((1, TK, C), lambda b, kv: (b, kv, 0)),    # k (kv tile)
            pl.BlockSpec((1, TK, Cv), lambda b, kv: (b, kv, 0)),   # v (kv tile)
            spec_c, spec_c,        # q_w, q_b
            spec_c, spec_c,        # k_w, k_b
            spec_cv, spec_cv,      # v_w, v_b
            spec_cv, spec_cv,      # p_w, p_b
        ],
        out_specs=pl.BlockSpec((1, T, Cv), lambda b, kv: (b, 0, 0)),
        scratch_shapes=[
            pltpu.VMEM((n_heads, T, dv), jnp.float32),   # acc
            pltpu.VMEM((n_heads, T, 1), jnp.float32),    # running max m
            pltpu.VMEM((n_heads, T, 1), jnp.float32),    # running sum l
        ],
        compiler_params=pltpu.CompilerParams(
            dimension_semantics=("parallel", "arbitrary")),
    )(q, k, v,
      vec("q_w", C), vec("q_b", C),
      vec("k_w", C), vec("k_b", C),
      vec("v_w", Cv), vec("v_b", Cv),
      vec("p_w", Cv), vec("p_b", Cv))


# --------------------------- pure-JAX reference ----------------------------- #

def spatial_attention_ref(q, k, v, params, n_heads):
    qp = q * params["q_w"] + params["q_b"]
    kp = k * params["k_w"] + params["k_b"]
    vp = v * params["v_w"] + params["v_b"]
    B, T, C = qp.shape
    Cv = vp.shape[2]
    dh = C // n_heads
    dv = Cv // n_heads
    scale = dh ** -0.5
    qh = qp.reshape(B, T, n_heads, dh).transpose(0, 2, 1, 3)
    kh = kp.reshape(B, T, n_heads, dh).transpose(0, 2, 1, 3)
    vh = vp.reshape(B, T, n_heads, dv).transpose(0, 2, 1, 3)
    s = jnp.einsum("bhqd,bhkd->bhqk", qh, kh) * scale
    p = jax.nn.softmax(s, axis=-1)
    o = jnp.einsum("bhqk,bhkd->bhqd", p, vh)
    o = o.transpose(0, 2, 1, 3).reshape(B, T, Cv)
    return o * params["p_w"] + params["p_b"]


# ----------------------------------- main ----------------------------------- #

if __name__ == "__main__":
    B = 2
    H = W = 8                 # the reference module requires HW a perfect square
    T = H * W                 # 64 tokens
    C_in = 32                 # in_features  (q / k channels)
    C_out = 16                # out_features (v / output channels)
    n_heads = 4

    key = jax.random.PRNGKey(0)
    kq, kk, kv_, kp = jax.random.split(key, 4)
    q = jax.random.normal(kq, (B, T, C_in), jnp.float32)
    k = jax.random.normal(kk, (B, T, C_in), jnp.float32)
    v = jax.random.normal(kv_, (B, T, C_out), jnp.float32)

    pkeys = iter(jax.random.split(kp, 16))

    def nrm(shape, s=0.1):
        return s * jax.random.normal(next(pkeys), shape, jnp.float32)

    params = {
        "q_w": 1.0 + nrm((C_in,)),  "q_b": nrm((C_in,)),
        "k_w": 1.0 + nrm((C_in,)),  "k_b": nrm((C_in,)),
        "v_w": 1.0 + nrm((C_out,)), "v_b": nrm((C_out,)),
        "p_w": 1.0 + nrm((C_out,)), "p_b": nrm((C_out,)),
    }

    out = spatial_attention(q, k, v, params, n_heads)
    out = jax.block_until_ready(out)
    assert out.shape == (B, T, C_out)

    ref = spatial_attention_ref(q, k, v, params, n_heads)
    err = float(jnp.max(jnp.abs(out - ref)))
    assert jnp.allclose(out, ref, atol=2e-2, rtol=2e-2), err

    print("KERNEL_OK")
</pallas_src>

<mosaic_0001>
module attributes {stable_mosaic.version = 11 : i64} {
  func.func @_spatial_attn_kernel(%arg0: i32, %arg1: i32, %arg2: memref<1x64x32xf32, #tpu.memory_space<vmem>>, %arg3: memref<1x64x32xf32, #tpu.memory_space<vmem>>, %arg4: memref<1x64x16xf32, #tpu.memory_space<vmem>>, %arg5: memref<1x32xf32, #tpu.memory_space<vmem>>, %arg6: memref<1x32xf32, #tpu.memory_space<vmem>>, %arg7: memref<1x32xf32, #tpu.memory_space<vmem>>, %arg8: memref<1x32xf32, #tpu.memory_space<vmem>>, %arg9: memref<1x16xf32, #tpu.memory_space<vmem>>, %arg10: memref<1x16xf32, #tpu.memory_space<vmem>>, %arg11: memref<1x16xf32, #tpu.memory_space<vmem>>, %arg12: memref<1x16xf32, #tpu.memory_space<vmem>>, %arg13: memref<1x64x16xf32, #tpu.memory_space<vmem>>, %arg14: memref<4x64x4xf32, #tpu.memory_space<vmem>>, %arg15: memref<4x64x1xf32, #tpu.memory_space<vmem>>, %arg16: memref<4x64x1xf32, #tpu.memory_space<vmem>>) attributes {dimension_semantics = [#tpu.dimension_semantics<parallel>, #tpu.dimension_semantics<arbitrary>], iteration_bounds = array<i64: 2, 1>, scalar_prefetch = 0 : i64, scratch_operands = 3 : i64, tpu.core_type = #tpu.core_type<tc>, window_params = [{transform_indices = @transform_0, window_bounds = array<i64: 1, 64, 32>}, {transform_indices = @transform_1, window_bounds = array<i64: 1, 64, 32>}, {transform_indices = @transform_2, window_bounds = array<i64: 1, 64, 16>}, {pipeline_mode = #tpu.pipeline_mode<synchronous>, transform_indices = @transform_3, window_bounds = array<i64: 1, 32>}, {pipeline_mode = #tpu.pipeline_mode<synchronous>, transform_indices = @transform_4, window_bounds = array<i64: 1, 32>}, {pipeline_mode = #tpu.pipeline_mode<synchronous>, transform_indices = @transform_5, window_bounds = array<i64: 1, 32>}, {pipeline_mode = #tpu.pipeline_mode<synchronous>, transform_indices = @transform_6, window_bounds = array<i64: 1, 32>}, {pipeline_mode = #tpu.pipeline_mode<synchronous>, transform_indices = @transform_7, window_bounds = array<i64: 1, 16>}, {pipeline_mode = #tpu.pipeline_mode<synchronous>, transform_indices = @transform_8, window_bounds = array<i64: 1, 16>}, {pipeline_mode = #tpu.pipeline_mode<synchronous>, transform_indices = @transform_9, window_bounds = array<i64: 1, 16>}, {pipeline_mode = #tpu.pipeline_mode<synchronous>, transform_indices = @transform_10, window_bounds = array<i64: 1, 16>}, {transform_indices = @transform_11, window_bounds = array<i64: 1, 64, 16>}]} {
    %c0_i32 = arith.constant 0 : i32
    %0 = arith.cmpi eq, %arg1, %c0_i32 : i32
    %1 = arith.extui %0 : i1 to i32
    %c0_i32_0 = arith.constant 0 : i32
    %2 = arith.cmpi ne, %1, %c0_i32_0 : i32
    scf.if %2 {
      %cst_111 = arith.constant 0xFF800000 : f32
      %190 = vector.broadcast %cst_111 : f32 to vector<4x64x1xf32>
      %c0_112 = arith.constant 0 : index
      %c0_113 = arith.constant 0 : index
      %c0_114 = arith.constant 0 : index
      %191 = vector.load %arg15[%c0_112, %c0_113, %c0_114] : memref<4x64x1xf32, #tpu.memory_space<vmem>>, vector<4x64x1xf32>
      tpu.vector_store %arg15[%c0_112, %c0_113, %c0_114], %190 {strides = array<i32>} : memref<4x64x1xf32, #tpu.memory_space<vmem>>, vector<4x64x1xf32>,
      %cst_115 = arith.constant 0.000000e+00 : f32
      %192 = vector.broadcast %cst_115 : f32 to vector<4x64x1xf32>
      %c0_116 = arith.constant 0 : index
      %c0_117 = arith.constant 0 : index
      %c0_118 = arith.constant 0 : index
      %193 = vector.load %arg16[%c0_116, %c0_117, %c0_118] : memref<4x64x1xf32, #tpu.memory_space<vmem>>, vector<4x64x1xf32>
      tpu.vector_store %arg16[%c0_116, %c0_117, %c0_118], %192 {strides = array<i32>} : memref<4x64x1xf32, #tpu.memory_space<vmem>>, vector<4x64x1xf32>,
      %cst_119 = arith.constant 0.000000e+00 : f32
      %194 = vector.broadcast %cst_119 : f32 to vector<4x64x4xf32>
      %c0_120 = arith.constant 0 : index
      %c0_121 = arith.constant 0 : index
      %c0_122 = arith.constant 0 : index
      %195 = vector.load %arg14[%c0_120, %c0_121, %c0_122] : memref<4x64x4xf32, #tpu.memory_space<vmem>>, vector<4x64x4xf32>
      tpu.vector_store %arg14[%c0_120, %c0_121, %c0_122], %194 {strides = array<i32>} : memref<4x64x4xf32, #tpu.memory_space<vmem>>, vector<4x64x4xf32>,
    } else {
    }
    %c0 = arith.constant 0 : index
    %c0_1 = arith.constant 0 : index
    %c0_2 = arith.constant 0 : index
    %3 = vector.load %arg2[%c0, %c0_1, %c0_2] : memref<1x64x32xf32, #tpu.memory_space<vmem>>, vector<1x64x32xf32>
    %4 = vector.shape_cast %3 : vector<1x64x32xf32> to vector<64x32xf32>
    %c0_3 = arith.constant 0 : index
    %c0_4 = arith.constant 0 : index
    %5 = vector.load %arg5[%c0_3, %c0_4] : memref<1x32xf32, #tpu.memory_space<vmem>>, vector<1x32xf32>
    %6 = vector.shape_cast %5 : vector<1x32xf32> to vector<32xf32>
    %7 = vector.shape_cast %6 : vector<32xf32> to vector<1x32xf32>
    %8 = vector.broadcast %7 : vector<1x32xf32> to vector<64x32xf32>
    %9 = arith.mulf %4, %8 : vector<64x32xf32>
    %c0_5 = arith.constant 0 : index
    %c0_6 = arith.constant 0 : index
    %10 = vector.load %arg6[%c0_5, %c0_6] : memref<1x32xf32, #tpu.memory_space<vmem>>, vector<1x32xf32>
    %11 = vector.shape_cast %10 : vector<1x32xf32> to vector<32xf32>
    %12 = vector.shape_cast %11 : vector<32xf32> to vector<1x32xf32>
    %13 = vector.broadcast %12 : vector<1x32xf32> to vector<64x32xf32>
    %14 = arith.addf %9, %13 : vector<64x32xf32>
    %c0_7 = arith.constant 0 : index
    %c0_8 = arith.constant 0 : index
    %c0_9 = arith.constant 0 : index
    %15 = vector.load %arg3[%c0_7, %c0_8, %c0_9] : memref<1x64x32xf32, #tpu.memory_space<vmem>>, vector<1x64x32xf32>
    %16 = vector.shape_cast %15 : vector<1x64x32xf32> to vector<64x32xf32>
    %c0_10 = arith.constant 0 : index
    %c0_11 = arith.constant 0 : index
    %17 = vector.load %arg7[%c0_10, %c0_11] : memref<1x32xf32, #tpu.memory_space<vmem>>, vector<1x32xf32>
    %18 = vector.shape_cast %17 : vector<1x32xf32> to vector<32xf32>
    %19 = vector.shape_cast %18 : vector<32xf32> to vector<1x32xf32>
    %20 = vector.broadcast %19 : vector<1x32xf32> to vector<64x32xf32>
    %21 = arith.mulf %16, %20 : vector<64x32xf32>
    %c0_12 = arith.constant 0 : index
    %c0_13 = arith.constant 0 : index
    %22 = vector.load %arg8[%c0_12, %c0_13] : memref<1x32xf32, #tpu.memory_space<vmem>>, vector<1x32xf32>
    %23 = vector.shape_cast %22 : vector<1x32xf32> to vector<32xf32>
    %24 = vector.shape_cast %23 : vector<32xf32> to vector<1x32xf32>
    %25 = vector.broadcast %24 : vector<1x32xf32> to vector<64x32xf32>
    %26 = arith.addf %21, %25 : vector<64x32xf32>
    %c0_14 = arith.constant 0 : index
    %c0_15 = arith.constant 0 : index
    %c0_16 = arith.constant 0 : index
    %27 = vector.load %arg4[%c0_14, %c0_15, %c0_16] : memref<1x64x16xf32, #tpu.memory_space<vmem>>, vector<1x64x16xf32>
    %28 = vector.shape_cast %27 : vector<1x64x16xf32> to vector<64x16xf32>
    %c0_17 = arith.constant 0 : index
    %c0_18 = arith.constant 0 : index
    %29 = vector.load %arg9[%c0_17, %c0_18] : memref<1x16xf32, #tpu.memory_space<vmem>>, vector<1x16xf32>
    %30 = vector.shape_cast %29 : vector<1x16xf32> to vector<16xf32>
    %31 = vector.shape_cast %30 : vector<16xf32> to vector<1x16xf32>
    %32 = vector.broadcast %31 : vector<1x16xf32> to vector<64x16xf32>
    %33 = arith.mulf %28, %32 : vector<64x16xf32>
    %c0_19 = arith.constant 0 : index
    %c0_20 = arith.constant 0 : index
    %34 = vector.load %arg10[%c0_19, %c0_20] : memref<1x16xf32, #tpu.memory_space<vmem>>, vector<1x16xf32>
    %35 = vector.shape_cast %34 : vector<1x16xf32> to vector<16xf32>
    %36 = vector.shape_cast %35 : vector<16xf32> to vector<1x16xf32>
    %37 = vector.broadcast %36 : vector<1x16xf32> to vector<64x16xf32>
    %38 = arith.addf %33, %37 : vector<64x16xf32>
    %39 = vector.extract_strided_slice %14 {offsets = [0, 0], sizes = [64, 8], strides = [1, 1]} : vector<64x32xf32> to vector<64x8xf32>
    %40 = vector.extract_strided_slice %26 {offsets = [0, 0], sizes = [64, 8], strides = [1, 1]} : vector<64x32xf32> to vector<64x8xf32>
    %41 = vector.extract_strided_slice %38 {offsets = [0, 0], sizes = [64, 4], strides = [1, 1]} : vector<64x16xf32> to vector<64x4xf32>
    %cst = arith.constant dense<0.000000e+00> : vector<64x64xf32>
    %42 = tpu.matmul %39, %40, %cst {dimension_numbers = #tpu.dot_dimension_numbers<[1], [1], [0], [0], [0, 0, 1, 0], [], []>} : vector<64x8xf32>, vector<64x8xf32>, vector<64x64xf32> -> vector<64x64xf32>
    %cst_21 = arith.constant 0.353553385 : f32
    %43 = vector.broadcast %cst_21 : f32 to vector<64x64xf32>
    %44 = arith.mulf %42, %43 : vector<64x64xf32>
    %c0_22 = arith.constant 0 : index
    %c0_23 = arith.constant 0 : index
    %c0_24 = arith.constant 0 : index
    %45 = vector.load %arg15[%c0_22, %c0_23, %c0_24] : memref<4x64x1xf32, #tpu.memory_space<vmem>>, vector<1x64x1xf32>
    %46 = vector.shape_cast %45 : vector<1x64x1xf32> to vector<64x1xf32>
    %cst_25 = arith.constant dense<0xFF800000> : vector<64xf32>
    %47 = vector.multi_reduction <maximumf>, %44, %cst_25 [1] : vector<64x64xf32> to vector<64xf32>
    %48 = vector.shape_cast %47 : vector<64xf32> to vector<64x1xf32>
    %49 = arith.maximumf %46, %48 : vector<64x1xf32>
    %50 = arith.subf %46, %49 : vector<64x1xf32>
    %51 = math.exp %50 : vector<64x1xf32>
    %52 = vector.broadcast %49 : vector<64x1xf32> to vector<64x64xf32>
    %53 = arith.subf %44, %52 : vector<64x64xf32>
    %54 = math.exp %53 : vector<64x64xf32>
    %c0_26 = arith.constant 0 : index
    %c0_27 = arith.constant 0 : index
    %c0_28 = arith.constant 0 : index
    %55 = vector.load %arg16[%c0_26, %c0_27, %c0_28] : memref<4x64x1xf32, #tpu.memory_space<vmem>>, vector<1x64x1xf32>
    %56 = vector.shape_cast %55 : vector<1x64x1xf32> to vector<64x1xf32>
    %57 = arith.mulf %51, %56 : vector<64x1xf32>
    %cst_29 = arith.constant dense<0.000000e+00> : vector<64xf32>
    %58 = vector.multi_reduction <add>, %54, %cst_29 [1] : vector<64x64xf32> to vector<64xf32>
    %59 = vector.shape_cast %58 : vector<64xf32> to vector<64x1xf32>
    %60 = arith.addf %57, %59 : vector<64x1xf32>
    %c0_30 = arith.constant 0 : index
    %c0_31 = arith.constant 0 : index
    %c0_32 = arith.constant 0 : index
    %61 = vector.load %arg16[%c0_30, %c0_31, %c0_32] : memref<4x64x1xf32, #tpu.memory_space<vmem>>, vector<1x64x1xf32>
    %62 = vector.shape_cast %61 : vector<1x64x1xf32> to vector<64x1xf32>
    %63 = vector.shape_cast %60 : vector<64x1xf32> to vector<1x64x1xf32>
    tpu.vector_store %arg16[%c0_30, %c0_31, %c0_32], %63 {strides = array<i32>} : memref<4x64x1xf32, #tpu.memory_space<vmem>>, vector<1x64x1xf32>,
    %cst_33 = arith.constant dense<0.000000e+00> : vector<64x4xf32>
    %64 = tpu.matmul %54, %41, %cst_33 {dimension_numbers = #tpu.dot_dimension_numbers<[1], [0], [0], [1], [0, 0, 1, 1], [], []>} : vector<64x64xf32>, vector<64x4xf32>, vector<64x4xf32> -> vector<64x4xf32>
    %c0_34 = arith.constant 0 : index
    %c0_35 = arith.constant 0 : index
    %c0_36 = arith.constant 0 : index
    %65 = vector.load %arg14[%c0_34, %c0_35, %c0_36] : memref<4x64x4xf32, #tpu.memory_space<vmem>>, vector<1x64x4xf32>
    %66 = vector.shape_cast %65 : vector<1x64x4xf32> to vector<64x4xf32>
    %67 = vector.broadcast %51 : vector<64x1xf32> to vector<64x4xf32>
    %68 = arith.mulf %67, %66 : vector<64x4xf32>
    %69 = arith.addf %68, %64 : vector<64x4xf32>
    %c0_37 = arith.constant 0 : index
    %c0_38 = arith.constant 0 : index
    %c0_39 = arith.constant 0 : index
    %70 = vector.load %arg14[%c0_37, %c0_38, %c0_39] : memref<4x64x4xf32, #tpu.memory_space<vmem>>, vector<1x64x4xf32>
    %71 = vector.shape_cast %70 : vector<1x64x4xf32> to vector<64x4xf32>
    %72 = vector.shape_cast %69 : vector<64x4xf32> to vector<1x64x4xf32>
    tpu.vector_store %arg14[%c0_37, %c0_38, %c0_39], %72 {strides = array<i32>} : memref<4x64x4xf32, #tpu.memory_space<vmem>>, vector<1x64x4xf32>,
    %c0_40 = arith.constant 0 : index
    %c0_41 = arith.constant 0 : index
    %c0_42 = arith.constant 0 : index
    %73 = vector.load %arg15[%c0_40, %c0_41, %c0_42] : memref<4x64x1xf32, #tpu.memory_space<vmem>>, vector<1x64x1xf32>
    %74 = vector.shape_cast %73 : vector<1x64x1xf32> to vector<64x1xf32>
    %75 = vector.shape_cast %49 : vector<64x1xf32> to vector<1x64x1xf32>
    tpu.vector_store %arg15[%c0_40, %c0_41, %c0_42], %75 {strides = array<i32>} : memref<4x64x1xf32, #tpu.memory_space<vmem>>, vector<1x64x1xf32>,
    %76 = vector.extract_strided_slice %14 {offsets = [0, 8], sizes = [64, 8], strides = [1, 1]} : vector<64x32xf32> to vector<64x8xf32>
    %77 = vector.extract_strided_slice %26 {offsets = [0, 8], sizes = [64, 8], strides = [1, 1]} : vector<64x32xf32> to vector<64x8xf32>
    %78 = vector.extract_strided_slice %38 {offsets = [0, 4], sizes = [64, 4], strides = [1, 1]} : vector<64x16xf32> to vector<64x4xf32>
    %cst_43 = arith.constant dense<0.000000e+00> : vector<64x64xf32>
    %79 = tpu.matmul %76, %77, %cst_43 {dimension_numbers = #tpu.dot_dimension_numbers<[1], [1], [0], [0], [0, 0, 1, 0], [], []>} : vector<64x8xf32>, vector<64x8xf32>, vector<64x64xf32> -> vector<64x64xf32>
    %cst_44 = arith.constant 0.353553385 : f32
    %80 = vector.broadcast %cst_44 : f32 to vector<64x64xf32>
    %81 = arith.mulf %79, %80 : vector<64x64xf32>
    %c1 = arith.constant 1 : index
    %c0_45 = arith.constant 0 : index
    %c0_46 = arith.constant 0 : index
    %82 = vector.load %arg15[%c1, %c0_45, %c0_46] : memref<4x64x1xf32, #tpu.memory_space<vmem>>, vector<1x64x1xf32>
    %83 = vector.shape_cast %82 : vector<1x64x1xf32> to vector<64x1xf32>
    %cst_47 = arith.constant dense<0xFF800000> : vector<64xf32>
    %84 = vector.multi_reduction <maximumf>, %81, %cst_47 [1] : vector<64x64xf32> to vector<64xf32>
    %85 = vector.shape_cast %84 : vector<64xf32> to vector<64x1xf32>
    %86 = arith.maximumf %83, %85 : vector<64x1xf32>
    %87 = arith.subf %83, %86 : vector<64x1xf32>
    %88 = math.exp %87 : vector<64x1xf32>
    %89 = vector.broadcast %86 : vector<64x1xf32> to vector<64x64xf32>
    %90 = arith.subf %81, %89 : vector<64x64xf32>
    %91 = math.exp %90 : vector<64x64xf32>
    %c1_48 = arith.constant 1 : index
    %c0_49 = arith.constant 0 : index
    %c0_50 = arith.constant 0 : index
    %92 = vector.load %arg16[%c1_48, %c0_49, %c0_50] : memref<4x64x1xf32, #tpu.memory_space<vmem>>, vector<1x64x1xf32>
    %93 = vector.shape_cast %92 : vector<1x64x1xf32> to vector<64x1xf32>
    %94 = arith.mulf %88, %93 : vector<64x1xf32>
    %cst_51 = arith.constant dense<0.000000e+00> : vector<64xf32>
    %95 = vector.multi_reduction <add>, %91, %cst_51 [1] : vector<64x64xf32> to vector<64xf32>
    %96 = vector.shape_cast %95 : vector<64xf32> to vector<64x1xf32>
    %97 = arith.addf %94, %96 : vector<64x1xf32>
    %c1_52 = arith.constant 1 : index
    %c0_53 = arith.constant 0 : index
    %c0_54 = arith.constant 0 : index
    %98 = vector.load %arg16[%c1_52, %c0_53, %c0_54] : memref<4x64x1xf32, #tpu.memory_space<vmem>>, vector<1x64x1xf32>
    %99 = vector.shape_cast %98 : vector<1x64x1xf32> to vector<64x1xf32>
    %100 = vector.shape_cast %97 : vector<64x1xf32> to vector<1x64x1xf32>
    tpu.vector_store %arg16[%c1_52, %c0_53, %c0_54], %100 {strides = array<i32>} : memref<4x64x1xf32, #tpu.memory_space<vmem>>, vector<1x64x1xf32>,
    %cst_55 = arith.constant dense<0.000000e+00> : vector<64x4xf32>
    %101 = tpu.matmul %91, %78, %cst_55 {dimension_numbers = #tpu.dot_dimension_numbers<[1], [0], [0], [1], [0, 0, 1, 1], [], []>} : vector<64x64xf32>, vector<64x4xf32>, vector<64x4xf32> -> vector<64x4xf32>
    %c1_56 = arith.constant 1 : index
    %c0_57 = arith.constant 0 : index
    %c0_58 = arith.constant 0 : index
    %102 = vector.load %arg14[%c1_56, %c0_57, %c0_58] : memref<4x64x4xf32, #tpu.memory_space<vmem>>, vector<1x64x4xf32>
    %103 = vector.shape_cast %102 : vector<1x64x4xf32> to vector<64x4xf32>
    %104 = vector.broadcast %88 : vector<64x1xf32> to vector<64x4xf32>
    %105 = arith.mulf %104, %103 : vector<64x4xf32>
    %106 = arith.addf %105, %101 : vector<64x4xf32>
    %c1_59 = arith.constant 1 : index
    %c0_60 = arith.constant 0 : index
    %c0_61 = arith.constant 0 : index
    %107 = vector.load %arg14[%c1_59, %c0_60, %c0_61] : memref<4x64x4xf32, #tpu.memory_space<vmem>>, vector<1x64x4xf32>
    %108 = vector.shape_cast %107 : vector<1x64x4xf32> to vector<64x4xf32>
    %109 = vector.shape_cast %106 : vector<64x4xf32> to vector<1x64x4xf32>
    tpu.vector_store %arg14[%c1_59, %c0_60, %c0_61], %109 {strides = array<i32>} : memref<4x64x4xf32, #tpu.memory_space<vmem>>, vector<1x64x4xf32>,
    %c1_62 = arith.constant 1 : index
    %c0_63 = arith.constant 0 : index
    %c0_64 = arith.constant 0 : index
    %110 = vector.load %arg15[%c1_62, %c0_63, %c0_64] : memref<4x64x1xf32, #tpu.memory_space<vmem>>, vector<1x64x1xf32>
    %111 = vector.shape_cast %110 : vector<1x64x1xf32> to vector<64x1xf32>
    %112 = vector.shape_cast %86 : vector<64x1xf32> to vector<1x64x1xf32>
    tpu.vector_store %arg15[%c1_62, %c0_63, %c0_64], %112 {strides = array<i32>} : memref<4x64x1xf32, #tpu.memory_space<vmem>>, vector<1x64x1xf32>,
    %113 = vector.extract_strided_slice %14 {offsets = [0, 16], sizes = [64, 8], strides = [1, 1]} : vector<64x32xf32> to vector<64x8xf32>
    %114 = vector.extract_strided_slice %26 {offsets = [0, 16], sizes = [64, 8], strides = [1, 1]} : vector<64x32xf32> to vector<64x8xf32>
    %115 = vector.extract_strided_slice %38 {offsets = [0, 8], sizes = [64, 4], strides = [1, 1]} : vector<64x16xf32> to vector<64x4xf32>
    %cst_65 = arith.constant dense<0.000000e+00> : vector<64x64xf32>
    %116 = tpu.matmul %113, %114, %cst_65 {dimension_numbers = #tpu.dot_dimension_numbers<[1], [1], [0], [0], [0, 0, 1, 0], [], []>} : vector<64x8xf32>, vector<64x8xf32>, vector<64x64xf32> -> vector<64x64xf32>
    %cst_66 = arith.constant 0.353553385 : f32
    %117 = vector.broadcast %cst_66 : f32 to vector<64x64xf32>
    %118 = arith.mulf %116, %117 : vector<64x64xf32>
    %c2 = arith.constant 2 : index
    %c0_67 = arith.constant 0 : index
    %c0_68 = arith.constant 0 : index
    %119 = vector.load %arg15[%c2, %c0_67, %c0_68] : memref<4x64x1xf32, #tpu.memory_space<vmem>>, vector<1x64x1xf32>
    %120 = vector.shape_cast %119 : vector<1x64x1xf32> to vector<64x1xf32>
    %cst_69 = arith.constant dense<0xFF800000> : vector<64xf32>
    %121 = vector.multi_reduction <maximumf>, %118, %cst_69 [1] : vector<64x64xf32> to vector<64xf32>
    %122 = vector.shape_cast %121 : vector<64xf32> to vector<64x1xf32>
    %123 = arith.maximumf %120, %122 : vector<64x1xf32>
    %124 = arith.subf %120, %123 : vector<64x1xf32>
    %125 = math.exp %124 : vector<64x1xf32>
    %126 = vector.broadcast %123 : vector<64x1xf32> to vector<64x64xf32>
    %127 = arith.subf %118, %126 : vector<64x64xf32>
    %128 = math.exp %127 : vector<64x64xf32>
    %c2_70 = arith.constant 2 : index
    %c0_71 = arith.constant 0 : index
    %c0_72 = arith.constant 0 : index
    %129 = vector.load %arg16[%c2_70, %c0_71, %c0_72] : memref<4x64x1xf32, #tpu.memory_space<vmem>>, vector<1x64x1xf32>
    %130 = vector.shape_cast %129 : vector<1x64x1xf32> to vector<64x1xf32>
    %131 = arith.mulf %125, %130 : vector<64x1xf32>
    %cst_73 = arith.constant dense<0.000000e+00> : vector<64xf32>
    %132 = vector.multi_reduction <add>, %128, %cst_73 [1] : vector<64x64xf32> to vector<64xf32>
    %133 = vector.shape_cast %132 : vector<64xf32> to vector<64x1xf32>
    %134 = arith.addf %131, %133 : vector<64x1xf32>
    %c2_74 = arith.constant 2 : index
    %c0_75 = arith.constant 0 : index
    %c0_76 = arith.constant 0 : index
    %135 = vector.load %arg16[%c2_74, %c0_75, %c0_76] : memref<4x64x1xf32, #tpu.memory_space<vmem>>, vector<1x64x1xf32>
    %136 = vector.shape_cast %135 : vector<1x64x1xf32> to vector<64x1xf32>
    %137 = vector.shape_cast %134 : vector<64x1xf32> to vector<1x64x1xf32>
    tpu.vector_store %arg16[%c2_74, %c0_75, %c0_76], %137 {strides = array<i32>} : memref<4x64x1xf32, #tpu.memory_space<vmem>>, vector<1x64x1xf32>,
    %cst_77 = arith.constant dense<0.000000e+00> : vector<64x4xf32>
    %138 = tpu.matmul %128, %115, %cst_77 {dimension_numbers = #tpu.dot_dimension_numbers<[1], [0], [0], [1], [0, 0, 1, 1], [], []>} : vector<64x64xf32>, vector<64x4xf32>, vector<64x4xf32> -> vector<64x4xf32>
    %c2_78 = arith.constant 2 : index
    %c0_79 = arith.constant 0 : index
    %c0_80 = arith.constant 0 : index
    %139 = vector.load %arg14[%c2_78, %c0_79, %c0_80] : memref<4x64x4xf32, #tpu.memory_space<vmem>>, vector<1x64x4xf32>
    %140 = vector.shape_cast %139 : vector<1x64x4xf32> to vector<64x4xf32>
    %141 = vector.broadcast %125 : vector<64x1xf32> to vector<64x4xf32>
    %142 = arith.mulf %141, %140 : vector<64x4xf32>
    %143 = arith.addf %142, %138 : vector<64x4xf32>
    %c2_81 = arith.constant 2 : index
    %c0_82 = arith.constant 0 : index
    %c0_83 = arith.constant 0 : index
    %144 = vector.load %arg14[%c2_81, %c0_82, %c0_83] : memref<4x64x4xf32, #tpu.memory_space<vmem>>, vector<1x64x4xf32>
    %145 = vector.shape_cast %144 : vector<1x64x4xf32> to vector<64x4xf32>
    %146 = vector.shape_cast %143 : vector<64x4xf32> to vector<1x64x4xf32>
    tpu.vector_store %arg14[%c2_81, %c0_82, %c0_83], %146 {strides = array<i32>} : memref<4x64x4xf32, #tpu.memory_space<vmem>>, vector<1x64x4xf32>,
    %c2_84 = arith.constant 2 : index
    %c0_85 = arith.constant 0 : index
    %c0_86 = arith.constant 0 : index
    %147 = vector.load %arg15[%c2_84, %c0_85, %c0_86] : memref<4x64x1xf32, #tpu.memory_space<vmem>>, vector<1x64x1xf32>
    %148 = vector.shape_cast %147 : vector<1x64x1xf32> to vector<64x1xf32>
    %149 = vector.shape_cast %123 : vector<64x1xf32> to vector<1x64x1xf32>
    tpu.vector_store %arg15[%c2_84, %c0_85, %c0_86], %149 {strides = array<i32>} : memref<4x64x1xf32, #tpu.memory_space<vmem>>, vector<1x64x1xf32>,
    %150 = vector.extract_strided_slice %14 {offsets = [0, 24], sizes = [64, 8], strides = [1, 1]} : vector<64x32xf32> to vector<64x8xf32>
    %151 = vector.extract_strided_slice %26 {offsets = [0, 24], sizes = [64, 8], strides = [1, 1]} : vector<64x32xf32> to vector<64x8xf32>
    %152 = vector.extract_strided_slice %38 {offsets = [0, 12], sizes = [64, 4], strides = [1, 1]} : vector<64x16xf32> to vector<64x4xf32>
    %cst_87 = arith.constant dense<0.000000e+00> : vector<64x64xf32>
    %153 = tpu.matmul %150, %151, %cst_87 {dimension_numbers = #tpu.dot_dimension_numbers<[1], [1], [0], [0], [0, 0, 1, 0], [], []>} : vector<64x8xf32>, vector<64x8xf32>, vector<64x64xf32> -> vector<64x64xf32>
    %cst_88 = arith.constant 0.353553385 : f32
    %154 = vector.broadcast %cst_88 : f32 to vector<64x64xf32>
    %155 = arith.mulf %153, %154 : vector<64x64xf32>
    %c3 = arith.constant 3 : index
    %c0_89 = arith.constant 0 : index
    %c0_90 = arith.constant 0 : index
    %156 = vector.load %arg15[%c3, %c0_89, %c0_90] : memref<4x64x1xf32, #tpu.memory_space<vmem>>, vector<1x64x1xf32>
    %157 = vector.shape_cast %156 : vector<1x64x1xf32> to vector<64x1xf32>
    %cst_91 = arith.constant dense<0xFF800000> : vector<64xf32>
    %158 = vector.multi_reduction <maximumf>, %155, %cst_91 [1] : vector<64x64xf32> to vector<64xf32>
    %159 = vector.shape_cast %158 : vector<64xf32> to vector<64x1xf32>
    %160 = arith.maximumf %157, %159 : vector<64x1xf32>
    %161 = arith.subf %157, %160 : vector<64x1xf32>
    %162 = math.exp %161 : vector<64x1xf32>
    %163 = vector.broadcast %160 : vector<64x1xf32> to vector<64x64xf32>
    %164 = arith.subf %155, %163 : vector<64x64xf32>
    %165 = math.exp %164 : vector<64x64xf32>
    %c3_92 = arith.constant 3 : index
    %c0_93 = arith.constant 0 : index
    %c0_94 = arith.constant 0 : index
    %166 = vector.load %arg16[%c3_92, %c0_93, %c0_94] : memref<4x64x1xf32, #tpu.memory_space<vmem>>, vector<1x64x1xf32>
    %167 = vector.shape_cast %166 : vector<1x64x1xf32> to vector<64x1xf32>
    %168 = arith.mulf %162, %167 : vector<64x1xf32>
    %cst_95 = arith.constant dense<0.000000e+00> : vector<64xf32>
    %169 = vector.multi_reduction <add>, %165, %cst_95 [1] : vector<64x64xf32> to vector<64xf32>
    %170 = vector.shape_cast %169 : vector<64xf32> to vector<64x1xf32>
    %171 = arith.addf %168, %170 : vector<64x1xf32>
    %c3_96 = arith.constant 3 : index
    %c0_97 = arith.constant 0 : index
    %c0_98 = arith.constant 0 : index
    %172 = vector.load %arg16[%c3_96, %c0_97, %c0_98] : memref<4x64x1xf32, #tpu.memory_space<vmem>>, vector<1x64x1xf32>
    %173 = vector.shape_cast %172 : vector<1x64x1xf32> to vector<64x1xf32>
    %174 = vector.shape_cast %171 : vector<64x1xf32> to vector<1x64x1xf32>
    tpu.vector_store %arg16[%c3_96, %c0_97, %c0_98], %174 {strides = array<i32>} : memref<4x64x1xf32, #tpu.memory_space<vmem>>, vector<1x64x1xf32>,
    %cst_99 = arith.constant dense<0.000000e+00> : vector<64x4xf32>
    %175 = tpu.matmul %165, %152, %cst_99 {dimension_numbers = #tpu.dot_dimension_numbers<[1], [0], [0], [1], [0, 0, 1, 1], [], []>} : vector<64x64xf32>, vector<64x4xf32>, vector<64x4xf32> -> vector<64x4xf32>
    %c3_100 = arith.constant 3 : index
    %c0_101 = arith.constant 0 : index
    %c0_102 = arith.constant 0 : index
    %176 = vector.load %arg14[%c3_100, %c0_101, %c0_102] : memref<4x64x4xf32, #tpu.memory_space<vmem>>, vector<1x64x4xf32>
    %177 = vector.shape_cast %176 : vector<1x64x4xf32> to vector<64x4xf32>
    %178 = vector.broadcast %162 : vector<64x1xf32> to vector<64x4xf32>
    %179 = arith.mulf %178, %177 : vector<64x4xf32>
    %180 = arith.addf %179, %175 : vector<64x4xf32>
    %c3_103 = arith.constant 3 : index
    %c0_104 = arith.constant 0 : index
    %c0_105 = arith.constant 0 : index
    %181 = vector.load %arg14[%c3_103, %c0_104, %c0_105] : memref<4x64x4xf32, #tpu.memory_space<vmem>>, vector<1x64x4xf32>
    %182 = vector.shape_cast %181 : vector<1x64x4xf32> to vector<64x4xf32>
    %183 = vector.shape_cast %180 : vector<64x4xf32> to vector<1x64x4xf32>
    tpu.vector_store %arg14[%c3_103, %c0_104, %c0_105], %183 {strides = array<i32>} : memref<4x64x4xf32, #tpu.memory_space<vmem>>, vector<1x64x4xf32>,
    %c3_106 = arith.constant 3 : index
    %c0_107 = arith.constant 0 : index
    %c0_108 = arith.constant 0 : index
    %184 = vector.load %arg15[%c3_106, %c0_107, %c0_108] : memref<4x64x1xf32, #tpu.memory_space<vmem>>, vector<1x64x1xf32>
    %185 = vector.shape_cast %184 : vector<1x64x1xf32> to vector<64x1xf32>
    %186 = vector.shape_cast %160 : vector<64x1xf32> to vector<1x64x1xf32>
    tpu.vector_store %arg15[%c3_106, %c0_107, %c0_108], %186 {strides = array<i32>} : memref<4x64x1xf32, #tpu.memory_space<vmem>>, vector<1x64x1xf32>,
    %c0_i32_109 = arith.constant 0 : i32
    %187 = arith.cmpi eq, %arg1, %c0_i32_109 : i32
    %188 = arith.extui %187 : i1 to i32
    %c0_i32_110 = arith.constant 0 : i32
    %189 = arith.cmpi ne, %188, %c0_i32_110 : i32
    scf.if %189 {
      %c0_111 = arith.constant 0 : index
      %c0_112 = arith.constant 0 : index
      %190 = vector.load %arg11[%c0_111, %c0_112] : memref<1x16xf32, #tpu.memory_space<vmem>>, vector<1x16xf32>
      %191 = vector.shape_cast %190 : vector<1x16xf32> to vector<16xf32>
      %c0_113 = arith.constant 0 : index
      %c0_114 = arith.constant 0 : index
      %192 = vector.load %arg12[%c0_113, %c0_114] : memref<1x16xf32, #tpu.memory_space<vmem>>, vector<1x16xf32>
      %193 = vector.shape_cast %192 : vector<1x16xf32> to vector<16xf32>
      %c0_115 = arith.constant 0 : index
      %c0_116 = arith.constant 0 : index
      %c0_117 = arith.constant 0 : index
      %194 = vector.load %arg16[%c0_115, %c0_116, %c0_117] : memref<4x64x1xf32, #tpu.memory_space<vmem>>, vector<1x64x1xf32>
      %195 = vector.shape_cast %194 : vector<1x64x1xf32> to vector<64x1xf32>
      %196 = tpu.reciprocal %195 {approx = true} : vector<64x1xf32> -> vector<64x1xf32>
      %c0_118 = arith.constant 0 : index
      %c0_119 = arith.constant 0 : index
      %c0_120 = arith.constant 0 : index
      %197 = vector.load %arg14[%c0_118, %c0_119, %c0_120] : memref<4x64x4xf32, #tpu.memory_space<vmem>>, vector<1x64x4xf32>
      %198 = vector.shape_cast %197 : vector<1x64x4xf32> to vector<64x4xf32>
      %199 = vector.broadcast %196 : vector<64x1xf32> to vector<64x4xf32>
      %200 = arith.mulf %198, %199 : vector<64x4xf32>
      %c1_121 = arith.constant 1 : index
      %c0_122 = arith.constant 0 : index
      %c0_123 = arith.constant 0 : index
      %201 = vector.load %arg16[%c1_121, %c0_122, %c0_123] : memref<4x64x1xf32, #tpu.memory_space<vmem>>, vector<1x64x1xf32>
      %202 = vector.shape_cast %201 : vector<1x64x1xf32> to vector<64x1xf32>
      %203 = tpu.reciprocal %202 {approx = true} : vector<64x1xf32> -> vector<64x1xf32>
      %c1_124 = arith.constant 1 : index
      %c0_125 = arith.constant 0 : index
      %c0_126 = arith.constant 0 : index
      %204 = vector.load %arg14[%c1_124, %c0_125, %c0_126] : memref<4x64x4xf32, #tpu.memory_space<vmem>>, vector<1x64x4xf32>
      %205 = vector.shape_cast %204 : vector<1x64x4xf32> to vector<64x4xf32>
      %206 = vector.broadcast %203 : vector<64x1xf32> to vector<64x4xf32>
      %207 = arith.mulf %205, %206 : vector<64x4xf32>
      %c2_127 = arith.constant 2 : index
      %c0_128 = arith.constant 0 : index
      %c0_129 = arith.constant 0 : index
      %208 = vector.load %arg16[%c2_127, %c0_128, %c0_129] : memref<4x64x1xf32, #tpu.memory_space<vmem>>, vector<1x64x1xf32>
      %209 = vector.shape_cast %208 : vector<1x64x1xf32> to vector<64x1xf32>
      %210 = tpu.reciprocal %209 {approx = true} : vector<64x1xf32> -> vector<64x1xf32>
      %c2_130 = arith.constant 2 : index
      %c0_131 = arith.constant 0 : index
      %c0_132 = arith.constant 0 : index
      %211 = vector.load %arg14[%c2_130, %c0_131, %c0_132] : memref<4x64x4xf32, #tpu.memory_space<vmem>>, vector<1x64x4xf32>
      %212 = vector.shape_cast %211 : vector<1x64x4xf32> to vector<64x4xf32>
      %213 = vector.broadcast %210 : vector<64x1xf32> to vector<64x4xf32>
      %214 = arith.mulf %212, %213 : vector<64x4xf32>
      %c3_133 = arith.constant 3 : index
      %c0_134 = arith.constant 0 : index
      %c0_135 = arith.constant 0 : index
      %215 = vector.load %arg16[%c3_133, %c0_134, %c0_135] : memref<4x64x1xf32, #tpu.memory_space<vmem>>, vector<1x64x1xf32>
      %216 = vector.shape_cast %215 : vector<1x64x1xf32> to vector<64x1xf32>
      %217 = tpu.reciprocal %216 {approx = true} : vector<64x1xf32> -> vector<64x1xf32>
      %c3_136 = arith.constant 3 : index
      %c0_137 = arith.constant 0 : index
      %c0_138 = arith.constant 0 : index
      %218 = vector.load %arg14[%c3_136, %c0_137, %c0_138] : memref<4x64x4xf32, #tpu.memory_space<vmem>>, vector<1x64x4xf32>
      %219 = vector.shape_cast %218 : vector<1x64x4xf32> to vector<64x4xf32>
      %220 = vector.broadcast %217 : vector<64x1xf32> to vector<64x4xf32>
      %221 = arith.mulf %219, %220 : vector<64x4xf32>
      %222 = tpu.concatenate %200, %207, %214, %221 in 1 : vector<64x4xf32>, vector<64x4xf32>, vector<64x4xf32>, vector<64x4xf32> -> vector<64x16xf32>
      %223 = vector.shape_cast %191 : vector<16xf32> to vector<1x16xf32>
      %224 = vector.broadcast %223 : vector<1x16xf32> to vector<64x16xf32>
      %225 = arith.mulf %222, %224 : vector<64x16xf32>
      %226 = vector.shape_cast %193 : vector<16xf32> to vector<1x16xf32>
      %227 = vector.broadcast %226 : vector<1x16xf32> to vector<64x16xf32>
      %228 = arith.addf %225, %227 : vector<64x16xf32>
      %c0_139 = arith.constant 0 : index
      %c0_140 = arith.constant 0 : index
      %c0_141 = arith.constant 0 : index
      %229 = vector.load %arg13[%c0_139, %c0_140, %c0_141] : memref<1x64x16xf32, #tpu.memory_space<vmem>>, vector<1x64x16xf32>
      %230 = vector.shape_cast %229 : vector<1x64x16xf32> to vector<64x16xf32>
      %231 = vector.shape_cast %228 : vector<64x16xf32> to vector<1x64x16xf32>
      tpu.vector_store %arg13[%c0_139, %c0_140, %c0_141], %231 {strides = array<i32>} : memref<1x64x16xf32, #tpu.memory_space<vmem>>, vector<1x64x16xf32>,
    } else {
    }
    return
  }
  func.func @transform_0(%arg0: i32, %arg1: i32) -> (i32, i32, i32) {
    %c0_i32 = arith.constant 0 : i32
    %c0_i32_0 = arith.constant 0 : i32
    %c0_i32_1 = arith.constant 0 : i32
    return %arg0, %c0_i32, %c0_i32_0 : i32, i32, i32
  }
  func.func @transform_1(%arg0: i32, %arg1: i32) -> (i32, i32, i32) {
    %c0_i32 = arith.constant 0 : i32
    %c0_i32_0 = arith.constant 0 : i32
    return %arg0, %arg1, %c0_i32 : i32, i32, i32
  }
  func.func @transform_2(%arg0: i32, %arg1: i32) -> (i32, i32, i32) {
    %c0_i32 = arith.constant 0 : i32
    %c0_i32_0 = arith.constant 0 : i32
    return %arg0, %arg1, %c0_i32 : i32, i32, i32
  }
  func.func @transform_3(%arg0: i32, %arg1: i32) -> (i32, i32) {
    %c0_i32 = arith.constant 0 : i32
    %c0_i32_0 = arith.constant 0 : i32
    %c0_i32_1 = arith.constant 0 : i32
    return %c0_i32, %c0_i32_0 : i32, i32
  }
  func.func @transform_4(%arg0: i32, %arg1: i32) -> (i32, i32) {
    %c0_i32 = arith.constant 0 : i32
    %c0_i32_0 = arith.constant 0 : i32
    %c0_i32_1 = arith.constant 0 : i32
    return %c0_i32, %c0_i32_0 : i32, i32
  }
  func.func @transform_5(%arg0: i32, %arg1: i32) -> (i32, i32) {
    %c0_i32 = arith.constant 0 : i32
    %c0_i32_0 = arith.constant 0 : i32
    %c0_i32_1 = arith.constant 0 : i32
    return %c0_i32, %c0_i32_0 : i32, i32
  }
  func.func @transform_6(%arg0: i32, %arg1: i32) -> (i32, i32) {
    %c0_i32 = arith.constant 0 : i32
    %c0_i32_0 = arith.constant 0 : i32
    %c0_i32_1 = arith.constant 0 : i32
    return %c0_i32, %c0_i32_0 : i32, i32
  }
  func.func @transform_7(%arg0: i32, %arg1: i32) -> (i32, i32) {
    %c0_i32 = arith.constant 0 : i32
    %c0_i32_0 = arith.constant 0 : i32
    %c0_i32_1 = arith.constant 0 : i32
    return %c0_i32, %c0_i32_0 : i32, i32
  }
  func.func @transform_8(%arg0: i32, %arg1: i32) -> (i32, i32) {
    %c0_i32 = arith.constant 0 : i32
    %c0_i32_0 = arith.constant 0 : i32
    %c0_i32_1 = arith.constant 0 : i32
    return %c0_i32, %c0_i32_0 : i32, i32
  }
  func.func @transform_9(%arg0: i32, %arg1: i32) -> (i32, i32) {
    %c0_i32 = arith.constant 0 : i32
    %c0_i32_0 = arith.constant 0 : i32
    %c0_i32_1 = arith.constant 0 : i32
    return %c0_i32, %c0_i32_0 : i32, i32
  }
  func.func @transform_10(%arg0: i32, %arg1: i32) -> (i32, i32) {
    %c0_i32 = arith.constant 0 : i32
    %c0_i32_0 = arith.constant 0 : i32
    %c0_i32_1 = arith.constant 0 : i32
    return %c0_i32, %c0_i32_0 : i32, i32
  }
  func.func @transform_11(%arg0: i32, %arg1: i32) -> (i32, i32, i32) {
    %c0_i32 = arith.constant 0 : i32
    %c0_i32_0 = arith.constant 0 : i32
    %c0_i32_1 = arith.constant 0 : i32
    return %arg0, %c0_i32, %c0_i32_0 : i32, i32, i32
  }
}

</mosaic_0001>

<bundles_post_ra>
// kernel: tpu_custom_call.1
= control target key start
LH: loop header
LB: loop body
LE: loop exit
PB: predicated region body
PF: predicated region fallthrough
CT: control target
= control target key end

     0   :  { %s4393_s17 = smov 0   ;;  %s4395_s18 = smov 0   ;;  %s6059_s0 = inlined_call_operand.vmem [shape: f32[2,64,32], index: 0, kind: input, shape index: {}]   ;;  %s6060_s1 = inlined_call_operand.vmem [shape: f32[2,64,32], index: 1, kind: input, shape index: {}]   ;;  %s6061_s2 = inlined_call_operand.vmem [shape: f32[2,64,16], index: 2, kind: input, shape index: {}]   ;;  %s6062_s3 = inlined_call_operand.vmem [shape: f32[1,32], index: 3, kind: input, shape index: {}]   ;;  %s6063_s4 = inlined_call_operand.vmem [shape: f32[1,32], index: 4, kind: input, shape index: {}]   ;;  %s6064_s5 = inlined_call_operand.vmem [shape: f32[1,32], index: 5, kind: input, shape index: {}]   ;;  %s6065_s6 = inlined_call_operand.vmem [shape: f32[1,32], index: 6, kind: input, shape index: {}]   ;;  %s6066_s7 = inlined_call_operand.vmem [shape: f32[1,16], index: 7, kind: input, shape index: {}]   ;;  %s6067_s8 = inlined_call_operand.vmem [shape: f32[1,16], index: 8, kind: input, shape index: {}]   ;;  %s6068_s9 = inlined_call_operand.vmem [shape: f32[1,16], index: 9, kind: input, shape index: {}]   ;;  %s6069_s10 = inlined_call_operand.vmem [shape: f32[1,16], index: 10, kind: input, shape index: {}]   ;;  %s6070_s11 = inlined_call_operand.vmem [shape: f32[2,64,16], index: 11, kind: output, shape index: {}]  }
   0x1   :  { %s4397_s19 = smov 0  }
   0x2 LB: > { %s33_s20 = sadd.s32 1, %s4316_s18  ;;  %p3598_p0 = scmp.ge.s32.totalorder %s4320_s19, 1  ;;  %s4320_s19 = sphi %s4397_s19, %s21_s19   ;;  %s4316_s18 = sphi %s4395_s18, %s6249_s18   ;;  %s4312_s17 = sphi %s4393_s17, %s6248_s17  }
   0x3   : > { %p35_p1 = scmp.ge.s32.totalorder %s33_s20, 2  ;;  %p383_p2 = scmp.lt.s32.totalorder %s4320_s19, 3 }
   0x5   : > { %s6251_s20 = smov (%p35_p1, %s33_s20), 0  ;;  %p384_p3 = pnand %p3598_p0, %p383_p2 }
   0x7   : > { %387 = sbr.rel (%p384_p3) target bundleno = 2579 (0xa13), region = 64 }
   0xc   : > { %p441_p4 = scmp.lt.s32.totalorder %s4312_s17, 1  ;;  %v3609_v0 = vld [vmem:[%s6064_s5] ss:$0 sm:$0xff]  ;;  %vm687_vm0 = vcmask 64512   ;;  %vm475_vm1 = vcmask 7168   ;;  %v4322_v52 = vmov -inf  }
   0xd   : > { %v3610_v1 = vld [vmem:[%s6065_s6] ss:$0 sm:$0xff]  ;;  %476 = vst.msk [vmem:[#allocation3] sm:$0xff] %vm475_vm1, %v4322_v52  ;;  %477 = vst.msk [vmem:[#allocation3 + $0x8] sm:$0xff] %vm475_vm1, %v4322_v52  ;;  %vm857_vm2 = vcmask 523264   ;;  %s4325_s28 = smov 120  }
   0xe   : > { %s6253_s17 = smov (!%p441_p4, %s4312_s17), 1  ;;  %v3607_v8 = vld [vmem:[%s6062_s3] ss:$0 sm:$0xff]  ;;  %478 = vst.msk [vmem:[#allocation3 + $0x10] sm:$0xff] %vm475_vm1, %v4322_v52  ;;  %479 = vst.msk [vmem:[#allocation3 + $0x18] sm:$0xff] %vm475_vm1, %v4322_v52  ;;  %s4326_s29 = smov 124  }
   0xf   : > { %s4411_s21 = sshll.u32 %s6253_s17, 6  ;;  %v3608_v13 = vld [vmem:[%s6063_s4] ss:$0 sm:$0xff]  ;;  %480 = vst.msk [vmem:[#allocation3 + $0x20] sm:$0xff] %vm475_vm1, %v4322_v52  ;;  %481 = vst.msk [vmem:[#allocation3 + $0x28] sm:$0xff] %vm475_vm1, %v4322_v52  ;;  %s4327_s30 = smov 112  }
  0x10   : > { %s4420_s26 = scalar_lea.vmem %s6060_s1, %s4411_s21  ;;  %s4429_s12 = scalar_lea.vmem %s6059_s0, %s4411_s21  ;;  %482 = vst.msk [vmem:[#allocation3 + $0x30] sm:$0xff] %vm475_vm1, %v4322_v52  ;;  %483 = vst.msk [vmem:[#allocation3 + $0x38] sm:$0xff] %vm475_vm1, %v4322_v52  ;;  %vm540_vm3 = vcmask 31744   ;;  %vm3449_vm4 = vcmask 97280   ;;  %vm3486_vm5 = vcmask 130048  }
  0x11   : > { %v618_v2 = vld [vmem:[%s4420_s26 + $0x38] sm:$0xff]  ;;  %v617_v3 = vld [vmem:[%s4420_s26 + $0x30] sm:$0xff]  ;;  %v616_v4 = vld [vmem:[%s4420_s26 + $0x28] sm:$0xff]  ;;  %484 = vst.msk [vmem:[#allocation3 + $0x40] sm:$0xff] %vm475_vm1, %v4322_v52  ;;  %s4665_s23 = scalar_lea.vmem %s6061_s2, %s4411_s21  ;;  %s4329_s13 = smov 116  }
  0x12   : > { %v633_v5 = vmul.f32 %v3609_v0, %v618_v2  ;;  %v632_v6 = vmul.f32 %v3609_v0, %v617_v3  ;;  %v573_v7 = vld [vmem:[%s4429_s12] sm:$0xff]  ;;  %v631_v11 = vmul.f32 %v3609_v0, %v616_v4  ;;  %v614_v18 = vld [vmem:[%s4420_s26 + $0x18] sm:$0xff]  ;;  %v613_v21 = vld [vmem:[%s4420_s26 + $0x10] sm:$0xff]  ;;  %485 = vst.msk [vmem:[#allocation3 + $0x48] sm:$0xff] %vm475_vm1, %v4322_v52  ;;  %s4330_s14 = smov 4   ;;  %s4331_s15 = smov 8  }
  0x13   : > { %v615_v12 = vld [vmem:[%s4420_s26 + $0x20] sm:$0xff]  ;;  %v588_v14 = vmul.f32 %v3607_v8, %v573_v7  ;;  %v629_v20 = vmul.f32 %v3609_v0, %v614_v18  ;;  %v628_v23 = vmul.f32 %v3609_v0, %v613_v21  ;;  %v612_v24 = vld [vmem:[%s4420_s26 + $0x8] sm:$0xff]  ;;  %v575_v32 = vld [vmem:[%s4429_s12 + $0x10] sm:$0xff]  ;;  %486 = vst.msk [vmem:[#allocation3 + $0x50] sm:$0xff] %vm475_vm1, %v4322_v52  ;;  %v6071_v18 = vmov 0.0   ;;  %s4332_s16 = smov 12   ;;  %s5997_s27 = scalar_lea.vmem %s6070_s11, %s4411_s21 }
  0x14   : > { %v4438_v9 = vadd.f32 %v3610_v1, %v633_v5  ;;  %v4440_v10 = vadd.f32 %v3610_v1, %v632_v6  ;;  %v4452_v15 = vadd.f32 %v3610_v1, %v631_v11  ;;  %v630_v16 = vmul.f32 %v3609_v0, %v615_v12  ;;  %v611_v27 = vld [vmem:[%s4420_s26] sm:$0xff]  ;;  %v574_v30 = vld [vmem:[%s4429_s12 + $0x8] sm:$0xff]  ;;  %v576_v35 = vld [vmem:[%s4429_s12 + $0x18] sm:$0xff]  ;;  %487 = vst.msk [vmem:[#allocation3 + $0x58] sm:$0xff] %vm475_vm1, %v4322_v52 }
  0x15   : > { %v4454_v17 = vadd.f32 %v3608_v13, %v588_v14  ;;  %v4470_v22 = vadd.f32 %v3610_v1, %v629_v20  ;;  %v4477_v25 = vadd.f32 %v3610_v1, %v628_v23  ;;  %v627_v26 = vmul.f32 %v3609_v0, %v612_v24  ;;  %v577_v36 = vld [vmem:[%s4429_s12 + $0x20] sm:$0xff]  ;;  %v578_v41 = vld [vmem:[%s4429_s12 + $0x28] sm:$0xff]  ;;  %v579_v42 = vld [vmem:[%s4429_s12 + $0x30] sm:$0xff]  ;;  %488 = vst.msk [vmem:[#allocation3 + $0x60] sm:$0xff] %vm475_vm1, %v4322_v52 }
  0x16   : > { %3845 = vmatprep.subr.msk.mxu0 %vm687_vm0, %v4438_v9  ;;  %v4463_v19 = vadd.f32 %v3610_v1, %v630_v16  ;;  %v626_v29 = vmul.f32 %v3609_v0, %v611_v27  ;;  %v589_v33 = vmul.f32 %v3607_v8, %v574_v30  ;;  %v590_v34 = vmul.f32 %v3607_v8, %v575_v32  ;;  %v580_v47 = vld [vmem:[%s4429_s12 + $0x38] sm:$0xff]  ;;  %v3611_v20 = vld [vmem:[%s6066_s7] ss:$0 sm:$0xff]  ;;  %v655_v24 = vld [vmem:[%s4665_s23 + $0x30] sm:$0xff]  ;;  %s4328_s12 = smov 104  }
  0x17   : > { %3846 = vmatpush3.xpose.msk.msra.mxu0 %vm687_vm0, %v4438_v9  ;;  %3861 = vmatprep.mubr.msk.f32.mxu0 %vm687_vm0, %v4454_v17  ;;  %v4484_v28 = vadd.f32 %v3610_v1, %v627_v26  ;;  %v591_v38 = vmul.f32 %v3607_v8, %v576_v35  ;;  %v592_v40 = vmul.f32 %v3607_v8, %v577_v36  ;;  %v4323_v14 = vmov 0   ;;  %v3612_v21 = vld [vmem:[%s6067_s8] ss:$0 sm:$0xff]  ;;  %v656_v23 = vld [vmem:[%s4665_s23 + $0x38] sm:$0xff]  ;;  %v654_v26 = vld [vmem:[%s4665_s23 + $0x28] sm:$0xff] }
  0x18   : > { %3847 = vmatprep.subr.msk.mxu0 %vm687_vm0, %v4440_v10  ;;  %v4491_v31 = vadd.f32 %v3610_v1, %v626_v29  ;;  %v4500_v37 = vadd.f32 %v3608_v13, %v589_v33  ;;  %v4504_v39 = vadd.f32 %v3608_v13, %v590_v34  ;;  %v593_v44 = vmul.f32 %v3607_v8, %v578_v41  ;;  %v653_v32 = vld [vmem:[%s4665_s23 + $0x20] sm:$0xff] }
  0x19   : > { %v4510_v43 = vadd.f32 %v3608_v13, %v591_v38  ;;  %v4514_v45 = vadd.f32 %v3608_v13, %v592_v40  ;;  %v594_v46 = vmul.f32 %v3607_v8, %v579_v42  ;;  %v595_v49 = vmul.f32 %v3607_v8, %v580_v47  ;;  %489 = vst.msk [vmem:[#allocation3 + $0x68] sm:$0xff] %vm475_vm1, %v4322_v52  ;;  %v652_v40 = vld [vmem:[%s4665_s23 + $0x18] sm:$0xff]  ;;  %v651_v42 = vld [vmem:[%s4665_s23 + $0x10] sm:$0xff]  ;;  %v4697_v47 = vld [vmem:[#allocation3] sm:$0xff] }
  0x1a   : > { %v4519_v48 = vadd.f32 %v3608_v13, %v593_v44  ;;  %490 = vst.msk [vmem:[#allocation3 + $0x70] sm:$0xff] %vm475_vm1, %v4322_v52  ;;  %491 = vst.msk [vmem:[#allocation3 + $0x78] sm:$0xff] %vm475_vm1, %v4322_v52  ;;  %4104 = vset.pattern.permute.xlu0 %v4323_v14  ;;  %4105 = vset.pattern.permute.xlu1 %v4323_v14  ;;  %v671_v27 = vmul.f32 %v3611_v20, %v656_v23  ;;  %v4734_v14 = vld [vmem:[#allocation3 + $0x20] sm:$0xff] }
  0x1b   : > { %3848 = vmatpush3.xpose.msk.msra.mxu0 %vm687_vm0, %v4440_v10  ;;  %v4523_v50 = vadd.f32 %v3608_v13, %v594_v46  ;;  %v4527_v51 = vadd.f32 %v3608_v13, %v595_v49  ;;  %492 = vst.msk [vmem:[#allocation3 + $0x80] sm:$0xff] %vm475_vm1, %v4322_v52  ;;  %493 = vst.msk [vmem:[#allocation3 + $0x88] sm:$0xff] %vm475_vm1, %v4322_v52  ;;  %v670_v29 = vmul.f32 %v3611_v20, %v655_v24  ;;  %v650_v49 = vld [vmem:[%s4665_s23 + $0x8] sm:$0xff] }
  0x1c   : > { %3849 = vmatprep.subr.msk.mxu0 %vm687_vm0, %v4452_v15  ;;  %494 = vst.msk [vmem:[#allocation3 + $0x90] sm:$0xff] %vm475_vm1, %v4322_v52  ;;  %495 = vst.msk [vmem:[#allocation3 + $0x98] sm:$0xff] %vm475_vm1, %v4322_v52  ;;  %v669_v30 = vmul.f32 %v3611_v20, %v654_v26  ;;  %v4677_v33 = vadd.f32 %v3612_v21, %v671_v27  ;;  %v668_v35 = vmul.f32 %v3611_v20, %v653_v32  ;;  %v4752_v27 = vld [vmem:[#allocation3 + $0x28] sm:$0xff] }
  0x1d   : > { %496 = vst.msk [vmem:[#allocation3 + $0xa0] sm:$0xff] %vm475_vm1, %v4322_v52  ;;  %497 = vst.msk [vmem:[#allocation3 + $0xa8] sm:$0xff] %vm475_vm1, %v4322_v52  ;;  %v4679_v34 = vadd.f32 %v3612_v21, %v670_v29  ;;  %v667_v41 = vmul.f32 %v3611_v20, %v652_v40  ;;  %v666_v46 = vmul.f32 %v3611_v20, %v651_v42  ;;  %v4754_v29 = vld [vmem:[#allocation3 + $0x30] sm:$0xff] }
  0x1e   : > { %498 = vst.msk [vmem:[#allocation3 + $0xb0] sm:$0xff] %vm475_vm1, %v4322_v52  ;;  %499 = vst.msk [vmem:[#allocation3 + $0xb8] sm:$0xff] %vm475_vm1, %v4322_v52  ;;  %3873 = vmatprep.subr.mxu1 %v4677_v33  ;;  %v4682_v36 = vadd.f32 %v3612_v21, %v669_v30  ;;  %v4686_v38 = vadd.f32 %v3612_v21, %v668_v35 }
  0x1f   : > { %3850 = vmatpush3.xpose.msk.msra.mxu0 %vm687_vm0, %v4452_v15  ;;  %500 = vst.msk [vmem:[#allocation3 + $0xc0] sm:$0xff] %vm475_vm1, %v4322_v52  ;;  %501 = vst.msk [vmem:[#allocation3 + $0xc8] sm:$0xff] %vm475_vm1, %v4322_v52  ;;  %3874 = vmatpush3.msra.mxu1 %v4677_v33  ;;  %v4695_v44 = vadd.f32 %v3612_v21, %v667_v41 }
  0x20   : > { %3851 = vmatprep.subr.msk.mxu0 %vm687_vm0, %v4463_v19  ;;  %502 = vst.msk [vmem:[#allocation3 + $0xd0] sm:$0xff] %vm475_vm1, %v4322_v52  ;;  %503 = vst.msk [vmem:[#allocation3 + $0xd8] sm:$0xff] %vm475_vm1, %v4322_v52  ;;  %3875 = vmatprep.subr.mxu1 %v4679_v34 }
  0x21   : > { %504 = vst.msk [vmem:[#allocation3 + $0xe0] sm:$0xff] %vm475_vm1, %v4322_v52  ;;  %505 = vst.msk [vmem:[#allocation3 + $0xe8] sm:$0xff] %vm475_vm1, %v4322_v52  ;;  %3876 = vmatpush3.msra.mxu1 %v4679_v34 }
  0x22   : > { %506 = vst.msk [vmem:[#allocation3 + $0xf0] sm:$0xff] %vm475_vm1, %v4322_v52  ;;  %507 = vst.msk [vmem:[#allocation3 + $0xf8] sm:$0xff] %vm475_vm1, %v4322_v52  ;;  %3877 = vmatprep.subr.mxu1 %v4682_v36  ;;  %v4701_v52 = vadd.f32 %v3612_v21, %v666_v46  ;;  %v4772_v46 = vld [vmem:[#allocation3 + $0x38] sm:$0xff] }
  0x23   : > { %3852 = vmatpush3.xpose.msk.msra.mxu0 %vm687_vm0, %v4463_v19  ;;  %509 = vst.msk [vmem:[#allocation4 + $0x8] sm:$0xff] %vm475_vm1, %v6071_v18  ;;  %508 = vst.msk [vmem:[#allocation4] sm:$0xff] %vm475_vm1, %v6071_v18  ;;  %3878 = vmatpush3.msra.mxu1 %v4682_v36 }
  0x24   : > { %3853 = vmatprep.subr.msk.mxu0 %vm687_vm0, %v4470_v22  ;;  %510 = vst.msk [vmem:[#allocation4 + $0x10] sm:$0xff] %vm475_vm1, %v6071_v18  ;;  %511 = vst.msk [vmem:[#allocation4 + $0x18] sm:$0xff] %vm475_vm1, %v6071_v18  ;;  %3879 = vmatprep.subr.mxu1 %v4686_v38 }
  0x25   : > { %512 = vst.msk [vmem:[#allocation4 + $0x20] sm:$0xff] %vm475_vm1, %v6071_v18  ;;  %513 = vst.msk [vmem:[#allocation4 + $0x28] sm:$0xff] %vm475_vm1, %v6071_v18  ;;  %3880 = vmatpush3.msra.mxu1 %v4686_v38 }
  0x26   : > { %514 = vst.msk [vmem:[#allocation4 + $0x30] sm:$0xff] %vm475_vm1, %v6071_v18  ;;  %515 = vst.msk [vmem:[#allocation4 + $0x38] sm:$0xff] %vm475_vm1, %v6071_v18  ;;  %3881 = vmatprep.subr.mxu1 %v4695_v44 }
  0x27   : > { %3854 = vmatpush3.xpose.msk.msra.mxu0 %vm687_vm0, %v4470_v22  ;;  %516 = vst.msk [vmem:[#allocation4 + $0x40] sm:$0xff] %vm475_vm1, %v6071_v18  ;;  %517 = vst.msk [vmem:[#allocation4 + $0x48] sm:$0xff] %vm475_vm1, %v6071_v18  ;;  %3882 = vmatpush3.msra.mxu1 %v4695_v44 }
  0x28   : > { %3855 = vmatprep.subr.msk.mxu0 %vm687_vm0, %v4477_v25  ;;  %518 = vst.msk [vmem:[#allocation4 + $0x50] sm:$0xff] %vm475_vm1, %v6071_v18  ;;  %519 = vst.msk [vmem:[#allocation4 + $0x58] sm:$0xff] %vm475_vm1, %v6071_v18  ;;  %3883 = vmatprep.subr.mxu1 %v4701_v52 }
  0x29   : > { %520 = vst.msk [vmem:[#allocation4 + $0x60] sm:$0xff] %vm475_vm1, %v6071_v18  ;;  %521 = vst.msk [vmem:[#allocation4 + $0x68] sm:$0xff] %vm475_vm1, %v6071_v18  ;;  %3884 = vmatpush3.msra.mxu1 %v4701_v52 }
  0x2a   : > { %522 = vst.msk [vmem:[#allocation4 + $0x70] sm:$0xff] %vm475_vm1, %v6071_v18  ;;  %523 = vst.msk [vmem:[#allocation4 + $0x78] sm:$0xff] %vm475_vm1, %v6071_v18 }
  0x2b   : > { %3856 = vmatpush3.xpose.msk.msra.mxu0 %vm687_vm0, %v4477_v25  ;;  %524 = vst.msk [vmem:[#allocation4 + $0x80] sm:$0xff] %vm475_vm1, %v6071_v18  ;;  %525 = vst.msk [vmem:[#allocation4 + $0x88] sm:$0xff] %vm475_vm1, %v6071_v18 }
  0x2c   : > { %3857 = vmatprep.subr.msk.mxu0 %vm687_vm0, %v4484_v28  ;;  %526 = vst.msk [vmem:[#allocation4 + $0x90] sm:$0xff] %vm475_vm1, %v6071_v18  ;;  %527 = vst.msk [vmem:[#allocation4 + $0x98] sm:$0xff] %vm475_vm1, %v6071_v18 }
  0x2d   : > { %528 = vst.msk [vmem:[#allocation4 + $0xa0] sm:$0xff] %vm475_vm1, %v6071_v18  ;;  %529 = vst.msk [vmem:[#allocation4 + $0xa8] sm:$0xff] %vm475_vm1, %v6071_v18 }
  0x2e   : > { %530 = vst.msk [vmem:[#allocation4 + $0xb0] sm:$0xff] %vm475_vm1, %v6071_v18  ;;  %531 = vst.msk [vmem:[#allocation4 + $0xb8] sm:$0xff] %vm475_vm1, %v6071_v18 }
  0x2f   : > { %3858 = vmatpush3.xpose.msk.msra.mxu0 %vm687_vm0, %v4484_v28  ;;  %532 = vst.msk [vmem:[#allocation4 + $0xc0] sm:$0xff] %vm475_vm1, %v6071_v18  ;;  %533 = vst.msk [vmem:[#allocation4 + $0xc8] sm:$0xff] %vm475_vm1, %v6071_v18 }
  0x30   : > { %3859 = vmatprep.subr.msk.mxu0 %vm687_vm0, %v4491_v31  ;;  %534 = vst.msk [vmem:[#allocation4 + $0xd0] sm:$0xff] %vm475_vm1, %v6071_v18  ;;  %535 = vst.msk [vmem:[#allocation4 + $0xd8] sm:$0xff] %vm475_vm1, %v6071_v18 }
  0x31   : > { %536 = vst.msk [vmem:[#allocation4 + $0xe0] sm:$0xff] %vm475_vm1, %v6071_v18  ;;  %537 = vst.msk [vmem:[#allocation4 + $0xe8] sm:$0xff] %vm475_vm1, %v6071_v18 }
  0x32   : > { %538 = vst.msk [vmem:[#allocation4 + $0xf0] sm:$0xff] %vm475_vm1, %v6071_v18  ;;  %539 = vst.msk [vmem:[#allocation4 + $0xf8] sm:$0xff] %vm475_vm1, %v6071_v18 }
  0x33   : > { %3860 = vmatpush3.xpose.msk.msra.mxu0 %vm687_vm0, %v4491_v31  ;;  %6110 = vst [vmem:[#allocation5_spill] sm:$0xff] %v4677_v33  ;;  %6111 = vst [vmem:[#allocation6_spill] sm:$0xff] %v4679_v34 }
  0x34   : > { %6112 = vst [vmem:[#allocation7_spill] sm:$0xff] %v4686_v38  ;;  %6113 = vst [vmem:[#allocation8_spill] sm:$0xff] %v4695_v44 }
  0x35   : > { %6114 = vst [vmem:[#allocation9_spill] sm:$0xff] %v4697_v47  ;;  %6115 = vst [vmem:[#allocation10_spill] sm:$0xff] %v4701_v52 }
  0x36   : > { %3862 = vmatmul.mubr.msk.f32.vlgmr.msra.gmra.mxu0 %vm687_vm0, %v4500_v37  ;;  %6119 = vst [vmem:[#allocation14_spill] sm:$0xff] %v4752_v27  ;;  %6121 = vst [vmem:[#allocation16_spill] sm:$0xff] %v4772_v46 }
  0x37   : > { %3864 = vmatprep.mubr.msk.f32.mxu0 %vm687_vm0, %v4504_v39 }
  0x3a   : > { %3865 = vmatmul.mubr.msk.f32.gmra.mxu0 %vm687_vm0, %v4510_v43 }
  0x3b   : > { %3867 = vmatprep.mubr.msk.f32.mxu0 %vm687_vm0, %v4514_v45 }
  0x3e   : > { %3868 = vmatmul.mubr.msk.f32.gmra.mxu0 %vm687_vm0, %v4519_v48 }
  0x3f   : > { %3870 = vmatprep.mubr.msk.f32.mxu0 %vm687_vm0, %v4523_v50 }
  0x42   : > { %3871 = vmatmul.mubr.msk.f32.gmra.mxu0 %vm687_vm0, %v4527_v51 }
  0xf6   : > { %v3863_v53 = vpop.f32.mrf.mxu0 }
  0xf7   : > { %v4567_v57 = vmul.f32 0.35355338, %v3863_v53  ;;  %v665_v53 = vmul.f32 %v3611_v20, %v650_v49 }
  0xf8   : > { %v802_v54 = vpop.f32.mrf.mxu0 }
  0xf9   : > { %v4565_v55 = vmul.f32 0.35355338, %v802_v54  ;;  %v861_v63 = vsel %vm857_vm2, %v4567_v57, -inf }
  0xfa   : > { %v3866_v56 = vpop.f32.mrf.mxu0 }
  0xfb   : > { %v858_v58 = vsel %vm857_vm2, %v4565_v55, -inf  ;;  %v4571_v60 = vmul.f32 0.35355338, %v3866_v56  ;;  %v649_v56 = vld [vmem:[%s4665_s23] sm:$0xff] }
  0xfc   : > { %859 = vmax.xlane.f32.xlu0 %v858_v58  ;;  %v812_v59 = vpop.f32.mrf.mxu0 }
  0xfd   : > { %v4573_v61 = vmul.f32 0.35355338, %v812_v59  ;;  %v867_v2 = vsel %vm857_vm2, %v4571_v60, -inf  ;;  %v4709_v59 = vadd.f32 %v3612_v21, %v665_v53 }
  0xfe   : > { %v3869_v62 = vpop.f32.mrf.mxu0 }
  0xff   : > { %v864_v0 = vsel %vm857_vm2, %v4573_v61, -inf  ;;  %v4581_v3 = vmul.f32 0.35355338, %v3869_v62  ;;  %v664_v62 = vmul.f32 %v3611_v20, %v649_v56  ;;  %3885 = vmatprep.subr.mxu1 %v4709_v59 }
 0x100   : > { %862 = vmax.xlane.f32.xlu0 %v861_v63  ;;  %865 = vmax.xlane.f32.xlu1 %v864_v0  ;;  %v822_v1 = vpop.f32.mrf.mxu0  ;;  %v4711_v63 = vld [vmem:[#allocation3 + $0x8] sm:$0xff]  ;;  %v4713_v0 = vld [vmem:[#allocation3 + $0x10] sm:$0xff] }
 0x101   : > { %v4583_v4 = vmul.f32 0.35355338, %v822_v1  ;;  %v873_v8 = vsel %vm857_vm2, %v4581_v3, -inf  ;;  %3886 = vmatpush3.msra.mxu1 %v4709_v59 }
 0x102   : > { %v3872_v5 = vpop.f32.mrf.mxu0 }
 0x103   : > { %v870_v6 = vsel %vm857_vm2, %v4583_v4, -inf  ;;  %v4589_v11 = vmul.f32 0.35355338, %v3872_v5 }
 0x104   : > { %868 = vmax.xlane.f32.xlu1 %v867_v2  ;;  %871 = vmax.xlane.f32.xlu0 %v870_v6  ;;  %v832_v7 = vpop.f32.mrf.mxu0  ;;  %v4722_v2 = vadd.f32 %v3612_v21, %v664_v62 }
 0x105   : > { %v4591_v12 = vmul.f32 0.35355338, %v832_v7  ;;  %v879_v16 = vsel %vm857_vm2, %v4589_v11, -inf }
 0x106   : > { %3887 = vmatprep.subr.mxu1 %v4722_v2 }
 0x107   : > { %v876_v13 = vsel %vm857_vm2, %v4591_v12, -inf  ;;  %3888 = vmatpush3.msra.mxu1 %v4722_v2 }
 0x108   : > { %874 = vmax.xlane.f32.xlu1 %v873_v8  ;;  %877 = vmax.xlane.f32.xlu0 %v876_v13  ;;  %v4732_v13 = vld [vmem:[#allocation3 + $0x18] sm:$0xff] }
 0x109   : > { %6117 = vst [vmem:[#allocation12_spill] sm:$0xff] %v4732_v13 }
 0x10c   : > { %880 = vmax.xlane.f32.xlu1 %v879_v16 }
 0x185   : > { %v860_v54 = vpop.xlane.xlu0 %859 }
 0x186   : > { %v4706_v58 = vmax.f32 %v4697_v47, %v860_v54 }
 0x188   : > { %6116 = vst [vmem:[#allocation11_spill] sm:$0xff] %v4706_v58  ;;  %1237 = vst.msk [vmem:[#allocation3] sm:$0xff] %vm475_vm1, %v4706_v58  ;;  %916 = vperm.xlu0 %4104, %v4706_v58  }
 0x189   : > { %v863_v5 = vpop.xlane.xlu0 %862  ;;  %v866_v6 = vpop.xlane.xlu1 %865 }
 0x18a   : > { %v4726_v7 = vmax.f32 %v4711_v63, %v863_v5  ;;  %v4729_v8 = vmax.f32 %v4713_v0, %v866_v6 }
 0x18c   : > { %1238 = vst.msk [vmem:[#allocation3 + $0x8] sm:$0xff] %vm475_vm1, %v4726_v7  ;;  %1239 = vst.msk [vmem:[#allocation3 + $0x10] sm:$0xff] %vm475_vm1, %v4729_v8  ;;  %921 = vperm.xlu1 %4105, %v4726_v7  }
 0x18d   : > { %v869_v21 = vpop.xlane.xlu1 %868  ;;  %v872_v23 = vpop.xlane.xlu0 %871 }
 0x18e   : > { %v4747_v24 = vmax.f32 %v4732_v13, %v869_v21  ;;  %v4750_v26 = vmax.f32 %v4734_v14, %v872_v23 }
 0x190   : > { %6118 = vst [vmem:[#allocation13_spill] sm:$0xff] %v4747_v24  ;;  %1240 = vst.msk [vmem:[#allocation3 + $0x18] sm:$0xff] %vm475_vm1, %v4747_v24  ;;  %1275 = vrot.lane.b32.xlu1 %v4438_v9, %s4325_s28 }
 0x191   : > { %1241 = vst.msk [vmem:[#allocation3 + $0x20] sm:$0xff] %vm475_vm1, %v4750_v26  ;;  %v875_v35 = vpop.xlane.xlu1 %874  ;;  %v878_v40 = vpop.xlane.xlu0 %877 }
 0x192   : > { %v4767_v41 = vmax.f32 %v4752_v27, %v875_v35  ;;  %v4770_v42 = vmax.f32 %v4754_v29, %v878_v40 }
 0x194   : > { %6120 = vst [vmem:[#allocation15_spill] sm:$0xff] %v4767_v41  ;;  %1242 = vst.msk [vmem:[#allocation3 + $0x28] sm:$0xff] %vm475_vm1, %v4767_v41  ;;  %1273 = vrot.lane.b32.xlu1 %v4440_v10, %s4325_s28 }
 0x195   : > { %1243 = vst.msk [vmem:[#allocation3 + $0x30] sm:$0xff] %vm475_vm1, %v4770_v42  ;;  %v881_v54 = vpop.xlane.xlu1 %880 }
 0x196   : > { %v4785_v56 = vmax.f32 %v4772_v46, %v881_v54  ;;  %v4973_v46 = vld [vmem:[#allocation3 + $0x68] sm:$0xff] }
 0x197   : > { %6139 = vst [vmem:[#allocation34_spill] sm:$0xff] %v4973_v46 }
 0x198   : > { %6122 = vst [vmem:[#allocation17_spill] sm:$0xff] %v4785_v56  ;;  %1244 = vst.msk [vmem:[#allocation3 + $0x38] sm:$0xff] %vm475_vm1, %v4785_v56  ;;  %931 = vperm.xlu1 %4105, %v4747_v24   ;;  %951 = vperm.xlu0 %4104, %v4785_v56   ;;  %v4958_v56 = vld [vmem:[#allocation3 + $0x50] sm:$0xff] }
 0x199   : > { %6136 = vst [vmem:[#allocation31_spill] sm:$0xff] %v4958_v56 }
 0x19c   : > { %926 = vperm.xlu1 %4105, %v4729_v8   ;;  %1269 = vrot.lane.b32.xlu0 %v4463_v19, %s4325_s28 }
 0x1a0   : > { %941 = vperm.xlu1 %4105, %v4767_v41   ;;  %1265 = vrot.lane.b32.xlu0 %v4477_v25, %s4325_s28  ;;  %v4975_v41 = vld [vmem:[#allocation3 + $0x60] sm:$0xff] }
 0x1a1   : > { %6140 = vst [vmem:[#allocation35_spill] sm:$0xff] %v4975_v41 }
 0x1a4   : > { %936 = vperm.xlu1 %4105, %v4750_v26   ;;  %1261 = vrot.lane.b32.xlu0 %v4491_v31, %s4325_s28 }
 0x1a8   : > { %946 = vperm.xlu1 %4105, %v4770_v42   ;;  %1247 = vrot.lane.b32.xlu0 %v4500_v37, %s4325_s28 }
 0x1ac   : > { %1271 = vrot.lane.b32.xlu1 %v4452_v15, %s4325_s28  ;;  %1251 = vrot.lane.b32.xlu0 %v4510_v43, %s4325_s28 }
 0x1b0   : > { %1267 = vrot.lane.b32.xlu1 %v4470_v22, %s4325_s28  ;;  %1255 = vrot.lane.b32.xlu0 %v4519_v48, %s4325_s28 }
 0x1b4   : > { %1263 = vrot.lane.b32.xlu1 %v4484_v28, %s4325_s28  ;;  %1259 = vrot.lane.b32.xlu0 %v4527_v51, %s4325_s28 }
 0x1b8   : > { %1245 = vrot.lane.b32.xlu1 %v4454_v17, %s4325_s28 }
 0x1bc   : > { %1249 = vrot.lane.b32.xlu1 %v4504_v39, %s4325_s28 }
 0x1c0   : > { %1253 = vrot.lane.b32.xlu1 %v4514_v45, %s4325_s28 }
 0x1c4   : > { %1257 = vrot.lane.b32.xlu1 %v4523_v50, %s4325_s28 }
 0x203   : > { %v917_v5 = vpop.permute.xlu0 %916 }
 0x204   : > { %v954_v6 = vsub.f32 %v4565_v55, %v917_v5 }
 0x206   : > { %v962_v21 = vmul.f32 1.442695, %v954_v6 }
 0x207   : > { %v922_v23 = vpop.permute.xlu1 %921 }
 0x208   : > { %4106 = vpow2.f32 %v962_v21  ;;  %v955_v35 = vsub.f32 %v4567_v57, %v922_v23 }
 0x20a   : > { %v964_v40 = vmul.f32 1.442695, %v955_v35 }
 0x20b   : > { %v1276_v54 = vpop.permute.xlu1 %1275 }
 0x20c   : > { %4108 = vpow2.f32 %v964_v40  ;;  %3901 = vmatprep.subr.msk.mxu1 %vm687_vm0, %v1276_v54 }
 0x20f   : > { %v1274_v62 = vpop.permute.xlu1 %1273 }
 0x213   : > { %v932_v49 = vpop.permute.xlu1 %931 }
 0x214   : > { %v957_v1 = vsub.f32 %v4571_v60, %v932_v49  ;;  %v952_v49 = vpop.permute.xlu0 %951 }
 0x215   : > { %v4828_v30 = vpop.eup %4106 }
 0x216   : > { %3889 = vmatprep.mubr.msk.f32.mxu1 %vm857_vm2, %v4828_v30  ;;  %v968_v57 = vmul.f32 1.442695, %v957_v1  ;;  %v961_v1 = vsub.f32 %v4589_v11, %v952_v49 }
 0x217   : > { %v927_v55 = vpop.permute.xlu1 %926 }
 0x218   : > { %v956_v5 = vsub.f32 %v4573_v61, %v927_v55  ;;  %v1270_v18 = vpop.permute.xlu0 %1269 }
 0x219   : > { %v4834_v6 = vpop.eup %4108 }
 0x21a   : > { %v966_v21 = vmul.f32 1.442695, %v956_v5  ;;  %3890 = vmatmul.mubr.msk.f32.vlgmr.msra.gmra.mxu1 %vm857_vm2, %v4834_v6 }
 0x21b   : > { %3902 = vmatpush3.xpose.msk.msra.mxu1 %vm687_vm0, %v1276_v54  ;;  %v942_v23 = vpop.permute.xlu1 %941 }
 0x21c   : > { %4110 = vpow2.f32 %v966_v21  ;;  %3903 = vmatprep.subr.msk.mxu1 %vm687_vm0, %v1274_v62  ;;  %v959_v60 = vsub.f32 %v4581_v3, %v942_v23  ;;  %v976_v21 = vmul.f32 1.442695, %v961_v1 }
 0x21d   : > { %4112 = vpow2.f32 %v968_v57 }
 0x21e   : > { %v972_v40 = vmul.f32 1.442695, %v959_v60 }
 0x21f   : > { %3904 = vmatpush3.xpose.msk.msra.mxu1 %vm687_vm0, %v1274_v62  ;;  %v937_v61 = vpop.permute.xlu1 %936 }
 0x220   : > { %v958_v35 = vsub.f32 %v4583_v4, %v937_v61 }
 0x222   : > { %v970_v55 = vmul.f32 1.442695, %v958_v35 }
 0x223   : > { %v947_v5 = vpop.permute.xlu1 %946 }
 0x224   : > { %4114 = vpow2.f32 %v970_v55  ;;  %v960_v54 = vsub.f32 %v4591_v12, %v947_v5  ;;  %v1266_v12 = vpop.permute.xlu0 %1265 }
 0x225   : > { %4116 = vpow2.f32 %v972_v40 }
 0x226   : > { %v974_v53 = vmul.f32 1.442695, %v960_v54 }
 0x227   : > { %v1272_v57 = vpop.permute.xlu1 %1271 }
 0x228   : > { %4118 = vpow2.f32 %v974_v53  ;;  %3905 = vmatprep.subr.msk.mxu1 %vm687_vm0, %v1272_v57  ;;  %v1262_v61 = vpop.permute.xlu0 %1261 }
 0x229   : > { %v4846_v3 = vpop.eup %4110  ;;  %4120 = vpow2.f32 %v976_v21  ;;  %3906 = vmatpush3.xpose.msk.msra.mxu1 %vm687_vm0, %v1272_v57 }
 0x22a   : > { %v4849_v4 = vpop.eup %4112  ;;  %3892 = vmatprep.mubr.msk.f32.mxu1 %vm857_vm2, %v4846_v3  ;;  %3907 = vmatprep.subr.msk.mxu1 %vm687_vm0, %v1270_v18 }
 0x22b   : > { %3893 = vmatmul.mubr.msk.f32.gmra.mxu1 %vm857_vm2, %v4849_v4  ;;  %v1268_v11 = vpop.permute.xlu1 %1267 }
 0x22c   : > { %v1248_v35 = vpop.permute.xlu0 %1247 }
 0x22d   : > { %3908 = vmatpush3.xpose.msk.msra.mxu1 %vm687_vm0, %v1270_v18 }
 0x22e   : > { %3909 = vmatprep.subr.msk.mxu1 %vm687_vm0, %v1268_v11 }
 0x22f   : > { %v1264_v62 = vpop.permute.xlu1 %1263 }
 0x230   : > { %v1252_v40 = vpop.permute.xlu0 %1251 }
 0x231   : > { %v4858_v53 = vpop.eup %4114  ;;  %3910 = vmatpush3.xpose.msk.msra.mxu1 %vm687_vm0, %v1268_v11 }
 0x232   : > { %v4861_v23 = vpop.eup %4116  ;;  %3895 = vmatprep.mubr.msk.f32.mxu1 %vm857_vm2, %v4858_v53  ;;  %3911 = vmatprep.subr.msk.mxu1 %vm687_vm0, %v1266_v12 }
 0x233   : > { %3896 = vmatmul.mubr.msk.f32.gmra.mxu1 %vm857_vm2, %v4861_v23  ;;  %v1246_v18 = vpop.permute.xlu1 %1245 }
 0x234   : > { %v1256_v5 = vpop.permute.xlu0 %1255 }
 0x235   : > { %v4868_v60 = vpop.eup %4118  ;;  %3912 = vmatpush3.xpose.msk.msra.mxu1 %vm687_vm0, %v1266_v12 }
 0x236   : > { %v4871_v49 = vpop.eup %4120  ;;  %3898 = vmatprep.mubr.msk.f32.mxu1 %vm857_vm2, %v4868_v60  ;;  %3913 = vmatprep.subr.msk.mxu1 %vm687_vm0, %v1264_v62 }
 0x237   : > { %3899 = vmatmul.mubr.msk.f32.gmra.mxu1 %vm857_vm2, %v4871_v49  ;;  %v1250_v1 = vpop.permute.xlu1 %1249 }
 0x238   : > { %3917 = vmatprep.mubr.msk.f32.mxu1 %vm687_vm0, %v1246_v18  ;;  %v1260_v21 = vpop.permute.xlu0 %1259 }
 0x239   : > { %3914 = vmatpush3.xpose.msk.msra.mxu1 %vm687_vm0, %v1264_v62 }
 0x23a   : > { %3915 = vmatprep.subr.msk.mxu1 %vm687_vm0, %v1262_v61 }
 0x23b   : > { %v1254_v55 = vpop.permute.xlu1 %1253 }
 0x23d   : > { %3916 = vmatpush3.xpose.msk.msra.mxu1 %vm687_vm0, %v1262_v61 }
 0x23f   : > { %v1258_v54 = vpop.permute.xlu1 %1257 }
 0x240   : > { %3918 = vmatmul.mubr.msk.f32.vlgmr.msra.gmra.mxu1 %vm687_vm0, %v1248_v35 }
 0x241   : > { %3920 = vmatprep.mubr.msk.f32.mxu1 %vm687_vm0, %v1250_v1 }
 0x244   : > { %3921 = vmatmul.mubr.msk.f32.gmra.mxu1 %vm687_vm0, %v1252_v40 }
 0x245   : > { %3923 = vmatprep.mubr.msk.f32.mxu1 %vm687_vm0, %v1254_v55 }
 0x248   : > { %3924 = vmatmul.mubr.msk.f32.gmra.mxu1 %vm687_vm0, %v1256_v5 }
 0x249   : > { %3926 = vmatprep.mubr.msk.f32.mxu1 %vm687_vm0, %v1258_v54 }
 0x24c   : > { %3927 = vmatmul.mubr.msk.f32.gmra.mxu1 %vm687_vm0, %v1260_v21 }
 0x2da   : > { %v4889_v57 = vpop.f32.mrf.mxu1 }
 0x2db   : > { %6123 = vst [vmem:[#allocation18_spill] sm:$0xff] %v4889_v57 }
 0x2dc   : > { %v4891_v11 = vpop.f32.mrf.mxu1 }
 0x2dd   : > { %6124 = vst [vmem:[#allocation19_spill] sm:$0xff] %v4891_v11 }
 0x2eb   : > { %v4893_v12 = vpop.f32.mrf.mxu1 }
 0x2ec   : > { %6125 = vst [vmem:[#allocation20_spill] sm:$0xff] %v4893_v12 }
 0x2ed   : > { %v4895_v62 = vpop.f32.mrf.mxu1 }
 0x2ee   : > { %6126 = vst [vmem:[#allocation21_spill] sm:$0xff] %v4895_v62 }
 0x2f3   : > { %v4897_v18 = vpop.f32.mrf.mxu1 }
 0x2f4   : > { %6127 = vst [vmem:[#allocation22_spill] sm:$0xff] %v4897_v18 }
 0x2f5   : > { %v4899_v61 = vpop.f32.mrf.mxu1 }
 0x2f6   : > { %6128 = vst [vmem:[#allocation23_spill] sm:$0xff] %v4899_v61 }
 0x2f7   : > { %v4901_v35 = vpop.f32.mrf.mxu1 }
 0x2f8   : > { %6129 = vst [vmem:[#allocation24_spill] sm:$0xff] %v4901_v35 }
 0x2f9   : > { %v4903_v1 = vpop.f32.mrf.mxu1 }
 0x2fa   : > { %6130 = vst [vmem:[#allocation25_spill] sm:$0xff] %v4903_v1 }
 0x300   : > { %v3919_v40 = vpop.f32.mrf.mxu1 }
 0x301   : > { %v4905_v55 = vmul.f32 0.35355338, %v3919_v40 }
 0x302   : > { %v1375_v5 = vpop.f32.mrf.mxu1 }
 0x303   : > { %v4907_v54 = vmul.f32 0.35355338, %v1375_v5  ;;  %v1434_v21 = vsel %vm857_vm2, %v4905_v55, -inf }
 0x304   : > { %1435 = vmax.xlane.f32.xlu0 %v1434_v21  ;;  %v3922_v32 = vpop.f32.mrf.mxu1 }
 0x305   : > { %v1431_v20 = vsel %vm857_vm2, %v4907_v54, -inf  ;;  %v4913_v16 = vmul.f32 0.35355338, %v3922_v32 }
 0x306   : > { %1432 = vmax.xlane.f32.xlu1 %v1431_v20  ;;  %v1385_v35 = vpop.f32.mrf.mxu1 }
 0x307   : > { %v4915_v18 = vmul.f32 0.35355338, %v1385_v35  ;;  %v1440_v40 = vsel %vm857_vm2, %v4913_v16, -inf }
 0x308   : > { %v3925_v12 = vpop.f32.mrf.mxu1 }
 0x309   : > { %v1437_v5 = vsel %vm857_vm2, %v4915_v18, -inf  ;;  %v4921_v11 = vmul.f32 0.35355338, %v3925_v12 }
 0x30a   : > { %1441 = vmax.xlane.f32.xlu1 %v1440_v40  ;;  %1438 = vmax.xlane.f32.xlu0 %v1437_v5  ;;  %v1395_v21 = vpop.f32.mrf.mxu1  ;;  %v4941_v5 = vld [vmem:[#allocation3 + $0x48] sm:$0xff] }
 0x30b   : > { %v4923_v1 = vmul.f32 0.35355338, %v1395_v21  ;;  %v1446_v20 = vsel %vm857_vm2, %v4921_v11, -inf  ;;  %6131 = vst [vmem:[#allocation26_spill] sm:$0xff] %v4941_v5 }
 0x30c   : > { %v3928_v32 = vpop.f32.mrf.mxu1 }
 0x30d   : > { %v1443_v35 = vsel %vm857_vm2, %v4923_v1, -inf  ;;  %v4929_v61 = vmul.f32 0.35355338, %v3928_v32 }
 0x30e   : > { %1447 = vmax.xlane.f32.xlu1 %v1446_v20  ;;  %1444 = vmax.xlane.f32.xlu0 %v1443_v35  ;;  %v1405_v62 = vpop.f32.mrf.mxu1 }
 0x30f   : > { %v4931_v57 = vmul.f32 0.35355338, %v1405_v62  ;;  %v1452_v12 = vsel %vm857_vm2, %v4929_v61, -inf  ;;  %v4943_v62 = vld [vmem:[#allocation3 + $0x40] sm:$0xff] }
 0x310   : > { %6132 = vst [vmem:[#allocation27_spill] sm:$0xff] %v4943_v62 }
 0x311   : > { %v1449_v40 = vsel %vm857_vm2, %v4931_v57, -inf }
 0x312   : > { %1453 = vmax.xlane.f32.xlu1 %v1452_v12  ;;  %1450 = vmax.xlane.f32.xlu0 %v1449_v40  ;;  %v4956_v40 = vld [vmem:[#allocation3 + $0x58] sm:$0xff] }
 0x313   : > { %6135 = vst [vmem:[#allocation30_spill] sm:$0xff] %v4956_v40 }
 0x323   : > { %1630 = vrot.lane.b32.xlu1 %v4677_v33, %s4326_s29 }
 0x328   : > { %1628 = vrot.lane.b32.xlu0 %v4679_v34, %s4326_s29 }
 0x38d   : > { %v1436_v21 = vpop.xlane.xlu0 %1435 }
 0x38e   : > { %v4946_v20 = vmax.f32 %v4941_v5, %v1436_v21  ;;  %v4995_v21 = vld [vmem:[#allocation3 + $0x78] sm:$0xff] }
 0x38f   : > { %v1433_v32 = vpop.xlane.xlu1 %1432  ;;  %6143 = vst [vmem:[#allocation38_spill] sm:$0xff] %v4995_v21 }
 0x390   : > { %6133 = vst [vmem:[#allocation28_spill] sm:$0xff] %v4946_v20  ;;  %1843 = vst.msk [vmem:[#allocation3 + $0x48] sm:$0xff] %vm475_vm1, %v4946_v20  ;;  %v4953_v12 = vmax.f32 %v4943_v62, %v1433_v32  ;;  %1494 = vperm.xlu1 %4105, %v4946_v20  }
 0x392   : > { %6134 = vst [vmem:[#allocation29_spill] sm:$0xff] %v4953_v12  ;;  %1842 = vst.msk [vmem:[#allocation3 + $0x40] sm:$0xff] %vm475_vm1, %v4953_v12  ;;  %1489 = vperm.xlu0 %4104, %v4953_v12  }
 0x393   : > { %v1442_v35 = vpop.xlane.xlu1 %1441  ;;  %v1439_v5 = vpop.xlane.xlu0 %1438 }
 0x394   : > { %1626 = vrot.lane.b32.xlu1 %v4682_v36, %s4326_s29  ;;  %v4968_v32 = vmax.f32 %v4956_v40, %v1442_v35  ;;  %v4971_v20 = vmax.f32 %v4958_v56, %v1439_v5  ;;  %v4997_v40 = vld [vmem:[#allocation3 + $0x70] sm:$0xff] }
 0x395   : > { %6144 = vst [vmem:[#allocation39_spill] sm:$0xff] %v4997_v40 }
 0x396   : > { %6137 = vst [vmem:[#allocation32_spill] sm:$0xff] %v4968_v32  ;;  %6138 = vst [vmem:[#allocation33_spill] sm:$0xff] %v4971_v20  ;;  %1624 = vrot.lane.b32.xlu0 %v4686_v38, %s4326_s29 }
 0x397   : > { %1845 = vst.msk [vmem:[#allocation3 + $0x58] sm:$0xff] %vm475_vm1, %v4968_v32  ;;  %1844 = vst.msk [vmem:[#allocation3 + $0x50] sm:$0xff] %vm475_vm1, %v4971_v20  ;;  %v1448_v5 = vpop.xlane.xlu1 %1447  ;;  %v1445_v12 = vpop.xlane.xlu0 %1444 }
 0x398   : > { %1622 = vrot.lane.b32.xlu1 %v4695_v44, %s4326_s29  ;;  %v4990_v62 = vmax.f32 %v4973_v46, %v1448_v5  ;;  %v4993_v27 = vmax.f32 %v4975_v41, %v1445_v12 }
 0x39a   : > { %6141 = vst [vmem:[#allocation36_spill] sm:$0xff] %v4990_v62  ;;  %6142 = vst [vmem:[#allocation37_spill] sm:$0xff] %v4993_v27  ;;  %1620 = vrot.lane.b32.xlu0 %v4701_v52, %s4326_s29 }
 0x39b   : > { %1847 = vst.msk [vmem:[#allocation3 + $0x68] sm:$0xff] %vm475_vm1, %v4990_v62  ;;  %1846 = vst.msk [vmem:[#allocation3 + $0x60] sm:$0xff] %vm475_vm1, %v4993_v27  ;;  %v1454_v12 = vpop.xlane.xlu1 %1453  ;;  %v1451_v56 = vpop.xlane.xlu0 %1450 }
 0x39c   : > { %1504 = vperm.xlu1 %4105, %v4968_v32   ;;  %v5011_v24 = vmax.f32 %v4995_v21, %v1454_v12  ;;  %v5014_v13 = vmax.f32 %v4997_v40, %v1451_v56 }
 0x39e   : > { %6145 = vst [vmem:[#allocation40_spill] sm:$0xff] %v5011_v24  ;;  %6146 = vst [vmem:[#allocation41_spill] sm:$0xff] %v5014_v13  ;;  %1618 = vrot.lane.b32.xlu0 %v4709_v59, %s4326_s29 }
 0x39f   : > { %1849 = vst.msk [vmem:[#allocation3 + $0x78] sm:$0xff] %vm475_vm1, %v5011_v24  ;;  %1848 = vst.msk [vmem:[#allocation3 + $0x70] sm:$0xff] %vm475_vm1, %v5014_v13  ;;  %v1631_v12 = vpop.permute.xlu1 %1630  ;;  %v1629_v46 = vpop.permute.xlu0 %1628 }
 0x3a0   : > { %1499 = vperm.xlu1 %4105, %v4971_v20   ;;  %3929 = vmatprep.subr.mxu0 %v1631_v12 }
 0x3a1   : > { %3930 = vmatpush3.msra.mxu0 %v1631_v12 }
 0x3a2   : > { %1616 = vrot.lane.b32.xlu0 %v4722_v2, %s4326_s29  ;;  %3931 = vmatprep.subr.mxu0 %v1629_v46 }
 0x3a3   : > { %3932 = vmatpush3.msra.mxu0 %v1629_v46 }
 0x3a4   : > { %1514 = vperm.xlu1 %4105, %v4990_v62  }
 0x3a6   : > { %1880 = vrot.lane.b32.xlu0 %v4438_v9, %s4327_s30 }
 0x3a8   : > { %1509 = vperm.xlu1 %4105, %v4993_v27  }
 0x3aa   : > { %1519 = vperm.xlu0 %4104, %v5014_v13  }
 0x3ac   : > { %1878 = vrot.lane.b32.xlu1 %v4440_v10, %s4327_s30 }
 0x3ae   : > { %1524 = vperm.xlu0 %4104, %v5011_v24  }
 0x3b0   : > { %1876 = vrot.lane.b32.xlu1 %v4452_v15, %s4327_s30 }
 0x3b2   : > { %1874 = vrot.lane.b32.xlu0 %v4463_v19, %s4327_s30 }
 0x3b4   : > { %1872 = vrot.lane.b32.xlu1 %v4470_v22, %s4327_s30 }
 0x3b6   : > { %1870 = vrot.lane.b32.xlu0 %v4477_v25, %s4327_s30 }
 0x3b8   : > { %1868 = vrot.lane.b32.xlu1 %v4484_v28, %s4327_s30 }
 0x3ba   : > { %1866 = vrot.lane.b32.xlu0 %v4491_v31, %s4327_s30 }
 0x3bc   : > { %1850 = vrot.lane.b32.xlu1 %v4454_v17, %s4327_s30 }
 0x3be   : > { %1852 = vrot.lane.b32.xlu0 %v4500_v37, %s4327_s30 }
 0x3c0   : > { %1854 = vrot.lane.b32.xlu1 %v4504_v39, %s4327_s30 }
 0x3c2   : > { %1856 = vrot.lane.b32.xlu0 %v4510_v43, %s4327_s30 }
 0x3c4   : > { %1858 = vrot.lane.b32.xlu1 %v4514_v45, %s4327_s30 }
 0x3c6   : > { %1860 = vrot.lane.b32.xlu0 %v4519_v48, %s4327_s30 }
 0x3c8   : > { %1862 = vrot.lane.b32.xlu1 %v4523_v50, %s4327_s30 }
 0x3ca   : > { %1864 = vrot.lane.b32.xlu0 %v4527_v51, %s4327_s30 }
 0x40b   : > { %v1495_v46 = vpop.permute.xlu1 %1494 }
 0x40c   : > { %v1528_v56 = vsub.f32 %v4905_v55, %v1495_v46 }
 0x40d   : > { %v1490_v12 = vpop.permute.xlu0 %1489 }
 0x40e   : > { %v1527_v35 = vsub.f32 %v4907_v54, %v1490_v12  ;;  %v1537_v5 = vmul.f32 1.442695, %v1528_v56 }
 0x40f   : > { %v1627_v24 = vpop.permute.xlu1 %1626 }
 0x410   : > { %v1535_v21 = vmul.f32 1.442695, %v1527_v35  ;;  %3933 = vmatprep.subr.mxu0 %v1627_v24 }
 0x411   : > { %3934 = vmatpush3.msra.mxu0 %v1627_v24  ;;  %v1625_v62 = vpop.permute.xlu0 %1624 }
 0x412   : > { %4122 = vpow2.f32 %v1535_v21  ;;  %3935 = vmatprep.subr.mxu0 %v1625_v62 }
 0x413   : > { %4124 = vpow2.f32 %v1537_v5  ;;  %v1623_v32 = vpop.permute.xlu1 %1622  ;;  %3936 = vmatpush3.msra.mxu0 %v1625_v62 }
 0x414   : > { %3937 = vmatprep.subr.mxu0 %v1623_v32 }
 0x415   : > { %3938 = vmatpush3.msra.mxu0 %v1623_v32  ;;  %v1621_v13 = vpop.permute.xlu0 %1620 }
 0x416   : > { %3939 = vmatprep.subr.mxu0 %v1621_v13 }
 0x417   : > { %v1505_v40 = vpop.permute.xlu1 %1504  ;;  %3940 = vmatpush3.msra.mxu0 %v1621_v13 }
 0x418   : > { %v1530_v55 = vsub.f32 %v4913_v16, %v1505_v40 }
 0x419   : > { %v1619_v54 = vpop.permute.xlu0 %1618 }
 0x41a   : > { %3941 = vmatprep.subr.mxu0 %v1619_v54  ;;  %v1541_v35 = vmul.f32 1.442695, %v1530_v55 }
 0x41b   : > { %v1500_v46 = vpop.permute.xlu1 %1499  ;;  %3942 = vmatpush3.msra.mxu0 %v1619_v54 }
 0x41c   : > { %v1529_v24 = vsub.f32 %v4915_v18, %v1500_v46 }
 0x41d   : > { %v1617_v21 = vpop.permute.xlu0 %1616 }
 0x41e   : > { %v1539_v56 = vmul.f32 1.442695, %v1529_v24  ;;  %3943 = vmatprep.subr.mxu0 %v1617_v21 }
 0x41f   : > { %v5053_v5 = vpop.eup %4122  ;;  %v1515_v62 = vpop.permute.xlu1 %1514  ;;  %3944 = vmatpush3.msra.mxu0 %v1617_v21 }
 0x420   : > { %v5055_v32 = vpop.eup %4124  ;;  %4126 = vpow2.f32 %v1539_v56  ;;  %3945 = vmatprep.mubr.msk.f32.mxu0 %vm857_vm2, %v5053_v5  ;;  %v1532_v13 = vsub.f32 %v4921_v11, %v1515_v62 }
 0x421   : > { %4128 = vpow2.f32 %v1541_v35  ;;  %3946 = vmatmul.mubr.msk.f32.vlgmr.msra.gmra.mxu0 %vm857_vm2, %v5055_v32  ;;  %v1881_v16 = vpop.permute.xlu0 %1880 }
 0x422   : > { %3957 = vmatprep.subr.msk.mxu0 %vm687_vm0, %v1881_v16  ;;  %v1545_v12 = vmul.f32 1.442695, %v1532_v13 }
 0x423   : > { %v1510_v18 = vpop.permute.xlu1 %1509  ;;  %3958 = vmatpush3.xpose.msk.msra.mxu0 %vm687_vm0, %v1881_v16 }
 0x424   : > { %v1531_v40 = vsub.f32 %v4923_v1, %v1510_v18 }
 0x425   : > { %v1520_v55 = vpop.permute.xlu0 %1519 }
 0x426   : > { %v1543_v54 = vmul.f32 1.442695, %v1531_v40  ;;  %v1533_v46 = vsub.f32 %v4931_v57, %v1520_v55 }
 0x427   : > { %v1879_v24 = vpop.permute.xlu1 %1878 }
 0x428   : > { %4130 = vpow2.f32 %v1543_v54  ;;  %v1547_v35 = vmul.f32 1.442695, %v1533_v46  ;;  %3959 = vmatprep.subr.msk.mxu0 %vm687_vm0, %v1879_v24 }
 0x429   : > { %4132 = vpow2.f32 %v1545_v12  ;;  %3960 = vmatpush3.xpose.msk.msra.mxu0 %vm687_vm0, %v1879_v24  ;;  %v1525_v11 = vpop.permute.xlu0 %1524 }
 0x42a   : > { %4134 = vpow2.f32 %v1547_v35  ;;  %v1534_v21 = vsub.f32 %v4929_v61, %v1525_v11 }
 0x42b   : > { %v1877_v56 = vpop.permute.xlu1 %1876 }
 0x42c   : > { %v1549_v62 = vmul.f32 1.442695, %v1534_v21  ;;  %3961 = vmatprep.subr.msk.mxu0 %vm687_vm0, %v1877_v56 }
 0x42d   : > { %v5070_v1 = vpop.eup %4126  ;;  %3962 = vmatpush3.xpose.msk.msra.mxu0 %vm687_vm0, %v1877_v56  ;;  %v1875_v57 = vpop.permute.xlu0 %1874 }
 0x42e   : > { %v5073_v13 = vpop.eup %4128  ;;  %4136 = vpow2.f32 %v1549_v62  ;;  %3948 = vmatprep.mubr.msk.f32.mxu0 %vm857_vm2, %v5070_v1  ;;  %3963 = vmatprep.subr.msk.mxu0 %vm687_vm0, %v1875_v57 }
 0x42f   : > { %3949 = vmatmul.mubr.msk.f32.gmra.mxu0 %vm857_vm2, %v5073_v13  ;;  %v1873_v61 = vpop.permute.xlu1 %1872 }
 0x431   : > { %3964 = vmatpush3.xpose.msk.msra.mxu0 %vm687_vm0, %v1875_v57  ;;  %v1871_v16 = vpop.permute.xlu0 %1870 }
 0x432   : > { %3965 = vmatprep.subr.msk.mxu0 %vm687_vm0, %v1873_v61 }
 0x433   : > { %v1869_v12 = vpop.permute.xlu1 %1868 }
 0x435   : > { %v5082_v18 = vpop.eup %4130  ;;  %3966 = vmatpush3.xpose.msk.msra.mxu0 %vm687_vm0, %v1873_v61  ;;  %v1867_v24 = vpop.permute.xlu0 %1866 }
 0x436   : > { %v5085_v40 = vpop.eup %4132  ;;  %3951 = vmatprep.mubr.msk.f32.mxu0 %vm857_vm2, %v5082_v18  ;;  %3967 = vmatprep.subr.msk.mxu0 %vm687_vm0, %v1871_v16 }
 0x437   : > { %v5090_v55 = vpop.eup %4134  ;;  %3952 = vmatmul.mubr.msk.f32.gmra.mxu0 %vm857_vm2, %v5085_v40  ;;  %v1851_v54 = vpop.permute.xlu1 %1850 }
 0x438   : > { %3954 = vmatprep.mubr.msk.f32.mxu0 %vm857_vm2, %v5090_v55 }
 0x439   : > { %3968 = vmatpush3.xpose.msk.msra.mxu0 %vm687_vm0, %v1871_v16  ;;  %v1853_v35 = vpop.permute.xlu0 %1852 }
 0x43a   : > { %3969 = vmatprep.subr.msk.mxu0 %vm687_vm0, %v1869_v12 }
 0x43b   : > { %v5098_v46 = vpop.eup %4136  ;;  %v1855_v11 = vpop.permute.xlu1 %1854 }
 0x43c   : > { %6147 = vst [vmem:[#allocation42_spill] sm:$0xff] %v5098_v46  ;;  %3955 = vmatmul.mubr.msk.f32.gmra.mxu0 %vm857_vm2, %v5098_v46  ;;  %v5199_v46 = vld [vmem:[#allocation3 + $0xa0] sm:$0xff] }
 0x43d   : > { %3970 = vmatpush3.xpose.msk.msra.mxu0 %vm687_vm0, %v1869_v12  ;;  %3973 = vmatprep.mubr.msk.f32.mxu0 %vm687_vm0, %v1851_v54  ;;  %v1857_v21 = vpop.permute.xlu0 %1856 }
 0x43e   : > { %3971 = vmatprep.subr.msk.mxu0 %vm687_vm0, %v1867_v24 }
 0x43f   : > { %v1859_v56 = vpop.permute.xlu1 %1858 }
 0x441   : > { %3972 = vmatpush3.xpose.msk.msra.mxu0 %vm687_vm0, %v1867_v24  ;;  %v1861_v62 = vpop.permute.xlu0 %1860 }
 0x443   : > { %v1863_v57 = vpop.permute.xlu1 %1862 }
 0x444   : > { %3974 = vmatmul.mubr.msk.f32.vlgmr.msra.gmra.mxu0 %vm687_vm0, %v1853_v35 }
 0x445   : > { %3976 = vmatprep.mubr.msk.f32.mxu0 %vm687_vm0, %v1855_v11  ;;  %v1865_v61 = vpop.permute.xlu0 %1864 }
 0x448   : > { %3977 = vmatmul.mubr.msk.f32.gmra.mxu0 %vm687_vm0, %v1857_v21 }
 0x449   : > { %3979 = vmatprep.mubr.msk.f32.mxu0 %vm687_vm0, %v1859_v56 }
 0x44c   : > { %3980 = vmatmul.mubr.msk.f32.gmra.mxu0 %vm687_vm0, %v1861_v62 }
 0x44d   : > { %3982 = vmatprep.mubr.msk.f32.mxu0 %vm687_vm0, %v1863_v57 }
 0x450   : > { %3983 = vmatmul.mubr.msk.f32.gmra.mxu0 %vm687_vm0, %v1865_v61 }
 0x4e1   : > { %v5113_v16 = vpop.f32.mrf.mxu0 }
 0x4e2   : > { %6148 = vst [vmem:[#allocation43_spill] sm:$0xff] %v5113_v16 }
 0x4e3   : > { %v5115_v12 = vpop.f32.mrf.mxu0 }
 0x4e4   : > { %6149 = vst [vmem:[#allocation44_spill] sm:$0xff] %v5115_v12 }
 0x4ef   : > { %v5117_v54 = vpop.f32.mrf.mxu0 }
 0x4f0   : > { %6150 = vst [vmem:[#allocation45_spill] sm:$0xff] %v5117_v54 }
 0x4f1   : > { %v5119_v24 = vpop.f32.mrf.mxu0 }
 0x4f2   : > { %6151 = vst [vmem:[#allocation46_spill] sm:$0xff] %v5119_v24 }
 0x4f7   : > { %v5121_v35 = vpop.f32.mrf.mxu0 }
 0x4f8   : > { %6152 = vst [vmem:[#allocation47_spill] sm:$0xff] %v5121_v35 }
 0x4f9   : > { %v5123_v11 = vpop.f32.mrf.mxu0 }
 0x4fa   : > { %6153 = vst [vmem:[#allocation48_spill] sm:$0xff] %v5123_v11 }
 0x4fc   : > { %v5125_v21 = vpop.f32.mrf.mxu0 }
 0x4fd   : > { %6154 = vst [vmem:[#allocation49_spill] sm:$0xff] %v5125_v21 }
 0x4fe   : > { %v5127_v56 = vpop.f32.mrf.mxu0 }
 0x4ff   : > { %6155 = vst [vmem:[#allocation50_spill] sm:$0xff] %v5127_v56 }
 0x504   : > { %v3975_v62 = vpop.f32.mrf.mxu0 }
 0x505   : > { %v5129_v57 = vmul.f32 0.35355338, %v3975_v62 }
 0x506   : > { %v1980_v61 = vpop.f32.mrf.mxu0 }
 0x507   : > { %v5131_v27 = vmul.f32 0.35355338, %v1980_v61  ;;  %v2039_v12 = vsel %vm857_vm2, %v5129_v57, -inf }
 0x508   : > { %2040 = vmax.xlane.f32.xlu0 %v2039_v12  ;;  %v3978_v54 = vpop.f32.mrf.mxu0 }
 0x509   : > { %v2036_v35 = vsel %vm857_vm2, %v5131_v27, -inf  ;;  %v5137_v24 = vmul.f32 0.35355338, %v3978_v54 }
 0x50a   : > { %2037 = vmax.xlane.f32.xlu1 %v2036_v35  ;;  %v1990_v21 = vpop.f32.mrf.mxu0 }
 0x50b   : > { %v5139_v11 = vmul.f32 0.35355338, %v1990_v21  ;;  %v2045_v62 = vsel %vm857_vm2, %v5137_v24, -inf }
 0x50c   : > { %v3981_v56 = vpop.f32.mrf.mxu0 }
 0x50d   : > { %v2042_v61 = vsel %vm857_vm2, %v5139_v11, -inf  ;;  %v5145_v16 = vmul.f32 0.35355338, %v3981_v56 }
 0x50e   : > { %2046 = vmax.xlane.f32.xlu1 %v2045_v62  ;;  %2043 = vmax.xlane.f32.xlu0 %v2042_v61  ;;  %v2000_v12 = vpop.f32.mrf.mxu0  ;;  %v5165_v61 = vld [vmem:[#allocation3 + $0x88] sm:$0xff] }
 0x50f   : > { %v5147_v41 = vmul.f32 0.35355338, %v2000_v12  ;;  %v2051_v54 = vsel %vm857_vm2, %v5145_v16, -inf  ;;  %6156 = vst [vmem:[#allocation51_spill] sm:$0xff] %v5165_v61 }
 0x510   : > { %v3984_v35 = vpop.f32.mrf.mxu0 }
 0x511   : > { %v2048_v21 = vsel %vm857_vm2, %v5147_v41, -inf  ;;  %v5153_v20 = vmul.f32 0.35355338, %v3984_v35 }
 0x512   : > { %2052 = vmax.xlane.f32.xlu1 %v2051_v54  ;;  %2049 = vmax.xlane.f32.xlu0 %v2048_v21  ;;  %v2010_v58 = vpop.f32.mrf.mxu0  ;;  %v5167_v54 = vld [vmem:[#allocation3 + $0x80] sm:$0xff] }
 0x513   : > { %v5155_v47 = vmul.f32 0.35355338, %v2010_v58  ;;  %v2057_v56 = vsel %vm857_vm2, %v5153_v20, -inf  ;;  %6157 = vst [vmem:[#allocation52_spill] sm:$0xff] %v5167_v54 }
 0x515   : > { %v2054_v62 = vsel %vm857_vm2, %v5155_v47, -inf }
 0x516   : > { %2058 = vmax.xlane.f32.xlu1 %v2057_v56  ;;  %2055 = vmax.xlane.f32.xlu0 %v2054_v62  ;;  %v5180_v62 = vld [vmem:[#allocation3 + $0x98] sm:$0xff] }
 0x517   : > { %6160 = vst [vmem:[#allocation55_spill] sm:$0xff] %v5180_v62 }
 0x527   : > { %2227 = vrot.lane.b32.xlu1 %v4677_v33, %s4325_s28  ;;  %v5197_v33 = vld [vmem:[#allocation3 + $0xa8] sm:$0xff] }
 0x528   : > { %6162 = vst [vmem:[#allocation57_spill] sm:$0xff] %v5197_v33 }
 0x52c   : > { %2225 = vrot.lane.b32.xlu0 %v4679_v34, %s4325_s28  ;;  %v5182_v34 = vld [vmem:[#allocation3 + $0x90] sm:$0xff] }
 0x52d   : > { %6161 = vst [vmem:[#allocation56_spill] sm:$0xff] %v5182_v34 }
 0x591   : > { %v2041_v12 = vpop.xlane.xlu0 %2040 }
 0x592   : > { %v5170_v58 = vmax.f32 %v5165_v61, %v2041_v12  ;;  %v5219_v12 = vld [vmem:[#allocation3 + $0xb8] sm:$0xff] }
 0x593   : > { %v2038_v35 = vpop.xlane.xlu1 %2037 }
 0x594   : > { %6158 = vst [vmem:[#allocation53_spill] sm:$0xff] %v5170_v58  ;;  %2440 = vst.msk [vmem:[#allocation3 + $0x88] sm:$0xff] %vm475_vm1, %v5170_v58  ;;  %v5177_v56 = vmax.f32 %v5167_v54, %v2038_v35  ;;  %2099 = vperm.xlu1 %4105, %v5170_v58  }
 0x596   : > { %6159 = vst [vmem:[#allocation54_spill] sm:$0xff] %v5177_v56  ;;  %2439 = vst.msk [vmem:[#allocation3 + $0x80] sm:$0xff] %vm475_vm1, %v5177_v56  ;;  %2094 = vperm.xlu0 %4104, %v5177_v56  }
 0x597   : > { %v2047_v21 = vpop.xlane.xlu1 %2046  ;;  %v2044_v61 = vpop.xlane.xlu0 %2043 }
 0x598   : > { %2223 = vrot.lane.b32.xlu1 %v4682_v36, %s4325_s28  ;;  %v5192_v35 = vmax.f32 %v5180_v62, %v2047_v21  ;;  %v5195_v58 = vmax.f32 %v5182_v34, %v2044_v61  ;;  %v5221_v62 = vld [vmem:[#allocation3 + $0xb0] sm:$0xff] }
 0x59a   : > { %2221 = vrot.lane.b32.xlu0 %v4686_v38, %s4325_s28  ;;  %2442 = vst.msk [vmem:[#allocation3 + $0x98] sm:$0xff] %vm475_vm1, %v5192_v35  ;;  %2441 = vst.msk [vmem:[#allocation3 + $0x90] sm:$0xff] %vm475_vm1, %v5195_v58 }
 0x59b   : > { %v2053_v61 = vpop.xlane.xlu1 %2052  ;;  %v2050_v56 = vpop.xlane.xlu0 %2049 }
 0x59c   : > { %2219 = vrot.lane.b32.xlu1 %v4695_v44, %s4325_s28  ;;  %v5214_v54 = vmax.f32 %v5197_v33, %v2053_v61  ;;  %v5217_v38 = vmax.f32 %v5199_v46, %v2050_v56 }
 0x59e   : > { %2217 = vrot.lane.b32.xlu0 %v4701_v52, %s4325_s28  ;;  %2444 = vst.msk [vmem:[#allocation3 + $0xa8] sm:$0xff] %vm475_vm1, %v5214_v54  ;;  %2443 = vst.msk [vmem:[#allocation3 + $0xa0] sm:$0xff] %vm475_vm1, %v5217_v38 }
 0x59f   : > { %v2059_v56 = vpop.xlane.xlu1 %2058  ;;  %v2056_v34 = vpop.xlane.xlu0 %2055 }
 0x5a0   : > { %2109 = vperm.xlu1 %4105, %v5192_v35   ;;  %v5235_v44 = vmax.f32 %v5219_v12, %v2059_v56  ;;  %v5238_v52 = vmax.f32 %v5221_v62, %v2056_v34  ;;  %v1580_v34 = vsel %vm857_vm2, %v5082_v18, 0.0 }
 0x5a2   : > { %2215 = vrot.lane.b32.xlu0 %v4709_v59, %s4325_s28  ;;  %2446 = vst.msk [vmem:[#allocation3 + $0xb8] sm:$0xff] %vm475_vm1, %v5235_v44  ;;  %2445 = vst.msk [vmem:[#allocation3 + $0xb0] sm:$0xff] %vm475_vm1, %v5238_v52 }
 0x5a3   : > { %v2228_v56 = vpop.permute.xlu1 %2227  ;;  %v2226_v33 = vpop.permute.xlu0 %2225 }
 0x5a4   : > { %2104 = vperm.xlu1 %4105, %v5195_v58   ;;  %3985 = vmatprep.subr.mxu1 %v2228_v56 }
 0x5a5   : > { %3986 = vmatpush3.msra.mxu1 %v2228_v56 }
 0x5a6   : > { %2213 = vrot.lane.b32.xlu0 %v4722_v2, %s4325_s28  ;;  %3987 = vmatprep.subr.mxu1 %v2226_v33 }
 0x5a7   : > { %3988 = vmatpush3.msra.mxu1 %v2226_v33  ;;  %v6166_v33 = vmov 0.0  }
 0x5a8   : > { %2119 = vperm.xlu1 %4105, %v5214_v54   ;;  %542 = vst.msk [vmem:[#allocation2 + $0x8] sm:$0xff] %vm540_vm3, %v6166_v33  ;;  %541 = vst.msk [vmem:[#allocation2] sm:$0xff] %vm540_vm3, %v6166_v33 }
 0x5a9   : > { %543 = vst.msk [vmem:[#allocation2 + $0x10] sm:$0xff] %vm540_vm3, %v6166_v33  ;;  %544 = vst.msk [vmem:[#allocation2 + $0x18] sm:$0xff] %vm540_vm3, %v6166_v33 }
 0x5aa   : > { %2477 = vrot.lane.b32.xlu0 %v4438_v9, %s4328_s12  ;;  %v997_v9 = vsel %vm857_vm2, %v4834_v6, 0.0  ;;  %545 = vst.msk [vmem:[#allocation2 + $0x20] sm:$0xff] %vm540_vm3, %v6166_v33  ;;  %546 = vst.msk [vmem:[#allocation2 + $0x28] sm:$0xff] %vm540_vm3, %v6166_v33 }
 0x5ab   : > { %547 = vst.msk [vmem:[#allocation2 + $0x30] sm:$0xff] %vm540_vm3, %v6166_v33  ;;  %548 = vst.msk [vmem:[#allocation2 + $0x38] sm:$0xff] %vm540_vm3, %v6166_v33 }
 0x5ac   : > { %2114 = vperm.xlu1 %4105, %v5217_v38   ;;  %549 = vst.msk [vmem:[#allocation2 + $0x40] sm:$0xff] %vm540_vm3, %v6166_v33  ;;  %550 = vst.msk [vmem:[#allocation2 + $0x48] sm:$0xff] %vm540_vm3, %v6166_v33 }
 0x5ad   : > { %551 = vst.msk [vmem:[#allocation2 + $0x50] sm:$0xff] %vm540_vm3, %v6166_v33  ;;  %552 = vst.msk [vmem:[#allocation2 + $0x58] sm:$0xff] %vm540_vm3, %v6166_v33 }
 0x5ae   : > { %2124 = vperm.xlu0 %4104, %v5238_v52   ;;  %553 = vst.msk [vmem:[#allocation2 + $0x60] sm:$0xff] %vm540_vm3, %v6166_v33  ;;  %554 = vst.msk [vmem:[#allocation2 + $0x68] sm:$0xff] %vm540_vm3, %v6166_v33 }
 0x5af   : > { %555 = vst.msk [vmem:[#allocation2 + $0x70] sm:$0xff] %vm540_vm3, %v6166_v33  ;;  %556 = vst.msk [vmem:[#allocation2 + $0x78] sm:$0xff] %vm540_vm3, %v6166_v33 }
 0x5b0   : > { %2475 = vrot.lane.b32.xlu1 %v4440_v10, %s4328_s12  ;;  %v994_v10 = vsel %vm857_vm2, %v4828_v30, 0.0  ;;  %557 = vst.msk [vmem:[#allocation2 + $0x80] sm:$0xff] %vm540_vm3, %v6166_v33  ;;  %558 = vst.msk [vmem:[#allocation2 + $0x88] sm:$0xff] %vm540_vm3, %v6166_v33 }
 0x5b1   : > { %559 = vst.msk [vmem:[#allocation2 + $0x90] sm:$0xff] %vm540_vm3, %v6166_v33  ;;  %560 = vst.msk [vmem:[#allocation2 + $0x98] sm:$0xff] %vm540_vm3, %v6166_v33 }
 0x5b2   : > { %2129 = vperm.xlu0 %4104, %v5235_v44   ;;  %561 = vst.msk [vmem:[#allocation2 + $0xa0] sm:$0xff] %vm540_vm3, %v6166_v33  ;;  %562 = vst.msk [vmem:[#allocation2 + $0xa8] sm:$0xff] %vm540_vm3, %v6166_v33 }
 0x5b3   : > { %563 = vst.msk [vmem:[#allocation2 + $0xb0] sm:$0xff] %vm540_vm3, %v6166_v33  ;;  %564 = vst.msk [vmem:[#allocation2 + $0xb8] sm:$0xff] %vm540_vm3, %v6166_v33 }
 0x5b4   : > { %2473 = vrot.lane.b32.xlu1 %v4452_v15, %s4328_s12  ;;  %v1000_v15 = vsel %vm857_vm2, %v4846_v3, 0.0  ;;  %565 = vst.msk [vmem:[#allocation2 + $0xc0] sm:$0xff] %vm540_vm3, %v6166_v33  ;;  %566 = vst.msk [vmem:[#allocation2 + $0xc8] sm:$0xff] %vm540_vm3, %v6166_v33 }
 0x5b5   : > { %567 = vst.msk [vmem:[#allocation2 + $0xd0] sm:$0xff] %vm540_vm3, %v6166_v33  ;;  %568 = vst.msk [vmem:[#allocation2 + $0xd8] sm:$0xff] %vm540_vm3, %v6166_v33 }
 0x5b6   : > { %2471 = vrot.lane.b32.xlu0 %v4463_v19, %s4328_s12  ;;  %v1006_v19 = vsel %vm857_vm2, %v4858_v53, 0.0  ;;  %569 = vst.msk [vmem:[#allocation2 + $0xe0] sm:$0xff] %vm540_vm3, %v6166_v33  ;;  %570 = vst.msk [vmem:[#allocation2 + $0xe8] sm:$0xff] %vm540_vm3, %v6166_v33 }
 0x5b7   : > { %571 = vst.msk [vmem:[#allocation2 + $0xf0] sm:$0xff] %vm540_vm3, %v6166_v33  ;;  %572 = vst.msk [vmem:[#allocation2 + $0xf8] sm:$0xff] %vm540_vm3, %v6166_v33 }
 0x5b8   : > { %2469 = vrot.lane.b32.xlu1 %v4470_v22, %s4328_s12  ;;  %v1009_v22 = vsel %vm857_vm2, %v4861_v23, 0.0 }
 0x5ba   : > { %2467 = vrot.lane.b32.xlu0 %v4477_v25, %s4328_s12  ;;  %v1012_v25 = vsel %vm857_vm2, %v4868_v60, 0.0 }
 0x5bc   : > { %2465 = vrot.lane.b32.xlu1 %v4484_v28, %s4328_s12  ;;  %v6163_v28 = vsub.f32 %v4711_v63, %v4726_v7  ;;  %v6167_v63 = vsub.f32 %v4754_v29, %v4770_v42  ;;  %v1586_v7 = vsel %vm857_vm2, %v5090_v55, 0.0 }
 0x5be   : > { %2463 = vrot.lane.b32.xlu0 %v4491_v31, %s4328_s12  ;;  %v900_v31 = vmul.f32 1.442695, %v6163_v28 }
 0x5c0   : > { %2447 = vrot.lane.b32.xlu1 %v4454_v17, %s4328_s12  ;;  %v1003_v17 = vsel %vm857_vm2, %v4849_v4, 0.0  ;;  %4138 = vpow2.f32 %v900_v31 }
 0x5c2   : > { %2449 = vrot.lane.b32.xlu0 %v4500_v37, %s4328_s12  ;;  %v1015_v37 = vsel %vm857_vm2, %v4871_v49, 0.0 }
 0x5c4   : > { %2451 = vrot.lane.b32.xlu1 %v4504_v39, %s4328_s12  ;;  %v1571_v39 = vsel %vm857_vm2, %v5055_v32, 0.0 }
 0x5c6   : > { %2453 = vrot.lane.b32.xlu0 %v4510_v43, %s4328_s12  ;;  %v6164_v43 = vsub.f32 %v4713_v0, %v4729_v8  ;;  %v910_v0 = vmul.f32 1.442695, %v6167_v63 }
 0x5c8   : > { %2455 = vrot.lane.b32.xlu1 %v4514_v45, %s4328_s12  ;;  %v902_v45 = vmul.f32 1.442695, %v6164_v43 }
 0x5ca   : > { %2457 = vrot.lane.b32.xlu0 %v4519_v48, %s4328_s12  ;;  %v1574_v48 = vsel %vm857_vm2, %v5070_v1, 0.0  ;;  %4140 = vpow2.f32 %v902_v45 }
 0x5cc   : > { %2459 = vrot.lane.b32.xlu1 %v4523_v50, %s4328_s12  ;;  %v6165_v50 = vsub.f32 %v4734_v14, %v4750_v26 }
 0x5cd   : > { %v5373_v8 = vpop.eup %4138 }
 0x5ce   : > { %2461 = vrot.lane.b32.xlu0 %v4527_v51, %s4328_s12  ;;  %v906_v51 = vmul.f32 1.442695, %v6165_v50 }
 0x5d0   : > { %4142 = vpow2.f32 %v906_v51 }
 0x5d1   : > { %4144 = vpow2.f32 %v910_v0 }
 0x5d7   : > { %v5376_v26 = vpop.eup %4140 }
 0x5dd   : > { %v5381_v4 = vpop.eup %4142 }
 0x5de   : > { %v5384_v49 = vpop.eup %4144 }
 0x5ed   : > { %998 = vadd.xlane.f32.xlu0 %v997_v9 }
 0x5f0   : > { %995 = vadd.xlane.f32.xlu1 %v994_v10 }
 0x5f1   : > { %1001 = vadd.xlane.f32.xlu0 %v1000_v15 }
 0x5f4   : > { %1004 = vadd.xlane.f32.xlu1 %v1003_v17 }
 0x5f5   : > { %1007 = vadd.xlane.f32.xlu0 %v1006_v19 }
 0x5f8   : > { %1010 = vadd.xlane.f32.xlu1 %v1009_v22 }
 0x5f9   : > { %1013 = vadd.xlane.f32.xlu0 %v1012_v25 }
 0x5fc   : > { %1016 = vadd.xlane.f32.xlu1 %v1015_v37 }
 0x5fd   : > { %1572 = vadd.xlane.f32.xlu0 %v1571_v39 }
 0x601   : > { %1575 = vadd.xlane.f32.xlu0 %v1574_v48 }
 0x605   : > { %1581 = vadd.xlane.f32.xlu0 %v1580_v34 }
 0x609   : > { %1587 = vadd.xlane.f32.xlu0 %v1586_v7 }
 0x60d   : > { %1179 = vperm.xlu1 %4105, %v5373_v8  }
 0x60f   : > { %v2100_v14 = vpop.permute.xlu1 %2099 }
 0x610   : > { %v2133_v30 = vsub.f32 %v5129_v57, %v2100_v14 }
 0x611   : > { %1184 = vperm.xlu1 %4105, %v5376_v26   ;;  %v2095_v6 = vpop.permute.xlu0 %2094 }
 0x612   : > { %v2132_v29 = vsub.f32 %v5131_v27, %v2095_v6  ;;  %v2142_v42 = vmul.f32 1.442695, %v2133_v30  ;;  %v1568_v6 = vsel %vm857_vm2, %v5053_v5, 0.0  ;;  %v1583_v5 = vsel %vm857_vm2, %v5085_v40, 0.0 }
 0x613   : > { %v2224_v3 = vpop.permute.xlu1 %2223 }
 0x614   : > { %v2140_v53 = vmul.f32 1.442695, %v2132_v29  ;;  %3989 = vmatprep.subr.mxu1 %v2224_v3 }
 0x615   : > { %1194 = vperm.xlu1 %4105, %v5381_v4   ;;  %3990 = vmatpush3.msra.mxu1 %v2224_v3  ;;  %v2222_v23 = vpop.permute.xlu0 %2221  ;;  %v1577_v3 = vsel %vm857_vm2, %v5073_v13, 0.0 }
 0x616   : > { %4146 = vpow2.f32 %v2140_v53  ;;  %3991 = vmatprep.subr.mxu1 %v2222_v23 }
 0x617   : > { %4148 = vpow2.f32 %v2142_v42  ;;  %v2220_v60 = vpop.permute.xlu1 %2219  ;;  %3992 = vmatpush3.msra.mxu1 %v2222_v23 }
 0x618   : > { %3993 = vmatprep.subr.mxu1 %v2220_v60 }
 0x619   : > { %1204 = vperm.xlu1 %4105, %v5384_v49   ;;  %3994 = vmatpush3.msra.mxu1 %v2220_v60  ;;  %v2218_v27 = vpop.permute.xlu0 %2217 }
 0x61a   : > { %3995 = vmatprep.subr.mxu1 %v2218_v27 }
 0x61b   : > { %v2110_v32 = vpop.permute.xlu1 %2109  ;;  %3996 = vmatpush3.msra.mxu1 %v2218_v27  ;;  %v6168_v27 = vld [vmem:[#allocation42_spill] sm:$0xff] }
 0x61c   : > { %v2135_v1 = vsub.f32 %v5137_v24, %v2110_v32  ;;  %v1589_v13 = vsel %vm857_vm2, %v6168_v27, 0.0 }
 0x61d   : > { %v2216_v18 = vpop.permute.xlu0 %2215 }
 0x61e   : > { %3997 = vmatprep.subr.mxu1 %v2216_v18  ;;  %v2146_v56 = vmul.f32 1.442695, %v2135_v1 }
 0x61f   : > { %v2105_v55 = vpop.permute.xlu1 %2104  ;;  %3998 = vmatpush3.msra.mxu1 %v2216_v18 }
 0x620   : > { %v2134_v57 = vsub.f32 %v5139_v11, %v2105_v55  ;;  %v6169_v55 = vld [vmem:[#allocation9_spill] sm:$0xff] }
 0x621   : > { %v2214_v9 = vpop.permute.xlu0 %2213 }
 0x622   : > { %v2144_v10 = vmul.f32 1.442695, %v2134_v57  ;;  %3999 = vmatprep.subr.mxu1 %v2214_v9  ;;  %v6170_v57 = vld [vmem:[#allocation11_spill] sm:$0xff] }
 0x623   : > { %v5389_v15 = vpop.eup %4146  ;;  %v2120_v17 = vpop.permute.xlu1 %2119  ;;  %4000 = vmatpush3.msra.mxu1 %v2214_v9 }
 0x624   : > { %v5391_v19 = vpop.eup %4148  ;;  %4150 = vpow2.f32 %v2144_v10  ;;  %4001 = vmatprep.mubr.msk.f32.mxu1 %vm857_vm2, %v5389_v15  ;;  %v2137_v24 = vsub.f32 %v5145_v16, %v2120_v17  ;;  %v6172_v10 = vld [vmem:[#allocation12_spill] sm:$0xff]  ;;  %v6173_v17 = vld [vmem:[#allocation13_spill] sm:$0xff] }
 0x625   : > { %4152 = vpow2.f32 %v2146_v56  ;;  %4002 = vmatmul.mubr.msk.f32.vlgmr.msra.gmra.mxu1 %vm857_vm2, %v5391_v19  ;;  %v2478_v11 = vpop.permute.xlu0 %2477  ;;  %v6171_v56 = vsub.f32 %v6169_v55, %v6170_v57  ;;  %v981_v57 = vld [vmem:[#allocation4 + $0x18] sm:$0xff] }
 0x626   : > { %4013 = vmatprep.subr.msk.mxu1 %vm687_vm0, %v2478_v11  ;;  %v2150_v28 = vmul.f32 1.442695, %v2137_v24  ;;  %v6174_v24 = vsub.f32 %v6172_v10, %v6173_v17 }
 0x627   : > { %v2115_v22 = vpop.permute.xlu1 %2114  ;;  %4014 = vmatpush3.xpose.msk.msra.mxu1 %vm687_vm0, %v2478_v11  ;;  %v898_v9 = vmul.f32 1.442695, %v6171_v56 }
 0x628   : > { %v2136_v25 = vsub.f32 %v5147_v41, %v2115_v22  ;;  %v904_v11 = vmul.f32 1.442695, %v6174_v24  ;;  %v6175_v22 = vld [vmem:[#allocation14_spill] sm:$0xff] }
 0x629   : > { %v2125_v31 = vpop.permute.xlu0 %2124 }
 0x62a   : > { %v2148_v37 = vmul.f32 1.442695, %v2136_v25  ;;  %v2138_v39 = vsub.f32 %v5155_v47, %v2125_v31  ;;  %v6176_v25 = vld [vmem:[#allocation15_spill] sm:$0xff] }
 0x62b   : > { %v2476_v43 = vpop.permute.xlu1 %2475 }
 0x62c   : > { %4154 = vpow2.f32 %v2148_v37  ;;  %v2152_v45 = vmul.f32 1.442695, %v2138_v39  ;;  %4015 = vmatprep.subr.msk.mxu1 %vm687_vm0, %v2476_v43  ;;  %v6178_v37 = vld [vmem:[#allocation16_spill] sm:$0xff]  ;;  %v6179_v39 = vld [vmem:[#allocation17_spill] sm:$0xff] }
 0x62d   : > { %4156 = vpow2.f32 %v2150_v28  ;;  %4016 = vmatpush3.xpose.msk.msra.mxu1 %vm687_vm0, %v2476_v43  ;;  %v2130_v16 = vpop.permute.xlu0 %2129  ;;  %v6177_v28 = vsub.f32 %v6175_v22, %v6176_v25  ;;  %v6180_v43 = vsub.f32 %v6178_v37, %v6179_v39  ;;  %v6191_v22 = vld [vmem:[#allocation41_spill] sm:$0xff]  ;;  %v983_v37 = vld [vmem:[#allocation4 + $0x28] sm:$0xff] }
 0x62e   : > { %4158 = vpow2.f32 %v2152_v45  ;;  %v2139_v48 = vsub.f32 %v5153_v20, %v2130_v16  ;;  %v6181_v16 = vld [vmem:[#allocation26_spill] sm:$0xff] }
 0x62f   : > { %v2474_v50 = vpop.permute.xlu1 %2473  ;;  %v908_v31 = vmul.f32 1.442695, %v6177_v28  ;;  %v912_v45 = vmul.f32 1.442695, %v6180_v43 }
 0x630   : > { %v2154_v51 = vmul.f32 1.442695, %v2139_v48  ;;  %4017 = vmatprep.subr.msk.mxu1 %vm687_vm0, %v2474_v50  ;;  %v6182_v48 = vld [vmem:[#allocation28_spill] sm:$0xff] }
 0x631   : > { %v5406_v41 = vpop.eup %4150  ;;  %4018 = vmatpush3.xpose.msk.msra.mxu1 %vm687_vm0, %v2474_v50  ;;  %v2472_v47 = vpop.permute.xlu0 %2471  ;;  %v6183_v50 = vsub.f32 %v6181_v16, %v6182_v48 }
 0x632   : > { %v5409_v33 = vpop.eup %4152  ;;  %4160 = vpow2.f32 %v2154_v51  ;;  %4004 = vmatprep.mubr.msk.f32.mxu1 %vm857_vm2, %v5406_v41  ;;  %4019 = vmatprep.subr.msk.mxu1 %vm687_vm0, %v2472_v47 }
 0x633   : > { %4005 = vmatmul.mubr.msk.f32.gmra.mxu1 %vm857_vm2, %v5409_v33  ;;  %v2470_v20 = vpop.permute.xlu1 %2469  ;;  %4162 = vpow2.f32 %v898_v9  ;;  %v1473_v51 = vmul.f32 1.442695, %v6183_v50  ;;  %v982_v9 = vld [vmem:[#allocation4 + $0x20] sm:$0xff] }
 0x634   : > { %4164 = vpow2.f32 %v904_v11  ;;  %v6190_v11 = vld [vmem:[#allocation39_spill] sm:$0xff] }
 0x635   : > { %4020 = vmatpush3.xpose.msk.msra.mxu1 %vm687_vm0, %v2472_v47  ;;  %v2468_v34 = vpop.permute.xlu0 %2467  ;;  %4166 = vpow2.f32 %v908_v31  ;;  %v979_v47 = vld [vmem:[#allocation4 + $0x8] sm:$0xff]  ;;  %v6192_v25 = vsub.f32 %v6190_v11, %v6191_v22 }
 0x636   : > { %4021 = vmatprep.subr.msk.mxu1 %vm687_vm0, %v2470_v20  ;;  %4168 = vpow2.f32 %v912_v45  ;;  %v984_v45 = vld [vmem:[#allocation4 + $0x30] sm:$0xff] }
 0x637   : > { %v2466_v7 = vpop.permute.xlu1 %2465  ;;  %4170 = vpow2.f32 %v1473_v51  ;;  %v1483_v28 = vmul.f32 1.442695, %v6192_v25 }
 0x639   : > { %v5418_v63 = vpop.eup %4154  ;;  %4022 = vmatpush3.xpose.msk.msra.mxu1 %vm687_vm0, %v2470_v20  ;;  %v2464_v30 = vpop.permute.xlu0 %2463 }
 0x63a   : > { %v5421_v0 = vpop.eup %4156  ;;  %4007 = vmatprep.mubr.msk.f32.mxu1 %vm857_vm2, %v5418_v63  ;;  %4023 = vmatprep.subr.msk.mxu1 %vm687_vm0, %v2468_v34 }
 0x63b   : > { %v5426_v14 = vpop.eup %4158  ;;  %4008 = vmatmul.mubr.msk.f32.gmra.mxu1 %vm857_vm2, %v5421_v0  ;;  %v2448_v29 = vpop.permute.xlu1 %2447 }
 0x63c   : > { %4010 = vmatprep.mubr.msk.f32.mxu1 %vm857_vm2, %v5426_v14 }
 0x63d   : > { %1569 = vadd.xlane.f32.xlu1 %v1568_v6  ;;  %4024 = vmatpush3.xpose.msk.msra.mxu1 %vm687_vm0, %v2468_v34  ;;  %v2450_v53 = vpop.permute.xlu0 %2449  ;;  %v6184_v34 = vld [vmem:[#allocation31_spill] sm:$0xff] }
 0x63e   : > { %4025 = vmatprep.subr.msk.mxu1 %vm687_vm0, %v2466_v7 }
 0x63f   : > { %v5436_v42 = vpop.eup %4160  ;;  %v2452_v23 = vpop.permute.xlu1 %2451 }
 0x640   : > { %4011 = vmatmul.mubr.msk.f32.gmra.mxu1 %vm857_vm2, %v5436_v42  ;;  %v5472_v20 = vpop.eup %4162 }
 0x641   : > { %1578 = vadd.xlane.f32.xlu1 %v1577_v3  ;;  %4026 = vmatpush3.xpose.msk.msra.mxu1 %vm687_vm0, %v2466_v7  ;;  %v2454_v60 = vpop.permute.xlu0 %2453  ;;  %v6185_v7 = vld [vmem:[#allocation33_spill] sm:$0xff]  ;;  %v5479_v27 = vpop.eup %4164 }
 0x642   : > { %4027 = vmatprep.subr.msk.mxu1 %vm687_vm0, %v2464_v30  ;;  %4029 = vmatprep.mubr.msk.f32.mxu1 %vm687_vm0, %v2448_v29  ;;  %v987_v29 = vmul.f32 %v5373_v8, %v979_v47  ;;  %v978_v3 = vld [vmem:[#allocation4] sm:$0xff]  ;;  %v989_v17 = vmul.f32 %v5479_v27, %v981_v57  ;;  %v5488_v24 = vpop.eup %4166  ;;  %v992_v47 = vmul.f32 %v5384_v49, %v984_v45 }
 0x643   : > { %v2456_v32 = vpop.permute.xlu1 %2455  ;;  %v991_v48 = vmul.f32 %v5488_v24, %v983_v37  ;;  %v5497_v50 = vpop.eup %4168  ;;  %v1558_v37 = vld [vmem:[#allocation4 + $0x70] sm:$0xff]  ;;  %v6194_v45 = vld [vmem:[#allocation21_spill] sm:$0xff] }
 0x645   : > { %1584 = vadd.xlane.f32.xlu1 %v1583_v5  ;;  %4028 = vmatpush3.xpose.msk.msra.mxu1 %vm687_vm0, %v2464_v30  ;;  %v2458_v1 = vpop.permute.xlu0 %2457  ;;  %v6186_v30 = vsub.f32 %v6184_v34, %v6185_v7  ;;  %v980_v5 = vld [vmem:[#allocation4 + $0x10] sm:$0xff]  ;;  %v985_v34 = vld [vmem:[#allocation4 + $0x38] sm:$0xff]  ;;  %v5501_v7 = vpop.eup %4170 }
 0x646   : > { %v988_v55 = vmul.f32 %v5376_v26, %v980_v5  ;;  %v990_v26 = vmul.f32 %v5381_v4, %v982_v9 }
 0x647   : > { %v2460_v40 = vpop.permute.xlu1 %2459  ;;  %v1475_v6 = vmul.f32 1.442695, %v6186_v30 }
 0x648   : > { %4030 = vmatmul.mubr.msk.f32.vlgmr.msra.gmra.mxu1 %vm687_vm0, %v2450_v53 }
 0x649   : > { %1590 = vadd.xlane.f32.xlu1 %v1589_v13  ;;  %4032 = vmatprep.mubr.msk.f32.mxu1 %vm687_vm0, %v2452_v23  ;;  %v2462_v18 = vpop.permute.xlu0 %2461  ;;  %4172 = vpow2.f32 %v1475_v6  ;;  %v6187_v13 = vld [vmem:[#allocation35_spill] sm:$0xff]  ;;  %v1553_v6 = vld [vmem:[#allocation4 + $0x48] sm:$0xff] }
 0x64a   : > { %v1561_v5 = vmul.f32 %v5501_v7, %v1553_v6  ;;  %v6195_v6 = vld [vmem:[#allocation23_spill] sm:$0xff] }
 0x64c   : > { %4033 = vmatmul.mubr.msk.f32.gmra.mxu1 %vm687_vm0, %v2454_v60  ;;  %v986_v60 = vmul.f32 %v5472_v20, %v978_v3  ;;  %v993_v3 = vmul.f32 %v5497_v50, %v985_v34 }
 0x64d   : > { %4035 = vmatprep.mubr.msk.f32.mxu1 %vm687_vm0, %v2456_v32  ;;  %v6188_v32 = vld [vmem:[#allocation37_spill] sm:$0xff] }
 0x650   : > { %4036 = vmatmul.mubr.msk.f32.gmra.mxu1 %vm687_vm0, %v2458_v1  ;;  %v6189_v1 = vsub.f32 %v6187_v13, %v6188_v32  ;;  %v1554_v13 = vld [vmem:[#allocation4 + $0x50] sm:$0xff] }
 0x651   : > { %4038 = vmatprep.mubr.msk.f32.mxu1 %vm687_vm0, %v2460_v40 }
 0x652   : > { %v1479_v40 = vmul.f32 1.442695, %v6189_v1  ;;  %v1165_v1 = vld [vmem:[#allocation2 + $0x8] sm:$0xff] }
 0x654   : > { %4039 = vmatmul.mubr.msk.f32.gmra.mxu1 %vm687_vm0, %v2462_v18  ;;  %4174 = vpow2.f32 %v1479_v40 }
 0x655   : > { %4176 = vpow2.f32 %v1483_v28 }
 0x676   : > { %v999_v53 = vpop.xlane.xlu0 %998 }
 0x677   : > { %v1019_v23 = vadd.f32 %v999_v53, %v987_v29 }
 0x679   : > { %1028 = vst.msk [vmem:[#allocation4 + $0x8] sm:$0xff] %vm475_vm1, %v1019_v23  ;;  %v996_v18 = vpop.xlane.xlu1 %995  ;;  %v5507_v23 = vpop.eup %4172 }
 0x67a   : > { %v1018_v8 = vadd.f32 %v996_v18, %v986_v60  ;;  %v1002_v56 = vpop.xlane.xlu0 %1001  ;;  %v1562_v18 = vmul.f32 %v5507_v23, %v1554_v13  ;;  %v6198_v13 = vld [vmem:[#allocation29_spill] sm:$0xff] }
 0x67b   : > { %v1020_v10 = vadd.f32 %v1002_v56, %v988_v55  ;;  %v5512_v55 = vpop.eup %4174  ;;  %v1556_v56 = vld [vmem:[#allocation4 + $0x60] sm:$0xff] }
 0x67c   : > { %1027 = vst.msk [vmem:[#allocation4] sm:$0xff] %vm475_vm1, %v1018_v8  ;;  %v1564_v25 = vmul.f32 %v5512_v55, %v1556_v56  ;;  %v5517_v28 = vpop.eup %4176  ;;  %v6203_v56 = vld [vmem:[#allocation34_spill] sm:$0xff] }
 0x67d   : > { %1029 = vst.msk [vmem:[#allocation4 + $0x10] sm:$0xff] %vm475_vm1, %v1020_v10  ;;  %v1005_v31 = vpop.xlane.xlu1 %1004  ;;  %v1166_v10 = vld [vmem:[#allocation2 + $0x10] sm:$0xff] }
 0x67e   : > { %v1021_v39 = vadd.f32 %v1005_v31, %v989_v17  ;;  %v1008_v43 = vpop.xlane.xlu0 %1007  ;;  %v6193_v17 = vld [vmem:[#allocation18_spill] sm:$0xff] }
 0x67f   : > { %v1022_v16 = vadd.f32 %v1008_v43, %v990_v26  ;;  %v1168_v43 = vld [vmem:[#allocation2 + $0x20] sm:$0xff] }
 0x680   : > { %1030 = vst.msk [vmem:[#allocation4 + $0x18] sm:$0xff] %vm475_vm1, %v1021_v39 }
 0x681   : > { %1031 = vst.msk [vmem:[#allocation4 + $0x20] sm:$0xff] %vm475_vm1, %v1022_v16  ;;  %v1011_v51 = vpop.xlane.xlu1 %1010 }
 0x682   : > { %v1023_v4 = vadd.f32 %v1011_v51, %v991_v48  ;;  %v1014_v30 = vpop.xlane.xlu0 %1013  ;;  %v1566_v51 = vmul.f32 %v5517_v28, %v1558_v37  ;;  %v1552_v37 = vld [vmem:[#allocation4 + $0x40] sm:$0xff] }
 0x683   : > { %v1024_v29 = vadd.f32 %v1014_v30, %v992_v47  ;;  %v1170_v30 = vld [vmem:[#allocation2 + $0x30] sm:$0xff] }
 0x684   : > { %1032 = vst.msk [vmem:[#allocation4 + $0x28] sm:$0xff] %vm475_vm1, %v1023_v4 }
 0x685   : > { %1033 = vst.msk [vmem:[#allocation4 + $0x30] sm:$0xff] %vm475_vm1, %v1024_v29  ;;  %v1017_v53 = vpop.xlane.xlu1 %1016 }
 0x686   : > { %v1025_v60 = vadd.f32 %v1017_v53, %v993_v3  ;;  %v1573_v49 = vpop.xlane.xlu0 %1572 }
 0x687   : > { %v1593_v32 = vadd.f32 %v1573_v49, %v1561_v5  ;;  %v6196_v5 = vld [vmem:[#allocation25_spill] sm:$0xff]  ;;  %v6197_v49 = vld [vmem:[#allocation27_spill] sm:$0xff] }
 0x688   : > { %1034 = vst.msk [vmem:[#allocation4 + $0x38] sm:$0xff] %vm475_vm1, %v1025_v60 }
 0x689   : > { %1601 = vst.msk [vmem:[#allocation4 + $0x48] sm:$0xff] %vm475_vm1, %v1593_v32  ;;  %v1180_v40 = vpop.permute.xlu1 %1179  ;;  %v6199_v32 = vsub.f32 %v6197_v49, %v6198_v13 }
 0x68a   : > { %v1213_v57 = vmul.f32 %v1180_v40, %v1165_v1  ;;  %v1576_v8 = vpop.xlane.xlu0 %1575  ;;  %v6200_v40 = vld [vmem:[#allocation30_spill] sm:$0xff] }
 0x68b   : > { %v1594_v9 = vadd.f32 %v1576_v8, %v1562_v18  ;;  %v1471_v1 = vmul.f32 1.442695, %v6199_v32  ;;  %v6201_v18 = vld [vmem:[#allocation32_spill] sm:$0xff] }
 0x68c   : > { %v1221_v11 = vadd.f32 %v6193_v17, %v1213_v57  ;;  %v6202_v57 = vsub.f32 %v6200_v40, %v6201_v18 }
 0x68d   : > { %1602 = vst.msk [vmem:[#allocation4 + $0x50] sm:$0xff] %vm475_vm1, %v1594_v9  ;;  %v1185_v22 = vpop.permute.xlu1 %1184  ;;  %4178 = vpow2.f32 %v1471_v1  ;;  %v6204_v9 = vld [vmem:[#allocation36_spill] sm:$0xff] }
 0x68e   : > { %1230 = vst.msk [vmem:[#allocation2 + $0x8] sm:$0xff] %vm540_vm3, %v1221_v11  ;;  %v1214_v31 = vmul.f32 %v1185_v22, %v1166_v10  ;;  %v1582_v26 = vpop.xlane.xlu0 %1581  ;;  %v1477_v8 = vmul.f32 1.442695, %v6202_v57  ;;  %v6205_v10 = vsub.f32 %v6203_v56, %v6204_v9  ;;  %v6206_v11 = vld [vmem:[#allocation38_spill] sm:$0xff]  ;;  %v6207_v22 = vld [vmem:[#allocation40_spill] sm:$0xff] }
 0x68f   : > { %v1596_v39 = vadd.f32 %v1582_v26, %v1564_v25  ;;  %v6208_v25 = vsub.f32 %v6206_v11, %v6207_v22 }
 0x690   : > { %v1222_v16 = vadd.f32 %v1214_v31, %v6194_v45  ;;  %4180 = vpow2.f32 %v1477_v8  ;;  %v1481_v17 = vmul.f32 1.442695, %v6205_v10 }
 0x691   : > { %1604 = vst.msk [vmem:[#allocation4 + $0x60] sm:$0xff] %vm475_vm1, %v1596_v39  ;;  %v1195_v48 = vpop.permute.xlu1 %1194  ;;  %v1485_v31 = vmul.f32 1.442695, %v6208_v25 }
 0x692   : > { %1231 = vst.msk [vmem:[#allocation2 + $0x10] sm:$0xff] %vm540_vm3, %v1222_v16  ;;  %v1216_v47 = vmul.f32 %v1195_v48, %v1168_v43  ;;  %v1588_v34 = vpop.xlane.xlu0 %1587  ;;  %4182 = vpow2.f32 %v1481_v17  ;;  %v1555_v16 = vld [vmem:[#allocation4 + $0x58] sm:$0xff] }
 0x693   : > { %v1598_v4 = vadd.f32 %v1588_v34, %v1566_v51  ;;  %4184 = vpow2.f32 %v1485_v31 }
 0x694   : > { %v1224_v29 = vadd.f32 %v1216_v47, %v6195_v6 }
 0x695   : > { %1606 = vst.msk [vmem:[#allocation4 + $0x70] sm:$0xff] %vm475_vm1, %v1598_v4  ;;  %v1205_v3 = vpop.permute.xlu1 %1204  ;;  %v1557_v4 = vld [vmem:[#allocation4 + $0x68] sm:$0xff] }
 0x696   : > { %1233 = vst.msk [vmem:[#allocation2 + $0x20] sm:$0xff] %vm540_vm3, %v1224_v29  ;;  %v1218_v53 = vmul.f32 %v1205_v3, %v1170_v30 }
 0x698   : > { %v1226_v60 = vadd.f32 %v1218_v53, %v6196_v5  ;;  %v1559_v53 = vld [vmem:[#allocation4 + $0x78] sm:$0xff] }
 0x69a   : > { %1235 = vst.msk [vmem:[#allocation2 + $0x30] sm:$0xff] %vm540_vm3, %v1226_v60  ;;  %v4179_v26 = vpop.eup %4178 }
 0x69b   : > { %v1560_v39 = vmul.f32 %v4179_v26, %v1552_v37 }
 0x69d   : > { %v5541_v43 = vpop.eup %4180 }
 0x69e   : > { %v1563_v51 = vmul.f32 %v5541_v43, %v1555_v16 }
 0x69f   : > { %v5545_v47 = vpop.eup %4182 }
 0x6a0   : > { %v1565_v6 = vmul.f32 %v5545_v47, %v1557_v4  ;;  %v5549_v29 = vpop.eup %4184 }
 0x6a1   : > { %v1567_v60 = vmul.f32 %v5549_v29, %v1559_v53 }
 0x6c6   : > { %v1570_v45 = vpop.xlane.xlu1 %1569 }
 0x6c7   : > { %v1592_v48 = vadd.f32 %v1570_v45, %v1560_v39 }
 0x6c9   : > { %1600 = vst.msk [vmem:[#allocation4 + $0x40] sm:$0xff] %vm475_vm1, %v1592_v48 }
 0x6ca   : > { %v1579_v34 = vpop.xlane.xlu1 %1578 }
 0x6cb   : > { %v1595_v30 = vadd.f32 %v1579_v34, %v1563_v51 }
 0x6cd   : > { %1603 = vst.msk [vmem:[#allocation4 + $0x58] sm:$0xff] %vm475_vm1, %v1595_v30 }
 0x6ce   : > { %v1585_v3 = vpop.xlane.xlu1 %1584 }
 0x6cf   : > { %v1597_v5 = vadd.f32 %v1585_v3, %v1565_v6  ;;  %v6209_v6 = vld [vmem:[#allocation5_spill] sm:$0xff] }
 0x6d1   : > { %1605 = vst.msk [vmem:[#allocation4 + $0x68] sm:$0xff] %vm475_vm1, %v1597_v5 }
 0x6d2   : > { %v1591_v49 = vpop.xlane.xlu1 %1590 }
 0x6d3   : > { %v1599_v13 = vadd.f32 %v1591_v49, %v1567_v60  ;;  %v5619_v49 = vld [vmem:[#allocation3 + $0xc0] sm:$0xff] }
 0x6d5   : > { %1607 = vst.msk [vmem:[#allocation4 + $0x78] sm:$0xff] %vm475_vm1, %v1599_v13  ;;  %v6214_v13 = vld [vmem:[#allocation20_spill] sm:$0xff] }
 0x6e5   : > { %v5554_v32 = vpop.f32.mrf.mxu1 }
 0x6e7   : > { %v5556_v1 = vpop.f32.mrf.mxu1 }
 0x6f3   : > { %v5558_v40 = vpop.f32.mrf.mxu1 }
 0x6f5   : > { %v5560_v18 = vpop.f32.mrf.mxu1 }
 0x6fb   : > { %v5562_v57 = vpop.f32.mrf.mxu1 }
 0x6fd   : > { %v5564_v8 = vpop.f32.mrf.mxu1 }
 0x700   : > { %v5566_v56 = vpop.f32.mrf.mxu1 }
 0x702   : > { %v5568_v9 = vpop.f32.mrf.mxu1 }
 0x708   : > { %v4031_v10 = vpop.f32.mrf.mxu1 }
 0x709   : > { %v5570_v17 = vmul.f32 0.35355338, %v4031_v10  ;;  %v5631_v10 = vld [vmem:[#allocation3 + $0xe8] sm:$0xff] }
 0x70a   : > { %v2577_v11 = vpop.f32.mrf.mxu1 }
 0x70b   : > { %v5572_v22 = vmul.f32 0.35355338, %v2577_v11  ;;  %v2636_v25 = vsel %vm857_vm2, %v5570_v17, -inf }
 0x70c   : > { %2637 = vmax.xlane.f32.xlu1 %v2636_v25  ;;  %v4034_v31 = vpop.f32.mrf.mxu1 }
 0x70d   : > { %v5576_v37 = vmul.f32 0.35355338, %v4034_v31  ;;  %v2633_v45 = vsel %vm857_vm2, %v5572_v22, -inf }
 0x70e   : > { %v2587_v39 = vpop.f32.mrf.mxu1 }
 0x70f   : > { %v2642_v51 = vsel %vm857_vm2, %v5576_v37, -inf  ;;  %v5584_v34 = vmul.f32 0.35355338, %v2587_v39 }
 0x710   : > { %2634 = vmax.xlane.f32.xlu1 %v2633_v45  ;;  %v4037_v16 = vpop.f32.mrf.mxu1 }
 0x711   : > { %v5580_v48 = vmul.f32 0.35355338, %v4037_v16  ;;  %v2639_v30 = vsel %vm857_vm2, %v5584_v34, -inf  ;;  %v5644_v16 = vld [vmem:[#allocation3 + $0xd0] sm:$0xff] }
 0x712   : > { %v2597_v3 = vpop.f32.mrf.mxu1 }
 0x713   : > { %v2648_v4 = vsel %vm857_vm2, %v5580_v48, -inf  ;;  %v5599_v53 = vmul.f32 0.35355338, %v2597_v3  ;;  %v1771_v3 = vld [vmem:[#allocation2 + $0x48] sm:$0xff] }
 0x714   : > { %2643 = vmax.xlane.f32.xlu1 %v2642_v51  ;;  %2649 = vmax.xlane.f32.xlu0 %v2648_v4  ;;  %v6212_v51 = vld [vmem:[#allocation19_spill] sm:$0xff] }
 0x718   : > { %2640 = vmax.xlane.f32.xlu1 %v2639_v30 }
 0x729   : > { %1785 = vperm.xlu1 %4105, %v5501_v7   ;;  %v4040_v7 = vpop.f32.mrf.mxu1 }
 0x72a   : > { %1174 = vperm.xlu0 %4104, %v5472_v20   ;;  %v5601_v20 = vmul.f32 0.35355338, %v4040_v7  ;;  %v1164_v7 = vld [vmem:[#allocation2] sm:$0xff] }
 0x72d   : > { %1790 = vperm.xlu1 %4105, %v5507_v23  }
 0x72e   : > { %1189 = vperm.xlu0 %4104, %v5479_v27   ;;  %v2645_v27 = vsel %vm857_vm2, %v5599_v53, -inf }
 0x732   : > { %1199 = vperm.xlu0 %4104, %v5488_v24   ;;  %v2607_v24 = vpop.f32.mrf.mxu1 }
 0x733   : > { %v5607_v23 = vmul.f32 0.35355338, %v2607_v24  ;;  %v6210_v24 = vld [vmem:[#allocation6_spill] sm:$0xff] }
 0x736   : > { %1209 = vperm.xlu0 %4104, %v5497_v50   ;;  %v2654_v50 = vsel %vm857_vm2, %v5601_v20, -inf }
 0x73a   : > { %1780 = vperm.xlu0 %4104, %v4179_v26   ;;  %v5614_v26 = vld [vmem:[#allocation3 + $0xc8] sm:$0xff] }
 0x73e   : > { %1800 = vperm.xlu0 %4104, %v5512_v55   ;;  %v2651_v55 = vsel %vm857_vm2, %v5607_v23, -inf }
 0x742   : > { %2824 = vrot.lane.b32.xlu0 %v6209_v6, %s4329_s13 }
 0x751   : > { %2646 = vmax.xlane.f32.xlu1 %v2645_v27 }
 0x755   : > { %2655 = vmax.xlane.f32.xlu1 %v2654_v50 }
 0x759   : > { %2652 = vmax.xlane.f32.xlu1 %v2651_v55 }
 0x76a   : > { %1795 = vperm.xlu1 %4105, %v5541_v43  }
 0x76e   : > { %1805 = vperm.xlu1 %4105, %v5545_v47  }
 0x772   : > { %1810 = vperm.xlu1 %4105, %v5517_v28   ;;  %v5629_v28 = vld [vmem:[#allocation3 + $0xd8] sm:$0xff] }
 0x795   : > { %v2638_v5 = vpop.xlane.xlu1 %2637 }
 0x796   : > { %v5617_v60 = vmax.f32 %v5614_v26, %v2638_v5 }
 0x798   : > { %3037 = vst.msk [vmem:[#allocation3 + $0xc8] sm:$0xff] %vm475_vm1, %v5617_v60  ;;  %2696 = vperm.xlu1 %4105, %v5617_v60  }
 0x799   : > { %v2635_v43 = vpop.xlane.xlu1 %2634 }
 0x79a   : > { %v5627_v47 = vmax.f32 %v5619_v49, %v2635_v43 }
 0x79c   : > { %3036 = vst.msk [vmem:[#allocation3 + $0xc0] sm:$0xff] %vm475_vm1, %v5627_v47  ;;  %2691 = vperm.xlu1 %4105, %v5627_v47  }
 0x79d   : > { %v2644_v25 = vpop.xlane.xlu1 %2643  ;;  %v2650_v31 = vpop.xlane.xlu0 %2649 }
 0x79e   : > { %v5639_v39 = vmax.f32 %v5629_v28, %v2644_v25  ;;  %v5642_v45 = vmax.f32 %v5631_v10, %v2650_v31  ;;  %v1772_v25 = vld [vmem:[#allocation2 + $0x50] sm:$0xff]  ;;  %v1167_v31 = vld [vmem:[#allocation2 + $0x18] sm:$0xff] }
 0x7a0   : > { %3039 = vst.msk [vmem:[#allocation3 + $0xd8] sm:$0xff] %vm475_vm1, %v5639_v39  ;;  %2706 = vperm.xlu0 %4104, %v5639_v39   ;;  %3041 = vst.msk [vmem:[#allocation3 + $0xe8] sm:$0xff] %vm475_vm1, %v5642_v45 }
 0x7a1   : > { %v2641_v30 = vpop.xlane.xlu1 %2640 }
 0x7a2   : > { %v5656_v6 = vmax.f32 %v5644_v16, %v2641_v30  ;;  %v6211_v30 = vld [vmem:[#allocation43_spill] sm:$0xff] }
 0x7a4   : > { %3038 = vst.msk [vmem:[#allocation3 + $0xd0] sm:$0xff] %vm475_vm1, %v5656_v6  ;;  %2822 = vrot.lane.b32.xlu0 %v6210_v24, %s4329_s13  ;;  %2701 = vperm.xlu1 %4105, %v5656_v6  }
 0x7a5   : > { %v1786_v50 = vpop.permute.xlu1 %1785  ;;  %v1175_v55 = vpop.permute.xlu0 %1174 }
 0x7a6   : > { %v1819_v5 = vmul.f32 %v1786_v50, %v1771_v3  ;;  %v1212_v43 = vmul.f32 %v1175_v55, %v1164_v7  ;;  %v1169_v7 = vld [vmem:[#allocation2 + $0x28] sm:$0xff] }
 0x7a7   : > { %v6213_v50 = vld [vmem:[#allocation46_spill] sm:$0xff] }
 0x7a8   : > { %v1827_v4 = vadd.f32 %v6211_v30, %v1819_v5  ;;  %v1220_v11 = vadd.f32 %v1212_v43, %v6212_v51  ;;  %2820 = vrot.lane.b32.xlu0 %v4682_v36, %s4329_s13  ;;  %2716 = vperm.xlu1 %4105, %v5642_v45   ;;  %v6215_v51 = vld [vmem:[#allocation7_spill] sm:$0xff]  ;;  %v1171_v30 = vld [vmem:[#allocation2 + $0x38] sm:$0xff] }
 0x7a9   : > { %v1791_v27 = vpop.permute.xlu1 %1790  ;;  %v1190_v21 = vpop.permute.xlu0 %1189 }
 0x7aa   : > { %1835 = vst.msk [vmem:[#allocation2 + $0x48] sm:$0xff] %vm540_vm3, %v1827_v4  ;;  %1229 = vst.msk [vmem:[#allocation2] sm:$0xff] %vm540_vm3, %v1220_v11  ;;  %v1820_v24 = vmul.f32 %v1791_v27, %v1772_v25  ;;  %v1215_v3 = vmul.f32 %v1190_v21, %v1167_v31  ;;  %v6216_v4 = vld [vmem:[#allocation22_spill] sm:$0xff]  ;;  %v6218_v25 = vld [vmem:[#allocation24_spill] sm:$0xff] }
 0x7ab   : > { %v6217_v11 = vld [vmem:[#allocation10_spill] sm:$0xff] }
 0x7ac   : > { %v1828_v55 = vadd.f32 %v1820_v24, %v6213_v50  ;;  %v1223_v5 = vadd.f32 %v6214_v13, %v1215_v3  ;;  %2818 = vrot.lane.b32.xlu0 %v6215_v51, %s4329_s13  ;;  %v1770_v13 = vld [vmem:[#allocation2 + $0x40] sm:$0xff]  ;;  %v6219_v50 = vld [vmem:[#allocation44_spill] sm:$0xff] }
 0x7ad   : > { %v1200_v43 = vpop.permute.xlu0 %1199 }
 0x7ae   : > { %1836 = vst.msk [vmem:[#allocation2 + $0x50] sm:$0xff] %vm540_vm3, %v1828_v55  ;;  %1232 = vst.msk [vmem:[#allocation2 + $0x18] sm:$0xff] %vm540_vm3, %v1223_v5  ;;  %v1217_v36 = vmul.f32 %v1200_v43, %v1169_v7  ;;  %v1774_v7 = vld [vmem:[#allocation2 + $0x60] sm:$0xff]  ;;  %v6220_v43 = vld [vmem:[#allocation48_spill] sm:$0xff] }
 0x7b0   : > { %v1225_v61 = vadd.f32 %v6216_v4, %v1217_v36  ;;  %2814 = vrot.lane.b32.xlu0 %v6217_v11, %s4329_s13  ;;  %v5694_v4 = vld [vmem:[#allocation3 + $0xe0] sm:$0xff] }
 0x7b1   : > { %v1210_v21 = vpop.permute.xlu0 %1209 }
 0x7b2   : > { %1234 = vst.msk [vmem:[#allocation2 + $0x28] sm:$0xff] %vm540_vm3, %v1225_v61  ;;  %v1219_v27 = vmul.f32 %v1210_v21, %v1171_v30  ;;  %v2179_v30 = vsel %vm857_vm2, %v5406_v41, 0.0  ;;  %v2182_v21 = vsel %vm857_vm2, %v5409_v33, 0.0 }
 0x7b4   : > { %v1227_v31 = vadd.f32 %v6218_v25, %v1219_v27  ;;  %2810 = vrot.lane.b32.xlu0 %v4722_v2, %s4329_s13  ;;  %v2173_v2 = vsel %vm857_vm2, %v5389_v15, 0.0  ;;  %v2188_v25 = vsel %vm857_vm2, %v5421_v0, 0.0 }
 0x7b5   : > { %v1781_v24 = vpop.permute.xlu0 %1780 }
 0x7b6   : > { %1236 = vst.msk [vmem:[#allocation2 + $0x38] sm:$0xff] %vm540_vm3, %v1227_v31  ;;  %v1818_v3 = vmul.f32 %v1781_v24, %v1770_v13  ;;  %v5701_v13 = vld [vmem:[#allocation3 + $0xf8] sm:$0xff]  ;;  %v5713_v31 = vld [vmem:[#allocation3 + $0xf0] sm:$0xff] }
 0x7b7   : > { %v1776_v24 = vld [vmem:[#allocation2 + $0x70] sm:$0xff] }
 0x7b8   : > { %v1826_v55 = vadd.f32 %v1818_v3, %v6219_v50  ;;  %v1773_v50 = vld [vmem:[#allocation2 + $0x58] sm:$0xff] }
 0x7b9   : > { %v1801_v5 = vpop.permute.xlu0 %1800 }
 0x7ba   : > { %1834 = vst.msk [vmem:[#allocation2 + $0x40] sm:$0xff] %vm540_vm3, %v1826_v55  ;;  %v1822_v51 = vmul.f32 %v1801_v5, %v1774_v7  ;;  %v2194_v7 = vsel %vm857_vm2, %v5436_v42, 0.0  ;;  %v1775_v42 = vld [vmem:[#allocation2 + $0x68] sm:$0xff]  ;;  %v6227_v55 = vld [vmem:[#allocation47_spill] sm:$0xff] }
 0x7bc   : > { %v1830_v61 = vadd.f32 %v1822_v51, %v6220_v43  ;;  %v6221_v51 = vld [vmem:[#allocation51_spill] sm:$0xff]  ;;  %v6222_v43 = vld [vmem:[#allocation53_spill] sm:$0xff] }
 0x7bd   : > { %v2825_v36 = vpop.permute.xlu0 %2824 }
 0x7be   : > { %1838 = vst.msk [vmem:[#allocation2 + $0x60] sm:$0xff] %vm540_vm3, %v1830_v61  ;;  %4041 = vmatprep.subr.mxu0 %v2825_v36  ;;  %v6223_v61 = vsub.f32 %v6221_v51, %v6222_v43 }
 0x7bf   : > { %4042 = vmatpush3.msra.mxu0 %v2825_v36 }
 0x7c0   : > { %v2078_v36 = vmul.f32 1.442695, %v6223_v61 }
 0x7c2   : > { %4186 = vpow2.f32 %v2078_v36  ;;  %v6230_v36 = vsub.f32 %v5614_v26, %v5617_v60  ;;  %v2176_v26 = vsel %vm857_vm2, %v5391_v19, 0.0 }
 0x7d3   : > { %2174 = vadd.xlane.f32.xlu0 %v2173_v2 }
 0x7d7   : > { %2180 = vadd.xlane.f32.xlu0 %v2179_v30  ;;  %v6224_v30 = vld [vmem:[#allocation45_spill] sm:$0xff] }
 0x7da   : > { %v2647_v11 = vpop.xlane.xlu1 %2646 }
 0x7db   : > { %v5699_v27 = vmax.f32 %v5694_v4, %v2647_v11  ;;  %2183 = vadd.xlane.f32.xlu0 %v2182_v21  ;;  %v6225_v21 = vld [vmem:[#allocation8_spill] sm:$0xff] }
 0x7dd   : > { %v2669_v15 = vsub.f32 %v5694_v4, %v5699_v27  ;;  %3040 = vst.msk [vmem:[#allocation3 + $0xe0] sm:$0xff] %vm475_vm1, %v5699_v27  ;;  %2711 = vperm.xlu1 %4105, %v5699_v27  }
 0x7de   : > { %v2656_v41 = vpop.xlane.xlu1 %2655 }
 0x7df   : > { %v5711_v33 = vmax.f32 %v5701_v13, %v2656_v41  ;;  %2189 = vadd.xlane.f32.xlu0 %v2188_v25  ;;  %v6226_v25 = vsub.f32 %v5199_v46, %v5217_v38  ;;  %v6229_v38 = vld [vmem:[#allocation50_spill] sm:$0xff] }
 0x7e1   : > { %3043 = vst.msk [vmem:[#allocation3 + $0xf8] sm:$0xff] %vm475_vm1, %v5711_v33  ;;  %2726 = vperm.xlu1 %4105, %v5711_v33  }
 0x7e2   : > { %v2653_v3 = vpop.xlane.xlu1 %2652 }
 0x7e3   : > { %v5723_v0 = vmax.f32 %v5713_v31, %v2653_v3  ;;  %2195 = vadd.xlane.f32.xlu0 %v2194_v7  ;;  %v2084_v3 = vmul.f32 1.442695, %v6226_v25  ;;  %v6232_v25 = vld [vmem:[#allocation54_spill] sm:$0xff] }
 0x7e5   : > { %3042 = vst.msk [vmem:[#allocation3 + $0xf0] sm:$0xff] %vm475_vm1, %v5723_v0  ;;  %2721 = vperm.xlu1 %4105, %v5723_v0   ;;  %4188 = vpow2.f32 %v2084_v3  ;;  %v6245_v4 = vsub.f32 %v5713_v31, %v5723_v0  ;;  %v3050_v0 = vld [vmem:[#allocation4 + $0x8] sm:$0xff] }
 0x7e6   : > { %v1796_v5 = vpop.permute.xlu1 %1795 }
 0x7e7   : > { %v1821_v2 = vmul.f32 %v1796_v5, %v1773_v50  ;;  %v6228_v5 = vsub.f32 %v5221_v62, %v5238_v52  ;;  %v2685_v27 = vmul.f32 1.442695, %v6245_v4 }
 0x7e9   : > { %v1829_v11 = vadd.f32 %v6224_v30, %v1821_v2  ;;  %2816 = vrot.lane.b32.xlu1 %v6225_v21, %s4329_s13  ;;  %v2088_v43 = vmul.f32 1.442695, %v6228_v5  ;;  %v2675_v2 = vmul.f32 1.442695, %v6230_v36 }
 0x7ea   : > { %v1806_v41 = vpop.permute.xlu1 %1805 }
 0x7eb   : > { %1837 = vst.msk [vmem:[#allocation2 + $0x58] sm:$0xff] %vm540_vm3, %v1829_v11  ;;  %v1823_v7 = vmul.f32 %v1806_v41, %v1775_v42  ;;  %4190 = vpow2.f32 %v2088_v43  ;;  %v2191_v11 = vsel %vm857_vm2, %v5426_v14, 0.0  ;;  %v6231_v41 = vld [vmem:[#allocation52_spill] sm:$0xff] }
 0x7ec   : > { %4192 = vpow2.f32 %v2675_v2  ;;  %v6233_v3 = vsub.f32 %v6231_v41, %v6232_v25  ;;  %v6240_v41 = vsub.f32 %v5219_v12, %v5235_v44 }
 0x7ed   : > { %v1831_v51 = vadd.f32 %v6227_v55, %v1823_v7  ;;  %2812 = vrot.lane.b32.xlu1 %v4709_v59, %s4329_s13  ;;  %v5752_v59 = vpop.eup %4186 }
 0x7ee   : > { %v1811_v50 = vpop.permute.xlu1 %1810  ;;  %v2076_v7 = vmul.f32 1.442695, %v6233_v3  ;;  %v2090_v25 = vmul.f32 1.442695, %v6240_v41  ;;  %v2160_v41 = vld [vmem:[#allocation4 + $0x98] sm:$0xff] }
 0x7ef   : > { %1839 = vst.msk [vmem:[#allocation2 + $0x68] sm:$0xff] %vm540_vm3, %v1831_v51  ;;  %v1824_v61 = vmul.f32 %v1811_v50, %v1776_v24  ;;  %v2185_v24 = vsel %vm857_vm2, %v5418_v63, 0.0  ;;  %v6234_v63 = vld [vmem:[#allocation56_spill] sm:$0xff] }
 0x7f0   : > { %v6235_v5 = vsub.f32 %v6234_v63, %v5195_v58 }
 0x7f1   : > { %v1832_v46 = vadd.f32 %v1824_v61, %v6229_v38 }
 0x7f2   : > { %v5755_v55 = vpop.eup %4188  ;;  %v2080_v43 = vmul.f32 1.442695, %v6235_v5 }
 0x7f3   : > { %1840 = vst.msk [vmem:[#allocation2 + $0x70] sm:$0xff] %vm540_vm3, %v1832_v46  ;;  %v6236_v46 = vld [vmem:[#allocation55_spill] sm:$0xff] }
 0x7f4   : > { %v6237_v36 = vsub.f32 %v6236_v46, %v5192_v35 }
 0x7f6   : > { %v2082_v2 = vmul.f32 1.442695, %v6237_v36  ;;  %v2157_v36 = vld [vmem:[#allocation4 + $0x80] sm:$0xff] }
 0x7f8   : > { %v5758_v52 = vpop.eup %4190 }
 0x7f9   : > { %2382 = vperm.xlu0 %4104, %v5752_v59   ;;  %v5761_v62 = vpop.eup %4192 }
 0x7fd   : > { %2397 = vperm.xlu0 %4104, %v5755_v55  }
 0x801   : > { %2407 = vperm.xlu0 %4104, %v5758_v52  }
 0x805   : > { %2979 = vperm.xlu0 %4104, %v5761_v62  }
 0x811   : > { %2177 = vadd.xlane.f32.xlu1 %v2176_v26 }
 0x813   : > { %v5766_v60 = vpop.permute.xlu1 %2696 }
 0x815   : > { %2186 = vadd.xlane.f32.xlu1 %v2185_v24 }
 0x817   : > { %v2692_v42 = vpop.permute.xlu1 %2691 }
 0x818   : > { %v2729_v30 = vsub.f32 %v5572_v22, %v2692_v42 }
 0x819   : > { %2192 = vadd.xlane.f32.xlu1 %v2191_v11 }
 0x81a   : > { %v2737_v21 = vmul.f32 1.442695, %v2729_v30  ;;  %v6238_v30 = vld [vmem:[#allocation57_spill] sm:$0xff] }
 0x81b   : > { %v2707_v19 = vpop.permute.xlu0 %2706 }
 0x81c   : > { %4194 = vpow2.f32 %v2737_v21  ;;  %v2732_v51 = vsub.f32 %v5576_v37, %v2707_v19 }
 0x81d   : > { %4196 = vpow2.f32 %v2076_v7 }
 0x81e   : > { %v2743_v50 = vmul.f32 1.442695, %v2732_v51 }
 0x81f   : > { %v2702_v22 = vpop.permute.xlu1 %2701  ;;  %v2823_v61 = vpop.permute.xlu0 %2822 }
 0x820   : > { %4198 = vpow2.f32 %v2743_v50  ;;  %v2731_v14 = vsub.f32 %v5584_v34, %v2702_v22  ;;  %4043 = vmatprep.subr.mxu0 %v2823_v61  ;;  %v6239_v34 = vsub.f32 %v6238_v30, %v5214_v54  ;;  %v6242_v50 = vsub.f32 %v5629_v28, %v5639_v39  ;;  %v2159_v30 = vld [vmem:[#allocation4 + $0x90] sm:$0xff] }
 0x821   : > { %4044 = vmatpush3.msra.mxu0 %v2823_v61  ;;  %4200 = vpow2.f32 %v2080_v43 }
 0x822   : > { %v2741_v38 = vmul.f32 1.442695, %v2731_v14  ;;  %v2086_v11 = vmul.f32 1.442695, %v6239_v34  ;;  %v2679_v63 = vmul.f32 1.442695, %v6242_v50 }
 0x823   : > { %v2717_v37 = vpop.permute.xlu1 %2716  ;;  %v2821_v26 = vpop.permute.xlu0 %2820 }
 0x824   : > { %4202 = vpow2.f32 %v2741_v38  ;;  %v2734_v24 = vsub.f32 %v5580_v48, %v2717_v37  ;;  %4045 = vmatprep.subr.mxu0 %v2821_v26 }
 0x825   : > { %4046 = vmatpush3.msra.mxu0 %v2821_v26  ;;  %4204 = vpow2.f32 %v2082_v2 }
 0x826   : > { %v2747_v58 = vmul.f32 1.442695, %v2734_v24 }
 0x827   : > { %v2819_v42 = vpop.permute.xlu0 %2818 }
 0x828   : > { %4206 = vpow2.f32 %v2747_v58  ;;  %4047 = vmatprep.subr.mxu0 %v2819_v42 }
 0x829   : > { %v4195_v21 = vpop.eup %4194  ;;  %4048 = vmatpush3.msra.mxu0 %v2819_v42  ;;  %4208 = vpow2.f32 %v2086_v11 }
 0x82a   : > { %4057 = vmatprep.mubr.msk.f32.mxu0 %vm857_vm2, %v4195_v21  ;;  %1815 = vperm.xlu1 %4105, %v5549_v29   ;;  %v2770_v35 = vsel %vm857_vm2, %v4195_v21, 0.0  ;;  %v4197_v48 = vpop.eup %4196  ;;  %4210 = vpow2.f32 %v2090_v25  ;;  %v6241_v29 = vsub.f32 %v5619_v49, %v5627_v47  ;;  %v6243_v47 = vsub.f32 %v5644_v16, %v5656_v6 }
 0x82b   : > { %2771 = vadd.xlane.f32.xlu0 %v2770_v35  ;;  %v2815_v38 = vpop.permute.xlu0 %2814  ;;  %v2730_v16 = vsub.f32 %v5570_v17, %v5766_v60  ;;  %v2165_v26 = vmul.f32 %v4197_v48, %v2157_v36 }
 0x82c   : > { %v2673_v19 = vmul.f32 1.442695, %v6241_v29  ;;  %v2677_v43 = vmul.f32 1.442695, %v6243_v47 }
 0x82d   : > { %v5794_v3 = vpop.eup %4198  ;;  %v2739_v2 = vmul.f32 1.442695, %v2730_v16 }
 0x82e   : > { %2377 = vperm.xlu1 %4105, %v4197_v48   ;;  %v2779_v54 = vsel %vm857_vm2, %v5794_v3, 0.0  ;;  %v4201_v7 = vpop.eup %4200  ;;  %4212 = vpow2.f32 %v2673_v19 }
 0x82f   : > { %2780 = vadd.xlane.f32.xlu0 %v2779_v54  ;;  %4214 = vpow2.f32 %v2679_v63  ;;  %v2811_v6 = vpop.permute.xlu0 %2810  ;;  %v2167_v35 = vmul.f32 %v4201_v7, %v2159_v30 }
 0x830   : > { %4216 = vpow2.f32 %v2677_v43 }
 0x831   : > { %v5801_v51 = vpop.eup %4202  ;;  %4218 = vpow2.f32 %v2739_v2  ;;  %v2368_v2 = vld [vmem:[#allocation2 + $0x88] sm:$0xff] }
 0x832   : > { %2387 = vperm.xlu1 %4105, %v4201_v7   ;;  %v2776_v44 = vsel %vm857_vm2, %v5801_v51, 0.0  ;;  %v4205_v12 = vpop.eup %4204 }
 0x833   : > { %2777 = vadd.xlane.f32.xlu0 %v2776_v44  ;;  %v2168_v54 = vmul.f32 %v4205_v12, %v2160_v41  ;;  %v3121_v41 = vld [vmem:[#allocation4 + $0x40] sm:$0xff] }
 0x835   : > { %v5808_v5 = vpop.eup %4206 }
 0x836   : > { %2392 = vperm.xlu1 %4105, %v4205_v12   ;;  %v2785_v49 = vsel %vm857_vm2, %v5808_v5, 0.0  ;;  %v4209_v22 = vpop.eup %4208 }
 0x837   : > { %2786 = vadd.xlane.f32.xlu0 %v2785_v49  ;;  %v4211_v61 = vpop.eup %4210 }
 0x83a   : > { %2402 = vperm.xlu1 %4105, %v4209_v22  }
 0x83b   : > { %v5815_v14 = vpop.eup %4212 }
 0x83c   : > { %v5818_v28 = vpop.eup %4214 }
 0x83d   : > { %v5821_v39 = vpop.eup %4216 }
 0x83e   : > { %2412 = vperm.xlu1 %4105, %v4211_v61   ;;  %v4219_v47 = vpop.eup %4218 }
 0x842   : > { %2974 = vperm.xlu1 %4105, %v5815_v14  }
 0x846   : > { %2989 = vperm.xlu1 %4105, %v5818_v28  }
 0x84a   : > { %2984 = vperm.xlu1 %4105, %v5821_v39  }
 0x858   : > { %v2712_v46 = vpop.permute.xlu1 %2711 }
 0x859   : > { %v2733_v37 = vsub.f32 %v5599_v53, %v2712_v46 }
 0x85b   : > { %v2745_v24 = vmul.f32 1.442695, %v2733_v37  ;;  %v2681_v37 = vmul.f32 1.442695, %v2669_v15 }
 0x85c   : > { %v2727_v58 = vpop.permute.xlu1 %2726  ;;  %v2175_v42 = vpop.xlane.xlu0 %2174 }
 0x85d   : > { %v2736_v34 = vsub.f32 %v5601_v20, %v2727_v58  ;;  %v2197_v11 = vadd.f32 %v2175_v42, %v2165_v26  ;;  %4220 = vpow2.f32 %v2745_v24  ;;  %v2162_v20 = vld [vmem:[#allocation4 + $0xa8] sm:$0xff]  ;;  %v6244_v26 = vsub.f32 %v5631_v10, %v5642_v45  ;;  %v2371_v42 = vld [vmem:[#allocation2 + $0xa0] sm:$0xff] }
 0x85e   : > { %v2170_v7 = vmul.f32 %v4209_v22, %v2162_v20  ;;  %v2773_v22 = vsel %vm857_vm2, %v4219_v47, 0.0  ;;  %v6246_v10 = vsub.f32 %v5701_v13, %v5711_v33  ;;  %v3051_v13 = vld [vmem:[#allocation4 + $0x10] sm:$0xff]  ;;  %v3052_v33 = vld [vmem:[#allocation4 + $0x18] sm:$0xff]  ;;  %v3125_v20 = vld [vmem:[#allocation4 + $0x60] sm:$0xff] }
 0x85f   : > { %v2751_v21 = vmul.f32 1.442695, %v2736_v34  ;;  %2205 = vst.msk [vmem:[#allocation4 + $0x80] sm:$0xff] %vm475_vm1, %v2197_v11  ;;  %v2683_v24 = vmul.f32 1.442695, %v6244_v26  ;;  %v2373_v34 = vld [vmem:[#allocation2 + $0xb0] sm:$0xff] }
 0x860   : > { %v2722_v17 = vpop.permute.xlu1 %2721  ;;  %v2181_v60 = vpop.xlane.xlu0 %2180  ;;  %v2687_v45 = vmul.f32 1.442695, %v6246_v10 }
 0x861   : > { %4222 = vpow2.f32 %v2751_v21  ;;  %v2735_v53 = vsub.f32 %v5607_v23, %v2722_v17  ;;  %v2199_v48 = vadd.f32 %v2181_v60, %v2167_v35  ;;  %v2164_v23 = vld [vmem:[#allocation4 + $0xb8] sm:$0xff]  ;;  %v3049_v21 = vld [vmem:[#allocation4] sm:$0xff] }
 0x862   : > { %v2172_v12 = vmul.f32 %v4211_v61, %v2164_v23 }
 0x863   : > { %v2749_v25 = vmul.f32 1.442695, %v2735_v53  ;;  %2207 = vst.msk [vmem:[#allocation4 + $0x90] sm:$0xff] %vm475_vm1, %v2199_v48  ;;  %v3122_v53 = vld [vmem:[#allocation4 + $0x48] sm:$0xff] }
 0x864   : > { %v2817_v29 = vpop.permute.xlu1 %2816  ;;  %v2184_v19 = vpop.xlane.xlu0 %2183 }
 0x865   : > { %4224 = vpow2.f32 %v2749_v25  ;;  %v2200_v44 = vadd.f32 %v2184_v19, %v2168_v54  ;;  %4049 = vmatprep.subr.mxu0 %v2817_v29  ;;  %v3123_v25 = vld [vmem:[#allocation4 + $0x50] sm:$0xff] }
 0x866   : > { %4050 = vmatpush3.msra.mxu0 %v2817_v29  ;;  %4226 = vpow2.f32 %v2681_v37  ;;  %v3124_v29 = vld [vmem:[#allocation4 + $0x58] sm:$0xff] }
 0x867   : > { %2208 = vst.msk [vmem:[#allocation4 + $0x98] sm:$0xff] %vm475_vm1, %v2200_v44  ;;  %4051 = vmatprep.subr.mxu0 %v2815_v38  ;;  %4228 = vpow2.f32 %v2683_v24  ;;  %v2163_v24 = vld [vmem:[#allocation4 + $0xb0] sm:$0xff] }
 0x868   : > { %v2813_v50 = vpop.permute.xlu1 %2812  ;;  %4052 = vmatpush3.msra.mxu0 %v2815_v38  ;;  %v2190_v63 = vpop.xlane.xlu0 %2189  ;;  %4230 = vpow2.f32 %v2685_v27 }
 0x869   : > { %v2202_v49 = vadd.f32 %v2190_v63, %v2170_v7  ;;  %4053 = vmatprep.subr.mxu0 %v2813_v50  ;;  %4232 = vpow2.f32 %v2687_v45  ;;  %v3126_v7 = vld [vmem:[#allocation4 + $0x68] sm:$0xff]  ;;  %v3127_v63 = vld [vmem:[#allocation4 + $0x70] sm:$0xff] }
 0x86a   : > { %4054 = vmatpush3.msra.mxu0 %v2813_v50  ;;  %v4221_v16 = vpop.eup %4220  ;;  %4234 = vrcp.f32 %v3049_v21  ;;  %v6247_v21 = vld [vmem:[#allocation49_spill] sm:$0xff] }
 0x86b   : > { %2210 = vst.msk [vmem:[#allocation4 + $0xa8] sm:$0xff] %vm475_vm1, %v2202_v49  ;;  %4055 = vmatprep.subr.mxu0 %v2811_v6  ;;  %v2782_v61 = vsel %vm857_vm2, %v4221_v16, 0.0  ;;  %4236 = vrcp.f32 %v3050_v0  ;;  %v3128_v49 = vld [vmem:[#allocation4 + $0x78] sm:$0xff] }
 0x86c   : > { %4056 = vmatpush3.msra.mxu0 %v2811_v6  ;;  %v2196_v43 = vpop.xlane.xlu0 %2195  ;;  %4238 = vrcp.f32 %v3051_v13 }
 0x86d   : > { %v2204_v46 = vadd.f32 %v2196_v43, %v2172_v12  ;;  %4058 = vmatmul.mubr.msk.f32.vlgmr.msra.gmra.mxu0 %vm857_vm2, %v4219_v47  ;;  %4240 = vrcp.f32 %v3052_v33  ;;  %v3193_v12 = vld [vmem:[#allocation4 + $0x80] sm:$0xff]  ;;  %v2158_v43 = vld [vmem:[#allocation4 + $0x88] sm:$0xff] }
 0x86e   : > { %v4223_v36 = vpop.eup %4222  ;;  %2774 = vadd.xlane.f32.xlu1 %v2773_v22  ;;  %4060 = vmatprep.mubr.msk.f32.mxu0 %vm857_vm2, %v5801_v51 }
 0x86f   : > { %2212 = vst.msk [vmem:[#allocation4 + $0xb8] sm:$0xff] %vm475_vm1, %v2204_v46  ;;  %v2791_v38 = vsel %vm857_vm2, %v4223_v36, 0.0  ;;  %v2166_v46 = vmul.f32 %v5752_v59, %v2158_v43 }
 0x870   : > { %2792 = vadd.xlane.f32.xlu0 %v2791_v38 }
 0x871   : > { %4061 = vmatmul.mubr.msk.f32.gmra.mxu0 %vm857_vm2, %v5794_v3 }
 0x872   : > { %v4225_v6 = vpop.eup %4224  ;;  %2783 = vadd.xlane.f32.xlu1 %v2782_v61  ;;  %4063 = vmatprep.mubr.msk.f32.mxu0 %vm857_vm2, %v4221_v16  ;;  %v2161_v61 = vld [vmem:[#allocation4 + $0xa0] sm:$0xff] }
 0x873   : > { %v2788_v3 = vsel %vm857_vm2, %v4225_v6, 0.0  ;;  %v5866_v17 = vpop.eup %4226  ;;  %v2169_v37 = vmul.f32 %v5755_v55, %v2161_v61  ;;  %v3196_v55 = vld [vmem:[#allocation4 + $0x98] sm:$0xff]  ;;  %v2756_v61 = vld [vmem:[#allocation4 + $0xd0] sm:$0xff] }
 0x874   : > { %v2383_v51 = vpop.permute.xlu0 %2382  ;;  %v5868_v60 = vpop.eup %4228 }
 0x875   : > { %v2416_v58 = vmul.f32 %v2383_v51, %v2368_v2  ;;  %4064 = vmatmul.mubr.msk.f32.gmra.mxu0 %vm857_vm2, %v5808_v5 }
 0x876   : > { %2789 = vadd.xlane.f32.xlu1 %v2788_v3  ;;  %4066 = vmatprep.mubr.msk.f32.mxu0 %vm857_vm2, %v4225_v6  ;;  %v2171_v3 = vmul.f32 %v5758_v52, %v2163_v24  ;;  %v2367_v52 = vld [vmem:[#allocation2 + $0x80] sm:$0xff]  ;;  %v2764_v24 = vmul.f32 %v5821_v39, %v2756_v61 }
 0x877   : > { %v2424_v30 = vadd.f32 %v5554_v32, %v2416_v58 }
 0x878   : > { %v2398_v15 = vpop.permute.xlu0 %2397 }
 0x879   : > { %2432 = vst.msk [vmem:[#allocation2 + $0x88] sm:$0xff] %vm540_vm3, %v2424_v30  ;;  %v2419_v5 = vmul.f32 %v2398_v15, %v2371_v42  ;;  %4067 = vmatmul.mubr.msk.f32.gmra.mxu0 %vm857_vm2, %v4223_v36  ;;  %v3195_v36 = vld [vmem:[#allocation4 + $0x90] sm:$0xff]  ;;  %v1777_v15 = vld [vmem:[#allocation2 + $0x78] sm:$0xff] }
 0x87b   : > { %v2427_v11 = vadd.f32 %v2419_v5, %v5564_v8  ;;  %v3053_v8 = vld [vmem:[#allocation4 + $0x20] sm:$0xff] }
 0x87c   : > { %v2408_v32 = vpop.permute.xlu0 %2407  ;;  %4242 = vrcp.f32 %v3053_v8  ;;  %v2369_v8 = vld [vmem:[#allocation2 + $0x90] sm:$0xff] }
 0x87d   : > { %2435 = vst.msk [vmem:[#allocation2 + $0xa0] sm:$0xff] %vm540_vm3, %v2427_v11  ;;  %v2421_v31 = vmul.f32 %v2408_v32, %v2373_v34  ;;  %4244 = vrcp.f32 %v3121_v41  ;;  %v3198_v32 = vld [vmem:[#allocation4 + $0xa8] sm:$0xff] }
 0x87e   : > { %4246 = vrcp.f32 %v3122_v53  ;;  %v3200_v53 = vld [vmem:[#allocation4 + $0xb8] sm:$0xff] }
 0x87f   : > { %v2429_v35 = vadd.f32 %v2421_v31, %v5568_v9  ;;  %v5872_v9 = vpop.eup %4230  ;;  %4248 = vrcp.f32 %v3123_v25 }
 0x880   : > { %v5874_v48 = vpop.eup %4232  ;;  %4250 = vrcp.f32 %v3124_v29  ;;  %v5888_v29 = vpop.permute.xlu0 %2979 }
 0x881   : > { %2437 = vst.msk [vmem:[#allocation2 + $0xb0] sm:$0xff] %vm540_vm3, %v2429_v35  ;;  %v4235_v54 = vpop.eup %4234  ;;  %4252 = vrcp.f32 %v3125_v20  ;;  %v2754_v20 = vld [vmem:[#allocation4 + $0xc0] sm:$0xff] }
 0x882   : > { %v4237_v19 = vpop.eup %4236  ;;  %4254 = vrcp.f32 %v3126_v7 }
 0x883   : > { %v4239_v44 = vpop.eup %4238  ;;  %4256 = vrcp.f32 %v3127_v63 }
 0x884   : > { %v4241_v50 = vpop.eup %4240  ;;  %4258 = vrcp.f32 %v3128_v49  ;;  %v2372_v49 = vld [vmem:[#allocation2 + $0xa8] sm:$0xff] }
 0x885   : > { %4260 = vrcp.f32 %v3193_v12 }
 0x886   : > { %2994 = vperm.xlu0 %4104, %v5866_v17   ;;  %4262 = vrcp.f32 %v3195_v36 }
 0x887   : > { %2999 = vperm.xlu1 %4105, %v5868_v60  }
 0x889   : > { %v4243_v23 = vpop.eup %4242 }
 0x88a   : > { %3004 = vperm.xlu0 %4104, %v5872_v9   ;;  %v4245_v47 = vpop.eup %4244 }
 0x88b   : > { %3009 = vperm.xlu1 %4105, %v5874_v48   ;;  %v4247_v16 = vpop.eup %4246 }
 0x88c   : > { %v4249_v22 = vpop.eup %4248 }
 0x88d   : > { %v4251_v2 = vpop.eup %4250 }
 0x88e   : > { %3075 = vperm.xlu0 %4104, %v4235_v54   ;;  %v4253_v51 = vpop.eup %4252 }
 0x88f   : > { %3080 = vperm.xlu1 %4105, %v4237_v19   ;;  %v4255_v59 = vpop.eup %4254  ;;  %v2370_v19 = vld [vmem:[#allocation2 + $0x98] sm:$0xff] }
 0x890   : > { %v4257_v42 = vpop.eup %4256 }
 0x891   : > { %v4259_v10 = vpop.eup %4258 }
 0x892   : > { %3085 = vperm.xlu0 %4104, %v4239_v44   ;;  %v4261_v45 = vpop.eup %4260 }
 0x893   : > { %3090 = vperm.xlu1 %4105, %v4241_v50   ;;  %v4263_v0 = vpop.eup %4262 }
 0x896   : > { %3095 = vperm.xlu0 %4104, %v4243_v23  }
 0x897   : > { %3147 = vperm.xlu1 %4105, %v4245_v47   ;;  %v2757_v47 = vld [vmem:[#allocation4 + $0xd8] sm:$0xff] }
 0x898   : > { %v2765_v36 = vmul.f32 %v5818_v28, %v2757_v47  ;;  %v2759_v28 = vld [vmem:[#allocation4 + $0xe8] sm:$0xff]  ;;  %v3055_v47 = vld [vmem:[#allocation4 + $0x30] sm:$0xff] }
 0x89a   : > { %v2178_v38 = vpop.xlane.xlu1 %2177  ;;  %3152 = vperm.xlu0 %4104, %v4247_v16  }
 0x89b   : > { %v2198_v6 = vadd.f32 %v2178_v38, %v2166_v46  ;;  %3157 = vperm.xlu1 %4105, %v4249_v22  }
 0x89d   : > { %2206 = vst.msk [vmem:[#allocation4 + $0x88] sm:$0xff] %vm475_vm1, %v2198_v6 }
 0x89e   : > { %v2187_v26 = vpop.xlane.xlu1 %2186  ;;  %3162 = vperm.xlu0 %4104, %v4251_v2  }
 0x89f   : > { %v2201_v58 = vadd.f32 %v2187_v26, %v2169_v37  ;;  %3167 = vperm.xlu1 %4105, %v4253_v51  }
 0x8a1   : > { %2209 = vst.msk [vmem:[#allocation4 + $0xa0] sm:$0xff] %vm475_vm1, %v2201_v58 }
 0x8a2   : > { %v2193_v30 = vpop.xlane.xlu1 %2192  ;;  %3172 = vperm.xlu0 %4104, %v4255_v59  }
 0x8a3   : > { %v2203_v4 = vadd.f32 %v2193_v30, %v2171_v3  ;;  %3177 = vperm.xlu1 %4105, %v4257_v42  }
 0x8a4   : > { %v3194_v27 = vld [vmem:[#allocation4 + $0x88] sm:$0xff] }
 0x8a5   : > { %4264 = vrcp.f32 %v3194_v27  ;;  %2211 = vst.msk [vmem:[#allocation4 + $0xb0] sm:$0xff] %vm475_vm1, %v2203_v4 }
 0x8a6   : > { %v1816_v5 = vpop.permute.xlu1 %1815  ;;  %3182 = vperm.xlu0 %4104, %v4259_v10   ;;  %4266 = vrcp.f32 %v3196_v55 }
 0x8a7   : > { %v1825_v34 = vmul.f32 %v1816_v5, %v1777_v15  ;;  %3219 = vperm.xlu1 %4105, %v4261_v45   ;;  %v2755_v5 = vld [vmem:[#allocation4 + $0xc8] sm:$0xff] }
 0x8a8   : > { %v3197_v11 = vld [vmem:[#allocation4 + $0xa0] sm:$0xff] }
 0x8a9   : > { %4268 = vrcp.f32 %v3197_v11  ;;  %v1833_v31 = vadd.f32 %v6247_v21, %v1825_v34  ;;  %v2761_v34 = vld [vmem:[#allocation4 + $0xf8] sm:$0xff] }
 0x8aa   : > { %v2378_v35 = vpop.permute.xlu1 %2377  ;;  %4270 = vrcp.f32 %v3198_v32  ;;  %v2769_v21 = vmul.f32 %v5874_v48, %v2761_v34 }
 0x8ab   : > { %1841 = vst.msk [vmem:[#allocation2 + $0x78] sm:$0xff] %vm540_vm3, %v1833_v31  ;;  %v2415_v13 = vmul.f32 %v2378_v35, %v2367_v52  ;;  %3229 = vperm.xlu1 %4105, %v4263_v0   ;;  %v2758_v52 = vld [vmem:[#allocation4 + $0xe0] sm:$0xff] }
 0x8ac   : > { %v3199_v33 = vld [vmem:[#allocation4 + $0xb0] sm:$0xff]  ;;  %v2766_v35 = vmul.f32 %v5866_v17, %v2758_v52 }
 0x8ad   : > { %4272 = vrcp.f32 %v3199_v33  ;;  %v2423_v41 = vadd.f32 %v2415_v13, %v5556_v1  ;;  %v2762_v1 = vmul.f32 %v5815_v14, %v2754_v20  ;;  %v2374_v14 = vld [vmem:[#allocation2 + $0xb8] sm:$0xff]  ;;  %v2760_v33 = vld [vmem:[#allocation4 + $0xf0] sm:$0xff] }
 0x8ae   : > { %v2388_v25 = vpop.permute.xlu1 %2387  ;;  %4274 = vrcp.f32 %v3200_v53 }
 0x8af   : > { %2431 = vst.msk [vmem:[#allocation2 + $0x80] sm:$0xff] %vm540_vm3, %v2423_v41  ;;  %v2417_v54 = vmul.f32 %v2388_v25, %v2369_v8 }
 0x8b1   : > { %v2425_v44 = vadd.f32 %v2417_v54, %v5560_v18 }
 0x8b2   : > { %v4265_v7 = vpop.eup %4264  ;;  %v2393_v50 = vpop.permute.xlu1 %2392 }
 0x8b3   : > { %2433 = vst.msk [vmem:[#allocation2 + $0x90] sm:$0xff] %vm540_vm3, %v2425_v44  ;;  %v2418_v63 = vmul.f32 %v2393_v50, %v2370_v19  ;;  %3224 = vperm.xlu0 %4104, %v4265_v7   ;;  %v4267_v12 = vpop.eup %4266 }
 0x8b4   : > { %v2772_v23 = vpop.xlane.xlu0 %2771 }
 0x8b5   : > { %v2426_v43 = vadd.f32 %v5558_v40, %v2418_v63  ;;  %v2794_v16 = vadd.f32 %v2772_v23, %v2762_v1  ;;  %v3054_v63 = vld [vmem:[#allocation4 + $0x28] sm:$0xff] }
 0x8b6   : > { %v4269_v46 = vpop.eup %4268  ;;  %v2403_v22 = vpop.permute.xlu1 %2402 }
 0x8b7   : > { %2434 = vst.msk [vmem:[#allocation2 + $0x98] sm:$0xff] %vm540_vm3, %v2426_v43  ;;  %v2420_v18 = vmul.f32 %v2403_v22, %v2372_v49  ;;  %3239 = vperm.xlu1 %4105, %v4269_v46   ;;  %3234 = vperm.xlu0 %4104, %v4267_v12   ;;  %v4271_v6 = vpop.eup %4270  ;;  %v3056_v43 = vld [vmem:[#allocation4 + $0x38] sm:$0xff] }
 0x8b8   : > { %2802 = vst.msk [vmem:[#allocation4 + $0xc0] sm:$0xff] %vm475_vm1, %v2794_v16  ;;  %v2781_v38 = vpop.xlane.xlu0 %2780 }
 0x8b9   : > { %v2428_v2 = vadd.f32 %v5562_v57, %v2420_v18  ;;  %v2797_v37 = vadd.f32 %v2781_v38, %v2765_v36  ;;  %v2767_v57 = vmul.f32 %v5868_v60, %v2759_v28  ;;  %v2763_v60 = vmul.f32 %v5761_v62, %v2755_v5  ;;  %v3138_v28 = vld [vmem:[#allocation2 + $0x48] sm:$0xff] }
 0x8ba   : > { %v4273_v40 = vpop.eup %4272  ;;  %v2413_v51 = vpop.permute.xlu1 %2412  ;;  %v2768_v62 = vmul.f32 %v5872_v9, %v2760_v33  ;;  %v3142_v5 = vld [vmem:[#allocation2 + $0x68] sm:$0xff] }
 0x8bb   : > { %2436 = vst.msk [vmem:[#allocation2 + $0xa8] sm:$0xff] %vm540_vm3, %v2428_v2  ;;  %v2422_v26 = vmul.f32 %v2413_v51, %v2374_v14  ;;  %3249 = vperm.xlu1 %4105, %v4273_v40   ;;  %3244 = vperm.xlu0 %4104, %v4271_v6   ;;  %v4275_v42 = vpop.eup %4274 }
 0x8bc   : > { %2805 = vst.msk [vmem:[#allocation4 + $0xd8] sm:$0xff] %vm475_vm1, %v2797_v37  ;;  %v2778_v58 = vpop.xlane.xlu0 %2777 }
 0x8bd   : > { %v2430_v59 = vadd.f32 %v5566_v56, %v2422_v26  ;;  %v2796_v3 = vadd.f32 %v2778_v58, %v2764_v24  ;;  %v3137_v58 = vld [vmem:[#allocation2 + $0x40] sm:$0xff] }
 0x8be   : > { %v5906_v10 = vpop.permute.xlu1 %2974 }
 0x8bf   : > { %v3265_v30 = vld [vmem:[#allocation4 + $0xc0] sm:$0xff]  ;;  %2438 = vst.msk [vmem:[#allocation2 + $0xb8] sm:$0xff] %vm540_vm3, %v2430_v59  ;;  %3254 = vperm.xlu0 %4104, %v4275_v42  }
 0x8c0   : > { %4276 = vrcp.f32 %v3265_v30  ;;  %2804 = vst.msk [vmem:[#allocation4 + $0xd0] sm:$0xff] %vm475_vm1, %v2796_v3  ;;  %v2787_v4 = vpop.xlane.xlu0 %2786 }
 0x8c1   : > { %v2799_v27 = vadd.f32 %v2787_v4, %v2767_v57  ;;  %v3139_v57 = vld [vmem:[#allocation2 + $0x50] sm:$0xff]  ;;  %v3140_v4 = vld [vmem:[#allocation2 + $0x58] sm:$0xff] }
 0x8c2   : > { %v5908_v55 = vpop.permute.xlu1 %2989 }
 0x8c3   : > { %2807 = vst.msk [vmem:[#allocation4 + $0xe8] sm:$0xff] %vm475_vm1, %v2799_v27  ;;  %v3268_v48 = vld [vmem:[#allocation4 + $0xd8] sm:$0xff] }
 0x8c6   : > { %v5910_v45 = vpop.permute.xlu1 %2984 }
 0x8c7   : > { %v3267_v39 = vld [vmem:[#allocation4 + $0xd0] sm:$0xff] }
 0x8c8   : > { %4278 = vrcp.f32 %v3267_v39 }
 0x8ca   : > { %v3270_v44 = vld [vmem:[#allocation4 + $0xe8] sm:$0xff] }
 0x8cd   : > { %v4277_v15 = vpop.eup %4276 }
 0x8ce   : > { %3291 = vperm.xlu1 %4105, %v4277_v15   ;;  %v2965_v15 = vld [vmem:[#allocation2 + $0xc8] sm:$0xff] }
 0x8d5   : > { %v4279_v56 = vpop.eup %4278 }
 0x8d6   : > { %3301 = vperm.xlu1 %4105, %v4279_v56   ;;  %v3141_v56 = vld [vmem:[#allocation2 + $0x60] sm:$0xff] }
 0x8f7   : > { %v2775_v11 = vpop.xlane.xlu1 %2774 }
 0x8f8   : > { %v2795_v32 = vadd.f32 %v2775_v11, %v2763_v60 }
 0x8f9   : > { %v2793_v31 = vpop.xlane.xlu0 %2792 }
 0x8fa   : > { %2803 = vst.msk [vmem:[#allocation4 + $0xc8] sm:$0xff] %vm475_vm1, %v2795_v32  ;;  %v2801_v0 = vadd.f32 %v2793_v31, %v2769_v21  ;;  %v2964_v32 = vld [vmem:[#allocation2 + $0xc0] sm:$0xff]  ;;  %v3013_v21 = vmul.f32 %v5888_v29, %v2965_v15  ;;  %v2967_v31 = vld [vmem:[#allocation2 + $0xd8] sm:$0xff] }
 0x8fb   : > { %v2784_v13 = vpop.xlane.xlu1 %2783  ;;  %v3012_v33 = vmul.f32 %v5906_v10, %v2964_v32 }
 0x8fc   : > { %2809 = vst.msk [vmem:[#allocation4 + $0xf8] sm:$0xff] %vm475_vm1, %v2801_v0  ;;  %v2798_v8 = vadd.f32 %v2784_v13, %v2766_v35  ;;  %v3143_v0 = vld [vmem:[#allocation2 + $0x70] sm:$0xff]  ;;  %v3144_v35 = vld [vmem:[#allocation2 + $0x78] sm:$0xff] }
 0x8fe   : > { %2806 = vst.msk [vmem:[#allocation4 + $0xe0] sm:$0xff] %vm475_vm1, %v2798_v8 }
 0x8ff   : > { %v2790_v41 = vpop.xlane.xlu1 %2789 }
 0x900   : > { %v2800_v53 = vadd.f32 %v2790_v41, %v2768_v62 }
 0x901   : > { %v3266_v25 = vld [vmem:[#allocation4 + $0xc8] sm:$0xff]  ;;  %v5919_v54 = vpop.permute.xlu0 %2994 }
 0x902   : > { %4280 = vrcp.f32 %v3266_v25  ;;  %2808 = vst.msk [vmem:[#allocation4 + $0xf0] sm:$0xff] %vm475_vm1, %v2800_v53  ;;  %v2966_v25 = vld [vmem:[#allocation2 + $0xd0] sm:$0xff] }
 0x903   : > { %v5922_v19 = vpop.permute.xlu1 %2999  ;;  %4282 = vrcp.f32 %v3268_v48  ;;  %v3272_v1 = vld [vmem:[#allocation4 + $0xf8] sm:$0xff] }
 0x905   : > { %v3269_v17 = vld [vmem:[#allocation4 + $0xe0] sm:$0xff]  ;;  %v5924_v20 = vpop.permute.xlu0 %3004 }
 0x906   : > { %4284 = vrcp.f32 %v3269_v17  ;;  %v3015_v17 = vmul.f32 %v5908_v55, %v2967_v31 }
 0x907   : > { %v5926_v7 = vpop.permute.xlu1 %3009  ;;  %4286 = vrcp.f32 %v3270_v44 }
 0x909   : > { %v3271_v9 = vld [vmem:[#allocation4 + $0xf0] sm:$0xff]  ;;  %v5928_v50 = vpop.permute.xlu0 %3075 }
 0x90a   : > { %4288 = vrcp.f32 %v3271_v9  ;;  %v2969_v9 = vld [vmem:[#allocation2 + $0xe8] sm:$0xff] }
 0x90b   : > { %v5930_v23 = vpop.permute.xlu1 %3080  ;;  %4290 = vrcp.f32 %v3054_v63  ;;  %v3209_v63 = vld [vmem:[#allocation2 + $0x80] sm:$0xff] }
 0x90c   : > { %4292 = vrcp.f32 %v3272_v1  ;;  %v3210_v1 = vld [vmem:[#allocation2 + $0x88] sm:$0xff] }
 0x90d   : > { %v5932_v49 = vpop.permute.xlu0 %3085  ;;  %4294 = vrcp.f32 %v3055_v47  ;;  %v3014_v47 = vmul.f32 %v5910_v45, %v2966_v25  ;;  %v2971_v45 = vld [vmem:[#allocation2 + $0xf8] sm:$0xff] }
 0x90e   : > { %4296 = vrcp.f32 %v3056_v43 }
 0x90f   : > { %v4281_v12 = vpop.eup %4280  ;;  %v5934_v16 = vpop.permute.xlu1 %3090 }
 0x910   : > { %3296 = vperm.xlu0 %4104, %v4281_v12   ;;  %v4283_v46 = vpop.eup %4282 }
 0x911   : > { %v5936_v22 = vpop.permute.xlu0 %3095 }
 0x913   : > { %v4285_v18 = vpop.eup %4284  ;;  %v3148_v36 = vpop.permute.xlu1 %3147 }
 0x914   : > { %3306 = vperm.xlu0 %4104, %v4283_v46   ;;  %3311 = vperm.xlu1 %4105, %v4285_v18   ;;  %v4287_v38 = vpop.eup %4286  ;;  %v3185_v59 = vmul.f32 %v3148_v36, %v3137_v58  ;;  %v2968_v18 = vld [vmem:[#allocation2 + $0xe0] sm:$0xff]  ;;  %v2970_v58 = vld [vmem:[#allocation2 + $0xf0] sm:$0xff] }
 0x915   : > { %v3153_v61 = vpop.permute.xlu0 %3152 }
 0x916   : > { %v3186_v3 = vmul.f32 %v3153_v61, %v3138_v28 }
 0x917   : > { %v4289_v14 = vpop.eup %4288  ;;  %v3158_v6 = vpop.permute.xlu1 %3157 }
 0x918   : > { %3321 = vperm.xlu1 %4105, %v4289_v14   ;;  %3316 = vperm.xlu0 %4104, %v4287_v38   ;;  %v4291_v2 = vpop.eup %4290  ;;  %v3187_v27 = vmul.f32 %v3158_v6, %v3139_v57  ;;  %v3017_v38 = vmul.f32 %v5922_v19, %v2969_v9  ;;  %v3211_v6 = vld [vmem:[#allocation2 + $0x90] sm:$0xff]  ;;  %v3018_v57 = vmul.f32 %v5924_v20, %v2970_v58 }
 0x919   : > { %v4293_v37 = vpop.eup %4292  ;;  %v3163_v51 = vpop.permute.xlu0 %3162 }
 0x91a   : > { %v4295_v40 = vpop.eup %4294  ;;  %v3188_v39 = vmul.f32 %v3163_v51, %v3140_v4 }
 0x91b   : > { %v3168_v26 = vpop.permute.xlu1 %3167  ;;  %v4297_v24 = vpop.eup %4296 }
 0x91c   : > { %3100 = vperm.xlu1 %4105, %v4291_v2   ;;  %3326 = vperm.xlu0 %4104, %v4293_v37   ;;  %v3189_v34 = vmul.f32 %v3168_v26, %v3141_v56  ;;  %v3212_v2 = vld [vmem:[#allocation2 + $0x98] sm:$0xff] }
 0x91d   : > { %v3173_v42 = vpop.permute.xlu0 %3172 }
 0x91e   : > { %v3190_v60 = vmul.f32 %v3173_v42, %v3142_v5  ;;  %v3213_v42 = vld [vmem:[#allocation2 + $0xa0] sm:$0xff] }
 0x91f   : > { %v3178_v30 = vpop.permute.xlu1 %3177 }
 0x920   : > { %3110 = vperm.xlu1 %4105, %v4297_v24   ;;  %3105 = vperm.xlu0 %4104, %v4295_v40   ;;  %v3191_v8 = vmul.f32 %v3178_v30, %v3143_v0  ;;  %v3016_v40 = vmul.f32 %v5919_v54, %v2968_v18  ;;  %v3214_v30 = vld [vmem:[#allocation2 + $0xa8] sm:$0xff] }
 0x921   : > { %v3183_v11 = vpop.permute.xlu0 %3182 }
 0x922   : > { %v3192_v62 = vmul.f32 %v3183_v11, %v3144_v35 }
 0x923   : > { %v3220_v52 = vpop.permute.xlu1 %3219 }
 0x924   : > { %3345 = vrot.lane.b32.xlu0 %v3185_v59, %s4330_s14  ;;  %3347 = vrot.lane.b32.xlu1 %v3186_v3, %s4330_s14  ;;  %v3257_v12 = vmul.f32 %v3220_v52, %v3209_v63  ;;  %v3019_v59 = vmul.f32 %v5926_v7, %v2971_v45  ;;  %v3071_v45 = vld [vmem:[#allocation2 + $0x30] sm:$0xff] }
 0x927   : > { %v3230_v44 = vpop.permute.xlu1 %3229 }
 0x928   : > { %3349 = vrot.lane.b32.xlu0 %v3187_v27, %s4330_s14  ;;  %3351 = vrot.lane.b32.xlu1 %v3188_v39, %s4330_s14  ;;  %v3259_v51 = vmul.f32 %v3230_v44, %v3211_v6 }
 0x92c   : > { %3353 = vrot.lane.b32.xlu0 %v3189_v34, %s4330_s14  ;;  %3355 = vrot.lane.b32.xlu1 %v3190_v60, %s4330_s14  ;;  %v3215_v34 = vld [vmem:[#allocation2 + $0xb0] sm:$0xff]  ;;  %v3216_v60 = vld [vmem:[#allocation2 + $0xb8] sm:$0xff] }
 0x92d   : > { %v4059_v13 = vpop.f32.mrf.mxu0 }
 0x92e   : > { %v3021_v41 = vadd.f32 %v4059_v13, %v3013_v21  ;;  %v3225_v53 = vpop.permute.xlu0 %3224 }
 0x92f   : > { %v2924_v48 = vpop.f32.mrf.mxu0  ;;  %v3258_v43 = vmul.f32 %v3225_v53, %v3210_v1 }
 0x930   : > { %3029 = vst.msk [vmem:[#allocation2 + $0xc8] sm:$0xff] %vm540_vm3, %v3021_v41  ;;  %v3020_v29 = vadd.f32 %v3012_v33, %v2924_v48  ;;  %3357 = vrot.lane.b32.xlu0 %v3191_v8, %s4330_s14  ;;  %3359 = vrot.lane.b32.xlu1 %v3192_v62, %s4330_s14 }
 0x931   : > { %v4062_v10 = vpop.f32.mrf.mxu0 }
 0x932   : > { %3028 = vst.msk [vmem:[#allocation2 + $0xc0] sm:$0xff] %vm540_vm3, %v3020_v29  ;;  %v3023_v46 = vadd.f32 %v4062_v10, %v3015_v17  ;;  %v3235_v55 = vpop.permute.xlu0 %3234  ;;  %v3240_v14 = vpop.permute.xlu1 %3239 }
 0x933   : > { %v2934_v36 = vpop.f32.mrf.mxu0  ;;  %v3260_v26 = vmul.f32 %v3235_v55, %v3212_v2  ;;  %v3261_v4 = vmul.f32 %v3240_v14, %v3213_v42 }
 0x934   : > { %3031 = vst.msk [vmem:[#allocation2 + $0xd8] sm:$0xff] %vm540_vm3, %v3023_v46  ;;  %v3022_v61 = vadd.f32 %v3014_v47, %v2934_v36  ;;  %3377 = vrot.lane.b32.xlu0 %v3257_v12, %s4331_s15  ;;  %3379 = vrot.lane.b32.xlu1 %v3258_v43, %s4331_s15  ;;  %v3069_v36 = vld [vmem:[#allocation2 + $0x20] sm:$0xff] }
 0x935   : > { %v4065_v37 = vpop.f32.mrf.mxu0 }
 0x936   : > { %3030 = vst.msk [vmem:[#allocation2 + $0xd0] sm:$0xff] %vm540_vm3, %v3022_v61  ;;  %v3025_v19 = vadd.f32 %v4065_v37, %v3017_v38  ;;  %v3245_v24 = vpop.permute.xlu0 %3244  ;;  %v3250_v27 = vpop.permute.xlu1 %3249  ;;  %v3117_v38 = vmul.f32 %v5936_v22, %v3069_v36 }
 0x937   : > { %v2944_v28 = vpop.f32.mrf.mxu0  ;;  %v3262_v39 = vmul.f32 %v3245_v24, %v3214_v30  ;;  %v3263_v11 = vmul.f32 %v3250_v27, %v3215_v34  ;;  %v3282_v13 = vld [vmem:[#allocation2 + $0xc8] sm:$0xff]  ;;  %v3065_v24 = vld [vmem:[#allocation2] sm:$0xff] }
 0x938   : > { %3033 = vst.msk [vmem:[#allocation2 + $0xe8] sm:$0xff] %vm540_vm3, %v3025_v19  ;;  %v3024_v3 = vadd.f32 %v3016_v40, %v2944_v28  ;;  %3381 = vrot.lane.b32.xlu0 %v3259_v51, %s4331_s15  ;;  %3383 = vrot.lane.b32.xlu1 %v3260_v26, %s4331_s15  ;;  %v3113_v28 = vmul.f32 %v5928_v50, %v3065_v24 }
 0x939   : > { %v4068_v54 = vpop.f32.mrf.mxu0  ;;  %v3281_v20 = vld [vmem:[#allocation2 + $0xc0] sm:$0xff] }
 0x93a   : > { %3032 = vst.msk [vmem:[#allocation2 + $0xe0] sm:$0xff] %vm540_vm3, %v3024_v3  ;;  %v3027_v15 = vadd.f32 %v4068_v54, %v3019_v59  ;;  %v3255_v56 = vpop.permute.xlu0 %3254  ;;  %v5982_v3 = vld [vmem:[%s6068_s9] ss:$0 sm:$0xff] }
 0x93b   : > { %v2954_v7 = vpop.f32.mrf.mxu0  ;;  %v3264_v52 = vmul.f32 %v3255_v56, %v3216_v60  ;;  %v3284_v53 = vld [vmem:[#allocation2 + $0xd8] sm:$0xff]  ;;  %v5988_v54 = vld [vmem:[%s6069_s10] ss:$0 sm:$0xff] }
 0x93c   : > { %3035 = vst.msk [vmem:[#allocation2 + $0xf8] sm:$0xff] %vm540_vm3, %v3027_v15  ;;  %v3026_v5 = vadd.f32 %v3018_v57, %v2954_v7  ;;  %3385 = vrot.lane.b32.xlu0 %v3261_v4, %s4331_s15  ;;  %3387 = vrot.lane.b32.xlu1 %v3262_v39, %s4331_s15  ;;  %v3067_v57 = vld [vmem:[#allocation2 + $0x10] sm:$0xff] }
 0x93d   : > { %v3283_v31 = vld [vmem:[#allocation2 + $0xd0] sm:$0xff]  ;;  %v3115_v27 = vmul.f32 %v5932_v49, %v3067_v57 }
 0x93e   : > { %3034 = vst.msk [vmem:[#allocation2 + $0xf0] sm:$0xff] %vm540_vm3, %v3026_v5 }
 0x93f   : > { %v3286_v9 = vld [vmem:[#allocation2 + $0xe8] sm:$0xff] }
 0x940   : > { %3389 = vrot.lane.b32.xlu0 %v3263_v11, %s4331_s15  ;;  %3391 = vrot.lane.b32.xlu1 %v3264_v52, %s4331_s15 }
 0x941   : > { %v3285_v41 = vld [vmem:[#allocation2 + $0xe0] sm:$0xff] }
 0x943   : > { %v3288_v47 = vld [vmem:[#allocation2 + $0xf8] sm:$0xff] }
 0x945   : > { %v3287_v29 = vld [vmem:[#allocation2 + $0xf0] sm:$0xff] }
 0x949   : > { %v3292_v32 = vpop.permute.xlu1 %3291 }
 0x94a   : > { %v3329_v21 = vmul.f32 %v3292_v32, %v3281_v20 }
 0x94c   : > { %3409 = vrot.lane.b32.xlu0 %v3329_v21, %s4332_s16 }
 0x951   : > { %v3302_v0 = vpop.permute.xlu1 %3301 }
 0x952   : > { %v3331_v35 = vmul.f32 %v3302_v0, %v3283_v31 }
 0x954   : > { %3413 = vrot.lane.b32.xlu0 %v3331_v35, %s4332_s16 }
 0x98b   : > { %v3297_v33 = vpop.permute.xlu0 %3296 }
 0x98c   : > { %v3330_v8 = vmul.f32 %v3297_v33, %v3282_v13  ;;  %v3066_v13 = vld [vmem:[#allocation2 + $0x8] sm:$0xff] }
 0x98e   : > { %3411 = vrot.lane.b32.xlu1 %v3330_v8, %s4332_s16  ;;  %v3114_v8 = vmul.f32 %v5930_v23, %v3066_v13 }
 0x98f   : > { %v3312_v62 = vpop.permute.xlu1 %3311  ;;  %v3307_v25 = vpop.permute.xlu0 %3306 }
 0x990   : > { %v3333_v48 = vmul.f32 %v3312_v62, %v3285_v41  ;;  %v3332_v17 = vmul.f32 %v3307_v25, %v3284_v53  ;;  %v3068_v41 = vld [vmem:[#allocation2 + $0x18] sm:$0xff] }
 0x992   : > { %3417 = vrot.lane.b32.xlu0 %v3333_v48, %s4332_s16  ;;  %3415 = vrot.lane.b32.xlu1 %v3332_v17, %s4332_s16  ;;  %v3116_v48 = vmul.f32 %v5934_v16, %v3068_v41 }
 0x993   : > { %v3322_v44 = vpop.permute.xlu1 %3321  ;;  %v3317_v63 = vpop.permute.xlu0 %3316 }
 0x994   : > { %v3335_v1 = vmul.f32 %v3322_v44, %v3287_v29  ;;  %v3334_v10 = vmul.f32 %v3317_v63, %v3286_v9  ;;  %v3070_v9 = vld [vmem:[#allocation2 + $0x28] sm:$0xff] }
 0x996   : > { %3421 = vrot.lane.b32.xlu0 %v3335_v1, %s4332_s16  ;;  %3419 = vrot.lane.b32.xlu1 %v3334_v10, %s4332_s16 }
 0x997   : > { %v3327_v12 = vpop.permute.xlu0 %3326  ;;  %v3101_v5 = vpop.permute.xlu1 %3100 }
 0x998   : > { %v3336_v43 = vmul.f32 %v3327_v12, %v3288_v47  ;;  %v3118_v47 = vmul.f32 %v3101_v5, %v3070_v9 }
 0x99a   : > { %3423 = vrot.lane.b32.xlu1 %v3336_v43, %s4332_s16 }
 0x99b   : > { %v3106_v46 = vpop.permute.xlu0 %3105  ;;  %v3111_v11 = vpop.permute.xlu1 %3110 }
 0x99c   : > { %v3119_v6 = vmul.f32 %v3106_v46, %v3071_v45 }
 0x99f   : > { %v3346_v55 = vpop.permute.xlu0 %3345  ;;  %v3348_v52 = vpop.permute.xlu1 %3347 }
 0x9a0   : > { %v3433_v59 = vsel %vm540_vm3, %v3113_v28, %v3346_v55  ;;  %v3434_v62 = vsel %vm540_vm3, %v3114_v8, %v3348_v52 }
 0x9a3   : > { %v3350_v18 = vpop.permute.xlu0 %3349  ;;  %v3352_v20 = vpop.permute.xlu1 %3351 }
 0x9a4   : > { %v3435_v15 = vsel %vm540_vm3, %v3115_v27, %v3350_v18  ;;  %v3436_v29 = vsel %vm540_vm3, %v3116_v48, %v3352_v20  ;;  %v3072_v18 = vld [vmem:[#allocation2 + $0x38] sm:$0xff] }
 0x9a7   : > { %v3354_v14 = vpop.permute.xlu0 %3353  ;;  %v3356_v32 = vpop.permute.xlu1 %3355 }
 0x9a8   : > { %v3437_v61 = vsel %vm540_vm3, %v3117_v38, %v3354_v14  ;;  %v3438_v55 = vsel %vm540_vm3, %v3118_v47, %v3356_v32 }
 0x9ab   : > { %v3358_v2 = vpop.permute.xlu0 %3357  ;;  %v3360_v21 = vpop.permute.xlu1 %3359 }
 0x9ac   : > { %v3439_v37 = vsel %vm540_vm3, %v3119_v6, %v3358_v2  ;;  %v3120_v6 = vmul.f32 %v3111_v11, %v3072_v18 }
 0x9af   : > { %v3378_v40 = vpop.permute.xlu0 %3377  ;;  %v3380_v31 = vpop.permute.xlu1 %3379 }
 0x9b0   : > { %v3441_v42 = vsel %vm687_vm0, %v3433_v59, %v3378_v40  ;;  %v3442_v53 = vsel %vm687_vm0, %v3434_v62, %v3380_v31 }
 0x9b3   : > { %v3382_v51 = vpop.permute.xlu0 %3381  ;;  %v3384_v0 = vpop.permute.xlu1 %3383 }
 0x9b4   : > { %v3443_v56 = vsel %vm687_vm0, %v3435_v15, %v3382_v51  ;;  %v3444_v63 = vsel %vm687_vm0, %v3436_v29, %v3384_v0 }
 0x9b7   : > { %v3386_v26 = vpop.permute.xlu0 %3385  ;;  %v3388_v35 = vpop.permute.xlu1 %3387 }
 0x9b8   : > { %v3445_v19 = vsel %vm687_vm0, %v3437_v61, %v3386_v26  ;;  %v3446_v36 = vsel %vm687_vm0, %v3438_v55, %v3388_v35  ;;  %v3440_v26 = vsel %vm540_vm3, %v3120_v6, %v3360_v21 }
 0x9bb   : > { %v3390_v58 = vpop.permute.xlu0 %3389  ;;  %v3392_v33 = vpop.permute.xlu1 %3391 }
 0x9bc   : > { %v5976_v22 = vsel %vm687_vm0, %v3439_v37, %v3390_v58 }
 0x9bf   : > { %v3410_v30 = vpop.permute.xlu0 %3409 }
 0x9c0   : > { %v3450_v50 = vsel %vm3449_vm4, %v3441_v42, %v3410_v30 }
 0x9c1   : > { %v3464_v4 = vmul.f32 %v5982_v3, %v3450_v50 }
 0x9c3   : > { %v3478_v39 = vadd.f32 %v5988_v54, %v3464_v4 }
 0x9c5   : > { %3487 = vst.msk [vmem:[%s5997_s27] sm:$0xff] %vm3486_vm5, %v3478_v39 }
 0x9c6   : > { %v3414_v7 = vpop.permute.xlu0 %3413 }
 0x9c7   : > { %v3452_v49 = vsel %vm3449_vm4, %v3443_v56, %v3414_v7 }
 0x9c8   : > { %v3466_v34 = vmul.f32 %v5982_v3, %v3452_v49 }
 0x9ca   : > { %v3480_v60 = vadd.f32 %v5988_v54, %v3466_v34 }
 0x9cc   : > { %3489 = vst.msk [vmem:[%s5997_s27 + $0x10] sm:$0xff] %vm3486_vm5, %v3480_v60 }
 0xa00   : > { %v3412_v25 = vpop.permute.xlu1 %3411 }
 0xa01   : > { %v3451_v17 = vsel %vm3449_vm4, %v3442_v53, %v3412_v25 }
 0xa02   : > { %v3465_v44 = vmul.f32 %v5982_v3, %v3451_v17 }
 0xa04   : > { %v3479_v23 = vadd.f32 %v5988_v54, %v3465_v44  ;;  %v3416_v1 = vpop.permute.xlu1 %3415  ;;  %v3418_v10 = vpop.permute.xlu0 %3417 }
 0xa05   : > { %v3453_v12 = vsel %vm3449_vm4, %v3444_v63, %v3416_v1  ;;  %v3454_v16 = vsel %vm3449_vm4, %v3445_v19, %v3418_v10  ;;  %v3448_v19 = vsel %vm687_vm0, %v3440_v26, %v3392_v33 }
 0xa06   : > { %3488 = vst.msk [vmem:[%s5997_s27 + $0x8] sm:$0xff] %vm3486_vm5, %v3479_v23  ;;  %v3467_v43 = vmul.f32 %v5982_v3, %v3453_v12  ;;  %v3468_v46 = vmul.f32 %v5982_v3, %v3454_v16 }
 0xa08   : > { %v3481_v38 = vadd.f32 %v5988_v54, %v3467_v43  ;;  %v3482_v14 = vadd.f32 %v5988_v54, %v3468_v46  ;;  %v3420_v61 = vpop.permute.xlu1 %3419  ;;  %v3422_v45 = vpop.permute.xlu0 %3421 }
 0xa09   : > { %v3455_v2 = vsel %vm3449_vm4, %v3446_v36, %v3420_v61  ;;  %v3456_v37 = vsel %vm3449_vm4, %v5976_v22, %v3422_v45 }
 0xa0a   : > { %3490 = vst.msk [vmem:[%s5997_s27 + $0x18] sm:$0xff] %vm3486_vm5, %v3481_v38  ;;  %3491 = vst.msk [vmem:[%s5997_s27 + $0x20] sm:$0xff] %vm3486_vm5, %v3482_v14  ;;  %v3469_v40 = vmul.f32 %v5982_v3, %v3455_v2  ;;  %v3470_v51 = vmul.f32 %v5982_v3, %v3456_v37 }
 0xa0c   : > { %v3483_v24 = vadd.f32 %v5988_v54, %v3469_v40  ;;  %v3484_v58 = vadd.f32 %v5988_v54, %v3470_v51  ;;  %v3424_v28 = vpop.permute.xlu1 %3423 }
 0xa0d   : > { %v3457_v59 = vsel %vm3449_vm4, %v3448_v19, %v3424_v28 }
 0xa0e   : > { %3492 = vst.msk [vmem:[%s5997_s27 + $0x28] sm:$0xff] %vm3486_vm5, %v3483_v24  ;;  %3493 = vst.msk [vmem:[%s5997_s27 + $0x30] sm:$0xff] %vm3486_vm5, %v3484_v58  ;;  %v3471_v22 = vmul.f32 %v5982_v3, %v3457_v59 }
 0xa10   : > { %v3485_v42 = vadd.f32 %v5988_v54, %v3471_v22 }
 0xa12   : > { %3494 = vst.msk [vmem:[%s5997_s27 + $0x38] sm:$0xff] %vm3486_vm5, %v3485_v42 }
 0xa13 PF: > { %s21_s19 = sadd.s32 1, %s4320_s19   ;;  %s6248_s17 = smov %s4316_s18 }
 0xa14   : > { %p18_p5 = scmp.ge.s32.totalorder %s21_s19, 4   ;;  %s6249_s18 = smov %s6251_s20 }
 0xa16   :  { %20 = sbr.rel (!%p18_p5) target bundleno = 2 (0x2), region = 117 }

</bundles_post_ra>
